<compile_context>
chip_gen: v5e
topology: v5e:2x2
jax: 0.10.0
libtpu: 0.0.40
codegen_flags: <defaults>
</compile_context>

<pallas_src>
import functools

import jax
import jax.numpy as jnp
from jax.experimental import pallas as pl
from jax.experimental.pallas import tpu as pltpu


NUM_LAYERS = 2
EMBED_DIM = 128     # lane-dense (PyTorch default was 100; padded to a lane multiple)
NUM_NODES = 1024    # number of items / graph nodes
ROW_TILE = 256      # output-row tile (parallel grid axis)
COL_TILE = 256      # adjacency-column / reduction tile (arbitrary grid axis)
EPS = 1e-12         # F.normalize default eps


def itemconv_layer_kernel(adj_ref, feat_ref, w_ref, avgin_ref,
                          h_ref, avg_ref, acc_ref, *, inv, first):
    """One ItemConv layer for one output row tile.

    Grid: (num_row_tiles, num_col_tiles); the column axis is a reduction.

    adj_ref:   [TM, TK]  bf16  column-normalized adjacency tile
    feat_ref:  [TK, D]   bf16  current node features (column tile of rows)
    w_ref:     [D, D]    bf16  layer weight, pre-transposed (x @ w == x @ W.T)
    avgin_ref: [TM, D]   f32   running average (layer 0: the raw features)
    h_ref:     [TM, D]   bf16  propagated features -> next layer's input
    avg_ref:   [TM, D]   f32   updated running average
    acc_ref:   [TM, D]   f32   VMEM accumulator for A @ X over column tiles
    """
    k = pl.program_id(1)

    @pl.when(k == 0)
    def _():
        acc_ref[...] = jnp.zeros_like(acc_ref)

    # Partial message passing: A[i_tile, k_tile] @ X[k_tile]  (MXU, f32 accum).
    acc_ref[...] += jnp.dot(adj_ref[...], feat_ref[...],
                            preferred_element_type=jnp.float32)

    @pl.when(k == pl.num_programs(1) - 1)
    def _():
        # Linear(bias=False), reassociated:  A @ (X @ W) == (A @ X) @ W
        h = jnp.dot(acc_ref[...].astype(jnp.bfloat16), w_ref[...],
                    preferred_element_type=jnp.float32)
        # F.normalize(h, p=2, dim=1): h / max(||h||, eps) == h * rsqrt(max(||h||^2, eps^2))
        sumsq = jnp.sum(h * h, axis=-1, keepdims=True)
        normed = h * jax.lax.rsqrt(jnp.maximum(sumsq, EPS * EPS))
        if first:
            avg_ref[...] = avgin_ref[...] * inv + normed * inv
        else:
            avg_ref[...] = avgin_ref[...] + normed * inv
        h_ref[...] = h.astype(h_ref.dtype)


def _itemconv_layer(adj_bf16, feats_bf16, w_bf16, avg_in, *, first, inv,
                    row_tile, col_tile):
    """Run one layer: returns (propagated features bf16, updated average f32)."""
    n, d = avg_in.shape
    assert n % row_tile == 0 and n % col_tile == 0
    grid = (n // row_tile, n // col_tile)
    kernel = functools.partial(itemconv_layer_kernel, inv=inv, first=first)
    return pl.pallas_call(
        kernel,
        out_shape=(jax.ShapeDtypeStruct((n, d), jnp.bfloat16),   # propagated feats
                   jax.ShapeDtypeStruct((n, d), jnp.float32)),   # running average
        grid_spec=pltpu.PrefetchScalarGridSpec(
            num_scalar_prefetch=0,
            grid=grid,
            in_specs=[
                pl.BlockSpec((row_tile, col_tile), lambda i, k: (i, k)),  # adjacency tile
                pl.BlockSpec((col_tile, d), lambda i, k: (k, 0)),         # feature col tile
                pl.BlockSpec((d, d), lambda i, k: (0, 0)),                # weight (resident)
                pl.BlockSpec((row_tile, d), lambda i, k: (i, 0)),         # avg in (row tile)
            ],
            out_specs=[
                pl.BlockSpec((row_tile, d), lambda i, k: (i, 0)),         # h out
                pl.BlockSpec((row_tile, d), lambda i, k: (i, 0)),         # avg out
            ],
            scratch_shapes=[pltpu.VMEM((row_tile, d), jnp.float32)],
        ),
        compiler_params=pltpu.CompilerParams(
            dimension_semantics=("parallel", "arbitrary"),
            vmem_limit_bytes=32 * 1024 * 1024,
        ),
    )(adj_bf16, feats_bf16, w_bf16, avg_in)


def item_conv_forward(features, adj_norm, weights_t, *, num_layers=NUM_LAYERS,
                      row_tile=ROW_TILE, col_tile=COL_TILE):
    """features [N, D] f32, adj_norm [N, N] f32, weights_t [L, D, D] f32
    (weights already transposed so the layer computes x @ weights_t[i])."""
    inv = 1.0 / (num_layers + 1)
    adj_bf16 = adj_norm.astype(jnp.bfloat16)     # MXU inputs in bf16, f32 accumulate
    w_bf16 = weights_t.astype(jnp.bfloat16)
    feats = features.astype(jnp.bfloat16)
    avg = features                                # layer 0 scales this in-kernel
    for layer in range(num_layers):
        feats, avg = _itemconv_layer(adj_bf16, feats, w_bf16[layer], avg,
                                     first=(layer == 0), inv=inv,
                                     row_tile=row_tile, col_tile=col_tile)
    return avg


def build_normalized_adj(key, n):
    """Reproduce the graph.setter preprocessing on a dense random adjacency:
    adj_t = A^T with unit edge weights, fill_diag(., 1.0),
    deg = column sums, adj_norm = adj_t * deg_inv (broadcast over columns)."""
    a = (jax.random.uniform(key, (n, n)) < 0.05).astype(jnp.float32)
    adj_t = a.T
    eye = jnp.eye(n, dtype=jnp.float32)
    adj_t = adj_t * (1.0 - eye) + eye             # fill_diag(adj_t, 1.0)
    deg = adj_t.sum(axis=0)                       # sparsesum(adj_t, dim=0)
    deg_inv = jnp.where(deg == 0.0, 0.0, 1.0 / deg)
    return adj_t * deg_inv[None, :]               # mul(adj_t, deg_inv.view(1,-1))


def reference_forward_matched(features, adj_norm, weights_t, num_layers):
    """Plain-JAX reference mirroring the kernel's precision policy
    (bf16 matmul inputs, f32 accumulation, (A @ X) @ W association)."""
    inv = 1.0 / (num_layers + 1)
    adj = adj_norm.astype(jnp.bfloat16)
    feats = features.astype(jnp.bfloat16)
    w = weights_t.astype(jnp.bfloat16)
    avg = features * inv
    for i in range(num_layers):
        t = jnp.dot(adj, feats, preferred_element_type=jnp.float32)
        h = jnp.dot(t.astype(jnp.bfloat16), w[i],
                    preferred_element_type=jnp.float32)
        sumsq = jnp.sum(h * h, axis=-1, keepdims=True)
        avg = avg + h * jax.lax.rsqrt(jnp.maximum(sumsq, EPS * EPS)) * inv
        feats = h.astype(jnp.bfloat16)
    return avg


def reference_forward_f32(features, adj_norm, weights_t, num_layers):
    """Faithful f32 mirror of the PyTorch forward (original op order)."""
    avg = features / (num_layers + 1)
    h = features
    for i in range(num_layers):
        h = h @ weights_t[i]
        h = adj_norm @ h
        norm = jnp.sqrt(jnp.sum(h * h, axis=-1, keepdims=True))
        avg = avg + (h / jnp.maximum(norm, EPS)) / (num_layers + 1)
    return avg


if __name__ == "__main__":
    key = jax.random.PRNGKey(0)
    k_adj, k_feat, k_w = jax.random.split(key, 3)

    n, d, l = NUM_NODES, EMBED_DIM, NUM_LAYERS

    adj_norm = build_normalized_adj(k_adj, n)
    features = jax.random.normal(k_feat, (n, d), dtype=jnp.float32)

    # Deterministic Linear(bias=False) weights ~ U(-1/sqrt(D), 1/sqrt(D)),
    # stored pre-transposed so the kernel computes x @ wt[i] (== x @ W_i.T).
    bound = 1.0 / jnp.sqrt(jnp.float32(d))
    w = jax.random.uniform(k_w, (l, d, d), dtype=jnp.float32,
                           minval=-bound, maxval=bound)
    weights_t = jnp.transpose(w, (0, 2, 1))

    fwd = jax.jit(functools.partial(item_conv_forward, num_layers=l))
    out = jax.block_until_ready(fwd(features, adj_norm, weights_t))

    assert out.shape == (n, d) and out.dtype == jnp.float32

    # Tight check vs. a precision-matched reference (same bf16/f32 policy).
    ref_matched = reference_forward_matched(features, adj_norm, weights_t, l)
    assert jnp.allclose(out, ref_matched, atol=1e-3, rtol=1e-3)

    # Loose check vs. the faithful f32 reference (difference is only bf16
    # rounding of the MXU inputs; accumulation stays f32).
    ref_f32 = reference_forward_f32(features, adj_norm, weights_t, l)
    assert jnp.allclose(out, ref_f32, atol=5e-2, rtol=5e-2)

    print("KERNEL_OK")
</pallas_src>

<mosaic_0001>
module attributes {stable_mosaic.version = 11 : i64} {
  func.func @itemconv_layer_kernel(%arg0: i32, %arg1: i32, %arg2: memref<256x256xbf16, #tpu.memory_space<vmem>>, %arg3: memref<256x128xbf16, #tpu.memory_space<vmem>>, %arg4: memref<128x128xbf16, #tpu.memory_space<vmem>>, %arg5: memref<256x128xf32, #tpu.memory_space<vmem>>, %arg6: memref<256x128xbf16, #tpu.memory_space<vmem>>, %arg7: memref<256x128xf32, #tpu.memory_space<vmem>>, %arg8: memref<256x128xf32, #tpu.memory_space<vmem>>) attributes {dimension_semantics = [#tpu.dimension_semantics<parallel>, #tpu.dimension_semantics<arbitrary>], iteration_bounds = array<i64: 4, 4>, scalar_prefetch = 0 : i64, scratch_operands = 1 : i64, tpu.core_type = #tpu.core_type<tc>, window_params = [{transform_indices = @transform_0, window_bounds = array<i64: 256, 256>}, {transform_indices = @transform_1, window_bounds = array<i64: 256, 128>}, {pipeline_mode = #tpu.pipeline_mode<synchronous>, transform_indices = @transform_2, window_bounds = array<i64: 128, 128>}, {transform_indices = @transform_3, window_bounds = array<i64: 256, 128>}, {transform_indices = @transform_4, window_bounds = array<i64: 256, 128>}, {transform_indices = @transform_5, window_bounds = array<i64: 256, 128>}]} {
    %c0_i32 = arith.constant 0 : i32
    %0 = arith.cmpi eq, %arg1, %c0_i32 : i32
    %1 = arith.extui %0 : i1 to i32
    %c0_i32_0 = arith.constant 0 : i32
    %2 = arith.cmpi ne, %1, %c0_i32_0 : i32
    scf.if %2 {
      %cst_9 = arith.constant 0.000000e+00 : f32
      %12 = vector.broadcast %cst_9 : f32 to vector<256x128xf32>
      %c0_10 = arith.constant 0 : index
      %c0_11 = arith.constant 0 : index
      %13 = vector.load %arg8[%c0_10, %c0_11] : memref<256x128xf32, #tpu.memory_space<vmem>>, vector<256x128xf32>
      tpu.vector_store %arg8[%c0_10, %c0_11], %12 {strides = array<i32>} : memref<256x128xf32, #tpu.memory_space<vmem>>, vector<256x128xf32>,
    } else {
    }
    %c0 = arith.constant 0 : index
    %c0_1 = arith.constant 0 : index
    %3 = vector.load %arg8[%c0, %c0_1] : memref<256x128xf32, #tpu.memory_space<vmem>>, vector<256x128xf32>
    %c0_2 = arith.constant 0 : index
    %c0_3 = arith.constant 0 : index
    %4 = vector.load %arg2[%c0_2, %c0_3] : memref<256x256xbf16, #tpu.memory_space<vmem>>, vector<256x256xbf16>
    %c0_4 = arith.constant 0 : index
    %c0_5 = arith.constant 0 : index
    %5 = vector.load %arg3[%c0_4, %c0_5] : memref<256x128xbf16, #tpu.memory_space<vmem>>, vector<256x128xbf16>
    %cst = arith.constant dense<0.000000e+00> : vector<256x128xf32>
    %6 = tpu.matmul %4, %5, %cst {dimension_numbers = #tpu.dot_dimension_numbers<[1], [0], [0], [1], [0, 0, 1, 1], [], []>} : vector<256x256xbf16>, vector<256x128xbf16>, vector<256x128xf32> -> vector<256x128xf32>
    %7 = arith.addf %3, %6 : vector<256x128xf32>
    %c0_6 = arith.constant 0 : index
    %c0_7 = arith.constant 0 : index
    %8 = vector.load %arg8[%c0_6, %c0_7] : memref<256x128xf32, #tpu.memory_space<vmem>>, vector<256x128xf32>
    tpu.vector_store %arg8[%c0_6, %c0_7], %7 {strides = array<i32>} : memref<256x128xf32, #tpu.memory_space<vmem>>, vector<256x128xf32>,
    %c3_i32 = arith.constant 3 : i32
    %9 = arith.cmpi eq, %arg1, %c3_i32 : i32
    %10 = arith.extui %9 : i1 to i32
    %c0_i32_8 = arith.constant 0 : i32
    %11 = arith.cmpi ne, %10, %c0_i32_8 : i32
    scf.if %11 {
      %c0_9 = arith.constant 0 : index
      %c0_10 = arith.constant 0 : index
      %12 = vector.load %arg8[%c0_9, %c0_10] : memref<256x128xf32, #tpu.memory_space<vmem>>, vector<256x128xf32>
      %13 = arith.truncf %12 : vector<256x128xf32> to vector<256x128xbf16>
      %c0_11 = arith.constant 0 : index
      %c0_12 = arith.constant 0 : index
      %14 = vector.load %arg4[%c0_11, %c0_12] : memref<128x128xbf16, #tpu.memory_space<vmem>>, vector<128x128xbf16>
      %cst_13 = arith.constant dense<0.000000e+00> : vector<256x128xf32>
      %15 = tpu.matmul %13, %14, %cst_13 {dimension_numbers = #tpu.dot_dimension_numbers<[1], [0], [0], [1], [0, 0, 1, 1], [], []>} : vector<256x128xbf16>, vector<128x128xbf16>, vector<256x128xf32> -> vector<256x128xf32>
      %16 = arith.mulf %15, %15 : vector<256x128xf32>
      %cst_14 = arith.constant dense<0.000000e+00> : vector<256xf32>
      %17 = vector.multi_reduction <add>, %16, %cst_14 [1] : vector<256x128xf32> to vector<256xf32>
      %18 = vector.shape_cast %17 : vector<256xf32> to vector<256x1xf32>
      %cst_15 = arith.constant 1.000000e-24 : f32
      %19 = vector.broadcast %cst_15 : f32 to vector<256x1xf32>
      %20 = arith.maximumf %18, %19 : vector<256x1xf32>
      %21 = math.rsqrt %20 : vector<256x1xf32>
      %22 = vector.broadcast %21 : vector<256x1xf32> to vector<256x128xf32>
      %23 = arith.mulf %15, %22 : vector<256x128xf32>
      %c0_16 = arith.constant 0 : index
      %c0_17 = arith.constant 0 : index
      %24 = vector.load %arg5[%c0_16, %c0_17] : memref<256x128xf32, #tpu.memory_space<vmem>>, vector<256x128xf32>
      %cst_18 = arith.constant 0.333333343 : f32
      %25 = vector.broadcast %cst_18 : f32 to vector<256x128xf32>
      %26 = arith.mulf %23, %25 : vector<256x128xf32>
      %27 = arith.addf %24, %26 : vector<256x128xf32>
      %c0_19 = arith.constant 0 : index
      %c0_20 = arith.constant 0 : index
      %28 = vector.load %arg7[%c0_19, %c0_20] : memref<256x128xf32, #tpu.memory_space<vmem>>, vector<256x128xf32>
      tpu.vector_store %arg7[%c0_19, %c0_20], %27 {strides = array<i32>} : memref<256x128xf32, #tpu.memory_space<vmem>>, vector<256x128xf32>,
      %29 = arith.truncf %15 : vector<256x128xf32> to vector<256x128xbf16>
      %c0_21 = arith.constant 0 : index
      %c0_22 = arith.constant 0 : index
      %30 = vector.load %arg6[%c0_21, %c0_22] : memref<256x128xbf16, #tpu.memory_space<vmem>>, vector<256x128xbf16>
      tpu.vector_store %arg6[%c0_21, %c0_22], %29 {strides = array<i32>} : memref<256x128xbf16, #tpu.memory_space<vmem>>, vector<256x128xbf16>,
    } else {
    }
    return
  }
  func.func @transform_0(%arg0: i32, %arg1: i32) -> (i32, i32) {
    %c0_i32 = arith.constant 0 : i32
    return %arg0, %arg1 : i32, i32
  }
  func.func @transform_1(%arg0: i32, %arg1: i32) -> (i32, i32) {
    %c0_i32 = arith.constant 0 : i32
    %c0_i32_0 = arith.constant 0 : i32
    return %arg1, %c0_i32 : i32, i32
  }
  func.func @transform_2(%arg0: i32, %arg1: i32) -> (i32, i32) {
    %c0_i32 = arith.constant 0 : i32
    %c0_i32_0 = arith.constant 0 : i32
    %c0_i32_1 = arith.constant 0 : i32
    return %c0_i32, %c0_i32_0 : i32, i32
  }
  func.func @transform_3(%arg0: i32, %arg1: i32) -> (i32, i32) {
    %c0_i32 = arith.constant 0 : i32
    %c0_i32_0 = arith.constant 0 : i32
    return %arg0, %c0_i32 : i32, i32
  }
  func.func @transform_4(%arg0: i32, %arg1: i32) -> (i32, i32) {
    %c0_i32 = arith.constant 0 : i32
    %c0_i32_0 = arith.constant 0 : i32
    return %arg0, %c0_i32 : i32, i32
  }
  func.func @transform_5(%arg0: i32, %arg1: i32) -> (i32, i32) {
    %c0_i32 = arith.constant 0 : i32
    %c0_i32_0 = arith.constant 0 : i32
    return %arg0, %c0_i32 : i32, i32
  }
}

module attributes {stable_mosaic.version = 11 : i64} {
  func.func @itemconv_layer_kernel(%arg0: i32, %arg1: i32, %arg2: memref<256x256xbf16, #tpu.memory_space<vmem>>, %arg3: memref<256x128xbf16, #tpu.memory_space<vmem>>, %arg4: memref<128x128xbf16, #tpu.memory_space<vmem>>, %arg5: memref<256x128xf32, #tpu.memory_space<vmem>>, %arg6: memref<256x128xbf16, #tpu.memory_space<vmem>>, %arg7: memref<256x128xf32, #tpu.memory_space<vmem>>, %arg8: memref<256x128xf32, #tpu.memory_space<vmem>>) attributes {dimension_semantics = [#tpu.dimension_semantics<parallel>, #tpu.dimension_semantics<arbitrary>], iteration_bounds = array<i64: 4, 4>, scalar_prefetch = 0 : i64, scratch_operands = 1 : i64, tpu.core_type = #tpu.core_type<tc>, window_params = [{transform_indices = @transform_0, window_bounds = array<i64: 256, 256>}, {transform_indices = @transform_1, window_bounds = array<i64: 256, 128>}, {pipeline_mode = #tpu.pipeline_mode<synchronous>, transform_indices = @transform_2, window_bounds = array<i64: 128, 128>}, {transform_indices = @transform_3, window_bounds = array<i64: 256, 128>}, {transform_indices = @transform_4, window_bounds = array<i64: 256, 128>}, {transform_indices = @transform_5, window_bounds = array<i64: 256, 128>}]} {
    %c0_i32 = arith.constant 0 : i32
    %0 = arith.cmpi eq, %arg1, %c0_i32 : i32
    %1 = arith.extui %0 : i1 to i32
    %c0_i32_0 = arith.constant 0 : i32
    %2 = arith.cmpi ne, %1, %c0_i32_0 : i32
    scf.if %2 {
      %cst_9 = arith.constant 0.000000e+00 : f32
      %12 = vector.broadcast %cst_9 : f32 to vector<256x128xf32>
      %c0_10 = arith.constant 0 : index
      %c0_11 = arith.constant 0 : index
      %13 = vector.load %arg8[%c0_10, %c0_11] : memref<256x128xf32, #tpu.memory_space<vmem>>, vector<256x128xf32>
      tpu.vector_store %arg8[%c0_10, %c0_11], %12 {strides = array<i32>} : memref<256x128xf32, #tpu.memory_space<vmem>>, vector<256x128xf32>,
    } else {
    }
    %c0 = arith.constant 0 : index
    %c0_1 = arith.constant 0 : index
    %3 = vector.load %arg8[%c0, %c0_1] : memref<256x128xf32, #tpu.memory_space<vmem>>, vector<256x128xf32>
    %c0_2 = arith.constant 0 : index
    %c0_3 = arith.constant 0 : index
    %4 = vector.load %arg2[%c0_2, %c0_3] : memref<256x256xbf16, #tpu.memory_space<vmem>>, vector<256x256xbf16>
    %c0_4 = arith.constant 0 : index
    %c0_5 = arith.constant 0 : index
    %5 = vector.load %arg3[%c0_4, %c0_5] : memref<256x128xbf16, #tpu.memory_space<vmem>>, vector<256x128xbf16>
    %cst = arith.constant dense<0.000000e+00> : vector<256x128xf32>
    %6 = tpu.matmul %4, %5, %cst {dimension_numbers = #tpu.dot_dimension_numbers<[1], [0], [0], [1], [0, 0, 1, 1], [], []>} : vector<256x256xbf16>, vector<256x128xbf16>, vector<256x128xf32> -> vector<256x128xf32>
    %7 = arith.addf %3, %6 : vector<256x128xf32>
    %c0_6 = arith.constant 0 : index
    %c0_7 = arith.constant 0 : index
    %8 = vector.load %arg8[%c0_6, %c0_7] : memref<256x128xf32, #tpu.memory_space<vmem>>, vector<256x128xf32>
    tpu.vector_store %arg8[%c0_6, %c0_7], %7 {strides = array<i32>} : memref<256x128xf32, #tpu.memory_space<vmem>>, vector<256x128xf32>,
    %c3_i32 = arith.constant 3 : i32
    %9 = arith.cmpi eq, %arg1, %c3_i32 : i32
    %10 = arith.extui %9 : i1 to i32
    %c0_i32_8 = arith.constant 0 : i32
    %11 = arith.cmpi ne, %10, %c0_i32_8 : i32
    scf.if %11 {
      %c0_9 = arith.constant 0 : index
      %c0_10 = arith.constant 0 : index
      %12 = vector.load %arg8[%c0_9, %c0_10] : memref<256x128xf32, #tpu.memory_space<vmem>>, vector<256x128xf32>
      %13 = arith.truncf %12 : vector<256x128xf32> to vector<256x128xbf16>
      %c0_11 = arith.constant 0 : index
      %c0_12 = arith.constant 0 : index
      %14 = vector.load %arg4[%c0_11, %c0_12] : memref<128x128xbf16, #tpu.memory_space<vmem>>, vector<128x128xbf16>
      %cst_13 = arith.constant dense<0.000000e+00> : vector<256x128xf32>
      %15 = tpu.matmul %13, %14, %cst_13 {dimension_numbers = #tpu.dot_dimension_numbers<[1], [0], [0], [1], [0, 0, 1, 1], [], []>} : vector<256x128xbf16>, vector<128x128xbf16>, vector<256x128xf32> -> vector<256x128xf32>
      %16 = arith.mulf %15, %15 : vector<256x128xf32>
      %cst_14 = arith.constant dense<0.000000e+00> : vector<256xf32>
      %17 = vector.multi_reduction <add>, %16, %cst_14 [1] : vector<256x128xf32> to vector<256xf32>
      %18 = vector.shape_cast %17 : vector<256xf32> to vector<256x1xf32>
      %cst_15 = arith.constant 1.000000e-24 : f32
      %19 = vector.broadcast %cst_15 : f32 to vector<256x1xf32>
      %20 = arith.maximumf %18, %19 : vector<256x1xf32>
      %21 = math.rsqrt %20 : vector<256x1xf32>
      %22 = vector.broadcast %21 : vector<256x1xf32> to vector<256x128xf32>
      %23 = arith.mulf %15, %22 : vector<256x128xf32>
      %c0_16 = arith.constant 0 : index
      %c0_17 = arith.constant 0 : index
      %24 = vector.load %arg5[%c0_16, %c0_17] : memref<256x128xf32, #tpu.memory_space<vmem>>, vector<256x128xf32>
      %cst_18 = arith.constant 0.333333343 : f32
      %25 = vector.broadcast %cst_18 : f32 to vector<256x128xf32>
      %26 = arith.mulf %24, %25 : vector<256x128xf32>
      %cst_19 = arith.constant 0.333333343 : f32
      %27 = vector.broadcast %cst_19 : f32 to vector<256x128xf32>
      %28 = arith.mulf %23, %27 : vector<256x128xf32>
      %29 = arith.addf %26, %28 : vector<256x128xf32>
      %c0_20 = arith.constant 0 : index
      %c0_21 = arith.constant 0 : index
      %30 = vector.load %arg7[%c0_20, %c0_21] : memref<256x128xf32, #tpu.memory_space<vmem>>, vector<256x128xf32>
      tpu.vector_store %arg7[%c0_20, %c0_21], %29 {strides = array<i32>} : memref<256x128xf32, #tpu.memory_space<vmem>>, vector<256x128xf32>,
      %31 = arith.truncf %15 : vector<256x128xf32> to vector<256x128xbf16>
      %c0_22 = arith.constant 0 : index
      %c0_23 = arith.constant 0 : index
      %32 = vector.load %arg6[%c0_22, %c0_23] : memref<256x128xbf16, #tpu.memory_space<vmem>>, vector<256x128xbf16>
      tpu.vector_store %arg6[%c0_22, %c0_23], %31 {strides = array<i32>} : memref<256x128xbf16, #tpu.memory_space<vmem>>, vector<256x128xbf16>,
    } else {
    }
    return
  }
  func.func @transform_0(%arg0: i32, %arg1: i32) -> (i32, i32) {
    %c0_i32 = arith.constant 0 : i32
    return %arg0, %arg1 : i32, i32
  }
  func.func @transform_1(%arg0: i32, %arg1: i32) -> (i32, i32) {
    %c0_i32 = arith.constant 0 : i32
    %c0_i32_0 = arith.constant 0 : i32
    return %arg1, %c0_i32 : i32, i32
  }
  func.func @transform_2(%arg0: i32, %arg1: i32) -> (i32, i32) {
    %c0_i32 = arith.constant 0 : i32
    %c0_i32_0 = arith.constant 0 : i32
    %c0_i32_1 = arith.constant 0 : i32
    return %c0_i32, %c0_i32_0 : i32, i32
  }
  func.func @transform_3(%arg0: i32, %arg1: i32) -> (i32, i32) {
    %c0_i32 = arith.constant 0 : i32
    %c0_i32_0 = arith.constant 0 : i32
    return %arg0, %c0_i32 : i32, i32
  }
  func.func @transform_4(%arg0: i32, %arg1: i32) -> (i32, i32) {
    %c0_i32 = arith.constant 0 : i32
    %c0_i32_0 = arith.constant 0 : i32
    return %arg0, %c0_i32 : i32, i32
  }
  func.func @transform_5(%arg0: i32, %arg1: i32) -> (i32, i32) {
    %c0_i32 = arith.constant 0 : i32
    %c0_i32_0 = arith.constant 0 : i32
    return %arg0, %c0_i32 : i32, i32
  }
}

</mosaic_0001>

<bundles_post_ra>
// kernel: item_conv_forward.3
= control target key start
LH: loop header
LB: loop body
LE: loop exit
PB: predicated region body
PF: predicated region fallthrough
CT: control target
= control target key end

     0   :  { %s3989_s0 = inlined_call_operand.vmem [shape: bf16[1024,1024], index: 0, kind: input, shape index: {}]   ;;  %s3990_s1 = inlined_call_operand.vmem [shape: bf16[1024,128], index: 1, kind: input, shape index: {}]   ;;  %s3991_s2 = inlined_call_operand.vmem [shape: bf16[128,128], index: 2, kind: input, shape index: {}]   ;;  %s3992_s3 = inlined_call_operand.vmem [shape: f32[1024,128], index: 3, kind: input, shape index: {}]   ;;  %s3993_s4 = inlined_call_operand.hbm [shape: bf16[1024,128], index: 4, kind: output, shape index: {0}]   ;;  %s3994_s5 = inlined_call_operand.hbm [shape: f32[1024,128], index: 5, kind: output, shape index: {1}]  }
   0x1   :  { %4000 = sst [smem:[#allocation16_spill]] %s3989_s0 }
   0x2   :  { %11 = vsyncpa [#allocation5], 0 }
   0x3   :  { %13 = vsyncpa [#allocation5 + $0x1], 0 }
   0x4   :  { %14 = vsyncpa [#allocation7], 0 }
   0x5   :  { %16 = vsyncpa [#allocation7 + $0x1], 0  ;;  %s2928_s18 = smov 0   ;;  %s2930_s19 = smov 0  }
   0x6   :  { %s2932_s20 = smov 0   ;;  %s2934_s21 = smov 0  }
   0x7   :  { %s2936_s22 = smov 0   ;;  %s2938_s23 = smov 0  }
   0x8   :  { %s2940_s24 = smov 0   ;;  %s2942_s25 = smov 0  }
   0x9   :  { %s2944_s26 = smov 0   ;;  %s2946_s27 = smov 0  }
   0xa LB: > { %4001 = sst [smem:[#allocation10_spill]] %s2871_s22  ;;  %s2143_s28 = sadd.s32 4294967295, %s2891_s27   ;;  %s2891_s27 = sphi %s2946_s27, %s22_s27   ;;  %s2887_s26 = sphi %s2944_s26, %s4016_s26   ;;  %s2883_s25 = sphi %s2942_s25, %s4015_s25   ;;  %s2879_s24 = sphi %s2940_s24, %s4014_s24   ;;  %s2875_s23 = sphi %s2938_s23, %s4013_s23   ;;  %s2871_s22 = sphi %s2936_s22, %s4012_s22   ;;  %s2867_s21 = sphi %s2934_s21, %s4011_s21   ;;  %s2863_s20 = sphi %s2932_s20, %s4019_s20   ;;  %s2859_s19 = sphi %s2930_s19, %s4018_s19   ;;  %s2855_s18 = sphi %s2928_s18, %s4017_s18  }
   0xb   : > { %4002 = sst [smem:[#allocation11_spill]] %s2883_s25  ;;  %s2144_s29 = sadd.s32 4294967294, %s2891_s27  }
   0xc   : > { %4003 = sst [smem:[#allocation12_spill]] %s2887_s26  ;;  %s31_s30 = sadd.s32 1, %s2883_s25 }
   0xd   : > { %s34_s6 = sadd.s32 1, %s2887_s26  ;;  %p32_p0 = scmp.ge.s32.totalorder %s31_s30, 4 }
   0xe   : > { %s43_s7 = sadd.s32 1, %s2871_s22  ;;  %p50_p1 = scmp.ne.s32.totalorder %s2871_s22, %s2867_s21 }
   0xf   : > { %p51_p2 = scmp.eq.s32.totalorder %s2891_s27, 0  ;;  %s4021_s30 = smov (%p32_p0, %s31_s30), 0 }
  0x10   : > { %4004 = sst [smem:[#allocation13_spill]] %s4021_s30  ;;  %s4023_s6 = smov (!%p32_p0, %s34_s6), %s2887_s26 }
  0x11   : > { %s39_s8 = ssub.s32 %s2883_s25, %s4021_s30  ;;  %p2991_p3 = por %p51_p2, %p50_p1 }
  0x12   : > { %p36_p4 = scmp.ge.s32.totalorder %s4023_s6, 4  ;;  %s142_s10 = sadd.s32 1, %s2863_s20 }
  0x13   : > { %p152_p5 = scmp.ne.s32.totalorder %s2863_s20, %s2859_s19  ;;  %p153_p6 = scmp.eq.s32.totalorder %s2143_s28, 15 }
  0x14   : > { %s4025_s6 = smov (%p36_p4, %s4023_s6), 0  ;;  %p158_p8 = scmp.ne.s32.totalorder %s2859_s19, %s2855_s18 }
  0x15   : > { %4006 = sst [smem:[#allocation14_spill]] %s4025_s6  ;;  %p3000_p7 = por %p153_p6, %p152_p5 }
  0x16   : > { %s38_s12 = ssub.s32 %s2887_s26, %s4025_s6  ;;  %p159_p9 = scmp.eq.s32.totalorder %s2144_s29, 15 }
  0x17   : > { %s40_s13 = sor.u32 %s39_s8, %s38_s12  ;;  %p140_p10 = scmp.eq.s32.totalorder %s38_s12, 0 }
  0x18   : > { %p41_p11 = scmp.eq.s32.totalorder %s40_s13, 0  ;;  %p3008_p12 = por %p159_p9, %p158_p8 }
  0x19   : > { %s3013_s15 = scalar_select %p140_p10, %s2863_s20, %s142_s10  }
  0x1a   : > { %s3016_s16 = scalar_select %p41_p11, %s2871_s22, %s43_s7  }
  0x1b   : > { %p2146_p13 = scmp.ge.s32.totalorder %s2891_s27, 16 }
  0x1c   : > { %4009 = sst [smem:[#allocation15_spill]] %s3016_s16 }
  0x1d   : > { %204 = sbr.rel (%p2146_p13) target bundleno = 76 (0x4c), region = 20 }
  0x22   : > { %207 = sbr.rel (!%p2991_p3) target bundleno = 76 (0x4c), region = 24  ;;  %s209_s17 = sand.u32 (%p2991_p3), 1, %s2871_s22  }
  0x23   : > { %s2149_s28 = sshll.u32 (%p2991_p3), %s2883_s25, 1  ;;  %s2147_s29 = sshll.u32 (%p2991_p3), %s209_s17, 8 }
  0x24   : > { %s2394_s8 = sshll.u32 (%p2991_p3), %s2887_s26, 8  ;;  %s4010_s0 = sld [smem:[#allocation16_spill]] (%p2991_p3) }
  0x25   : > { %s215_s12 = sadd.s32 (%p2991_p3), %s2394_s8, %s2149_s28  ;;  %s3032_s9 = scalar_lea.vmem (%p2991_p3), [#allocation3], %s2147_s29 }
  0x26   : > { %s2151_s13 = sshll.u32 (%p2991_p3), %s215_s12, 2 }
  0x2a   : > { %s3027_s7 = scalar_lea.vmem %s4010_s0, %s2151_s13 }
  0x2b   : > { %v308_v0 = vld [vmem:[%s3027_s7] sm:$0xff] }
  0x2c   : > { %v310_v1 = vld [vmem:[%s3027_s7 + $0x20] sm:$0xff]  ;;  %309 = vst [vmem:[%s3032_s9] sm:$0xff] %v308_v0 }
  0x2d   : > { %v312_v2 = vld [vmem:[%s3027_s7 + $0x40] sm:$0xff]  ;;  %311 = vst [vmem:[%s3032_s9 + $0x8] sm:$0xff] %v310_v1 }
  0x2e   : > { %v314_v3 = vld [vmem:[%s3027_s7 + $0x60] sm:$0xff]  ;;  %313 = vst [vmem:[%s3032_s9 + $0x10] sm:$0xff] %v312_v2 }
  0x2f   : > { %v316_v4 = vld [vmem:[%s3027_s7 + $0x80] sm:$0xff]  ;;  %315 = vst [vmem:[%s3032_s9 + $0x18] sm:$0xff] %v314_v3 }
  0x30   : > { %v318_v5 = vld [vmem:[%s3027_s7 + $0xa0] sm:$0xff]  ;;  %317 = vst [vmem:[%s3032_s9 + $0x20] sm:$0xff] %v316_v4 }
  0x31   : > { %v320_v6 = vld [vmem:[%s3027_s7 + $0xc0] sm:$0xff]  ;;  %319 = vst [vmem:[%s3032_s9 + $0x28] sm:$0xff] %v318_v5 }
  0x32   : > { %v322_v7 = vld [vmem:[%s3027_s7 + $0xe0] sm:$0xff]  ;;  %321 = vst [vmem:[%s3032_s9 + $0x30] sm:$0xff] %v320_v6 }
  0x33   : > { %v324_v8 = vld [vmem:[%s3027_s7 + $0x100] sm:$0xff]  ;;  %323 = vst [vmem:[%s3032_s9 + $0x38] sm:$0xff] %v322_v7 }
  0x34   : > { %v326_v9 = vld [vmem:[%s3027_s7 + $0x120] sm:$0xff]  ;;  %325 = vst [vmem:[%s3032_s9 + $0x40] sm:$0xff] %v324_v8 }
  0x35   : > { %v328_v10 = vld [vmem:[%s3027_s7 + $0x140] sm:$0xff]  ;;  %327 = vst [vmem:[%s3032_s9 + $0x48] sm:$0xff] %v326_v9 }
  0x36   : > { %v330_v11 = vld [vmem:[%s3027_s7 + $0x160] sm:$0xff]  ;;  %329 = vst [vmem:[%s3032_s9 + $0x50] sm:$0xff] %v328_v10 }
  0x37   : > { %v332_v12 = vld [vmem:[%s3027_s7 + $0x180] sm:$0xff]  ;;  %331 = vst [vmem:[%s3032_s9 + $0x58] sm:$0xff] %v330_v11 }
  0x38   : > { %v334_v13 = vld [vmem:[%s3027_s7 + $0x1a0] sm:$0xff]  ;;  %333 = vst [vmem:[%s3032_s9 + $0x60] sm:$0xff] %v332_v12 }
  0x39   : > { %v336_v14 = vld [vmem:[%s3027_s7 + $0x1c0] sm:$0xff]  ;;  %335 = vst [vmem:[%s3032_s9 + $0x68] sm:$0xff] %v334_v13 }
  0x3a   : > { %v338_v15 = vld [vmem:[%s3027_s7 + $0x1e0] sm:$0xff]  ;;  %337 = vst [vmem:[%s3032_s9 + $0x70] sm:$0xff] %v336_v14 }
  0x3b   : > { %v340_v16 = vld [vmem:[%s3027_s7 + $0x200] sm:$0xff]  ;;  %339 = vst [vmem:[%s3032_s9 + $0x78] sm:$0xff] %v338_v15 }
  0x3c   : > { %v342_v17 = vld [vmem:[%s3027_s7 + $0x220] sm:$0xff]  ;;  %341 = vst [vmem:[%s3032_s9 + $0x80] sm:$0xff] %v340_v16 }
  0x3d   : > { %v344_v18 = vld [vmem:[%s3027_s7 + $0x240] sm:$0xff]  ;;  %343 = vst [vmem:[%s3032_s9 + $0x88] sm:$0xff] %v342_v17 }
  0x3e   : > { %v346_v19 = vld [vmem:[%s3027_s7 + $0x260] sm:$0xff]  ;;  %345 = vst [vmem:[%s3032_s9 + $0x90] sm:$0xff] %v344_v18 }
  0x3f   : > { %v348_v20 = vld [vmem:[%s3027_s7 + $0x280] sm:$0xff]  ;;  %347 = vst [vmem:[%s3032_s9 + $0x98] sm:$0xff] %v346_v19 }
  0x40   : > { %v350_v21 = vld [vmem:[%s3027_s7 + $0x2a0] sm:$0xff]  ;;  %349 = vst [vmem:[%s3032_s9 + $0xa0] sm:$0xff] %v348_v20 }
  0x41   : > { %v352_v22 = vld [vmem:[%s3027_s7 + $0x2c0] sm:$0xff]  ;;  %351 = vst [vmem:[%s3032_s9 + $0xa8] sm:$0xff] %v350_v21 }
  0x42   : > { %v354_v23 = vld [vmem:[%s3027_s7 + $0x2e0] sm:$0xff]  ;;  %353 = vst [vmem:[%s3032_s9 + $0xb0] sm:$0xff] %v352_v22 }
  0x43   : > { %v356_v24 = vld [vmem:[%s3027_s7 + $0x300] sm:$0xff]  ;;  %355 = vst [vmem:[%s3032_s9 + $0xb8] sm:$0xff] %v354_v23 }
  0x44   : > { %v358_v25 = vld [vmem:[%s3027_s7 + $0x320] sm:$0xff]  ;;  %357 = vst [vmem:[%s3032_s9 + $0xc0] sm:$0xff] %v356_v24 }
  0x45   : > { %v360_v26 = vld [vmem:[%s3027_s7 + $0x340] sm:$0xff]  ;;  %359 = vst [vmem:[%s3032_s9 + $0xc8] sm:$0xff] %v358_v25 }
  0x46   : > { %v362_v27 = vld [vmem:[%s3027_s7 + $0x360] sm:$0xff]  ;;  %361 = vst [vmem:[%s3032_s9 + $0xd0] sm:$0xff] %v360_v26 }
  0x47   : > { %v364_v28 = vld [vmem:[%s3027_s7 + $0x380] sm:$0xff]  ;;  %363 = vst [vmem:[%s3032_s9 + $0xd8] sm:$0xff] %v362_v27 }
  0x48   : > { %v366_v29 = vld [vmem:[%s3027_s7 + $0x3a0] sm:$0xff]  ;;  %365 = vst [vmem:[%s3032_s9 + $0xe0] sm:$0xff] %v364_v28 }
  0x49   : > { %v368_v30 = vld [vmem:[%s3027_s7 + $0x3c0] sm:$0xff]  ;;  %367 = vst [vmem:[%s3032_s9 + $0xe8] sm:$0xff] %v366_v29 }
  0x4a   : > { %v370_v31 = vld [vmem:[%s3027_s7 + $0x3e0] sm:$0xff]  ;;  %369 = vst [vmem:[%s3032_s9 + $0xf0] sm:$0xff] %v368_v30 }
  0x4b   : > { %371 = vst [vmem:[%s3032_s9 + $0xf8] sm:$0xff] %v370_v31 }
  0x4c PF: > { %p2152_p0 = scmp.ge.s32.totalorder %s2891_s27, 1  ;;  %p394_p1 = scmp.lt.s32.totalorder %s2891_s27, 17 }
  0x4e   : > { %p395_p2 = pnand %p2152_p0, %p394_p1 }
  0x4f   : > { %s401_s6 = sand.u32 (!%p395_p2), 1, %s2867_s21   ;;  %s3099_s17 = sand.u32 (!%p395_p2), 1, %s2859_s19  }
  0x50   : > { %398 = sbr.rel (%p395_p2) target bundleno = 850 (0x352), region = 70  ;;  %s2153_s28 = sshll.u32 (!%p395_p2), %s401_s6, 8 }
  0x51   : > { %s2154_s29 = sshll.u32 (!%p395_p2), %s3099_s17, 7  ;;  %s2155_s8 = sshll.u32 (!%p395_p2), %s3099_s17, 8 }
  0x52   : > { %s2156_s12 = sshll.u32 (!%p395_p2), %s2875_s23, 5  ;;  %s2158_s13 = sshll.u32 (!%p395_p2), %s2879_s24, 5 }
  0x53   : > { %p446_p3 = scmp.lt.s32.totalorder (!%p395_p2), %s2156_s12, 127  ;;  %p452_p4 = scmp.lt.s32.totalorder (!%p395_p2), %s2158_s13, 127 }
  0x54   : > { %s3115_s6 = scalar_lea.vmem (!%p395_p2), [#allocation3], %s2153_s28  ;;  %s3117_s16 = scalar_lea.vmem (!%p395_p2), [#allocation4], %s2154_s29 }
  0x55   : > { %s4027_s12 = smov (!%p446_p3, %s2156_s12), 127  ;;  %s4029_s13 = smov (!%p452_p4, %s2158_s13), 127 }
  0x56   : > { %s2157_s10 = sshll.u32 %s4027_s12, 2  ;;  %s2159_s21 = sshll.u32 %s4029_s13, 3 }
  0x57   : > { %s3108_s0 = scalar_lea.vmem %s3990_s1, %s2157_s10  ;;  %s3113_s25 = scalar_lea.vmem %s3992_s3, %s2159_s21 }
  0x58   : > { %s3119_s22 = scalar_lea.vmem [#allocation6], %s2155_s8  ;;  %p2160_p5 = scmp.ne.s32.totalorder %s2875_s23, 0 }
  0x5a   : > { %462 = sbr.rel (%p2160_p5) target bundleno = 128 (0x80), region = 78 }
  0x5f   : > { %v2893_v32 = vmov 0.0  }
  0x60   : > { %463 = vst [vmem:[#allocation2 + $0xb0] sm:$0xff] %v2893_v32 }
  0x61   : > { %464 = vst [vmem:[#allocation2] sm:$0xff] %v2893_v32 }
  0x62   : > { %465 = vst [vmem:[#allocation2 + $0xd8] sm:$0xff] %v2893_v32 }
  0x63   : > { %466 = vst [vmem:[#allocation2 + $0x18] sm:$0xff] %v2893_v32 }
  0x64   : > { %467 = vst [vmem:[#allocation2 + $0x50] sm:$0xff] %v2893_v32 }
  0x65   : > { %468 = vst [vmem:[#allocation2 + $0x68] sm:$0xff] %v2893_v32 }
  0x66   : > { %469 = vst [vmem:[#allocation2 + $0x30] sm:$0xff] %v2893_v32 }
  0x67   : > { %470 = vst [vmem:[#allocation2 + $0x48] sm:$0xff] %v2893_v32 }
  0x68   : > { %471 = vst [vmem:[#allocation2 + $0x80] sm:$0xff] %v2893_v32 }
  0x69   : > { %472 = vst [vmem:[#allocation2 + $0x88] sm:$0xff] %v2893_v32 }
  0x6a   : > { %473 = vst [vmem:[#allocation2 + $0xe8] sm:$0xff] %v2893_v32 }
  0x6b   : > { %474 = vst [vmem:[#allocation2 + $0xb8] sm:$0xff] %v2893_v32 }
  0x6c   : > { %475 = vst [vmem:[#allocation2 + $0x60] sm:$0xff] %v2893_v32 }
  0x6d   : > { %476 = vst [vmem:[#allocation2 + $0xf0] sm:$0xff] %v2893_v32 }
  0x6e   : > { %477 = vst [vmem:[#allocation2 + $0x8] sm:$0xff] %v2893_v32 }
  0x6f   : > { %478 = vst [vmem:[#allocation2 + $0x78] sm:$0xff] %v2893_v32 }
  0x70   : > { %479 = vst [vmem:[#allocation2 + $0x38] sm:$0xff] %v2893_v32 }
  0x71   : > { %480 = vst [vmem:[#allocation2 + $0x58] sm:$0xff] %v2893_v32 }
  0x72   : > { %481 = vst [vmem:[#allocation2 + $0x40] sm:$0xff] %v2893_v32 }
  0x73   : > { %482 = vst [vmem:[#allocation2 + $0xc8] sm:$0xff] %v2893_v32 }
  0x74   : > { %483 = vst [vmem:[#allocation2 + $0xe0] sm:$0xff] %v2893_v32 }
  0x75   : > { %484 = vst [vmem:[#allocation2 + $0x90] sm:$0xff] %v2893_v32 }
  0x76   : > { %485 = vst [vmem:[#allocation2 + $0x70] sm:$0xff] %v2893_v32 }
  0x77   : > { %486 = vst [vmem:[#allocation2 + $0xc0] sm:$0xff] %v2893_v32 }
  0x78   : > { %487 = vst [vmem:[#allocation2 + $0xa8] sm:$0xff] %v2893_v32 }
  0x79   : > { %488 = vst [vmem:[#allocation2 + $0xd0] sm:$0xff] %v2893_v32 }
  0x7a   : > { %489 = vst [vmem:[#allocation2 + $0x10] sm:$0xff] %v2893_v32 }
  0x7b   : > { %490 = vst [vmem:[#allocation2 + $0x28] sm:$0xff] %v2893_v32 }
  0x7c   : > { %491 = vst [vmem:[#allocation2 + $0xa0] sm:$0xff] %v2893_v32 }
  0x7d   : > { %492 = vst [vmem:[#allocation2 + $0xf8] sm:$0xff] %v2893_v32 }
  0x7e   : > { %493 = vst [vmem:[#allocation2 + $0x20] sm:$0xff] %v2893_v32 }
  0x7f   : > { %494 = vst [vmem:[#allocation2 + $0x98] sm:$0xff] %v2893_v32 }
  0x80 PF: > { %v2434_v33 = vld [vmem:[%s3108_s0 + $0x38] sm:$0xff]  ;;  %v2433_v35 = vld [vmem:[%s3108_s0 + $0x30] sm:$0xff]  ;;  %v2432_v37 = vld [vmem:[%s3108_s0 + $0x28] sm:$0xff]  ;;  %p2353_p6 = scmp.ne.s32.totalorder %s2875_s23, 3 }
  0x81   : > { %v2442_v34 = vld [vmem:[%s3108_s0 + $0x78] sm:$0xff]  ;;  %847 = vmatpush.bf16.msra.mxu0 %v2434_v33  ;;  %2548 = vmatpush.bf16.msra.mxu2 %v2434_v33  ;;  %v2441_v36 = vld [vmem:[%s3108_s0 + $0x70] sm:$0xff]  ;;  %v2440_v38 = vld [vmem:[%s3108_s0 + $0x68] sm:$0xff] }
  0x82   : > { %936 = vmatpush.bf16.msra.mxu1 %v2442_v34  ;;  %2556 = vmatpush.bf16.msra.mxu3 %v2442_v34  ;;  %v2431_v39 = vld [vmem:[%s3108_s0 + $0x20] sm:$0xff]  ;;  %v2430_v41 = vld [vmem:[%s3108_s0 + $0x18] sm:$0xff]  ;;  %v2429_v43 = vld [vmem:[%s3108_s0 + $0x10] sm:$0xff] }
  0x83   : > { %v2439_v40 = vld [vmem:[%s3108_s0 + $0x60] sm:$0xff]  ;;  %v2438_v42 = vld [vmem:[%s3108_s0 + $0x58] sm:$0xff]  ;;  %v2437_v44 = vld [vmem:[%s3108_s0 + $0x50] sm:$0xff] }
  0x84   : > { %v2428_v45 = vld [vmem:[%s3108_s0 + $0x8] sm:$0xff]  ;;  %v2427_v47 = vld [vmem:[%s3108_s0] sm:$0xff]  ;;  %v2171_v61 = vld [vmem:[%s3115_s6 + $0x10] sm:$0xf] }
  0x85   : > { %848 = vmatpush.bf16.msra.mxu0 %v2433_v35  ;;  %2549 = vmatpush.bf16.msra.mxu2 %v2433_v35  ;;  %v2436_v46 = vld [vmem:[%s3108_s0 + $0x48] sm:$0xff]  ;;  %v2435_v48 = vld [vmem:[%s3108_s0 + $0x40] sm:$0xff]  ;;  %v2398_v62 = vld [vmem:[%s3115_s6 + $0x14] sm:$0xf0] }
  0x86   : > { %937 = vmatpush.bf16.msra.mxu1 %v2441_v36  ;;  %2557 = vmatpush.bf16.msra.mxu3 %v2441_v36  ;;  %v2163_v49 = vld [vmem:[%s3115_s6] sm:$0xf]  ;;  %v2396_v50 = vld [vmem:[%s3115_s6 + $0x4] sm:$0xf0]  ;;  %v2395_v53 = vld [vmem:[%s3115_s6 + $0x4] sm:$0xf]  ;;  %v2172_v5 = vor.u32 %v2398_v62, %v2171_v61 }
  0x87   : > { %v2227_v51 = vld [vmem:[%s3115_s6 + $0x80] sm:$0xf]  ;;  %v2412_v52 = vld [vmem:[%s3115_s6 + $0x84] sm:$0xf0]  ;;  %v2165_v54 = vld [vmem:[%s3115_s6 + $0x8] sm:$0xf0]  ;;  %v2164_v57 = vor.u32 %v2396_v50, %v2163_v49 }
  0x88   : > { %v2411_v55 = vld [vmem:[%s3115_s6 + $0x84] sm:$0xf]  ;;  %v2229_v56 = vld [vmem:[%s3115_s6 + $0x88] sm:$0xf0]  ;;  %v2228_v58 = vor.u32 %v2412_v52, %v2227_v51  ;;  %v2168_v59 = vor.u32 %v2395_v53, %v2165_v54  ;;  %v2235_v63 = vld [vmem:[%s3115_s6 + $0x90] sm:$0xf] }
  0x89   : > { %849 = vmatpush.bf16.msra.mxu0 %v2432_v37  ;;  %2550 = vmatpush.bf16.msra.mxu2 %v2432_v37  ;;  %v2232_v60 = vor.u32 %v2411_v55, %v2229_v56  ;;  %v2414_v0 = vld [vmem:[%s3115_s6 + $0x94] sm:$0xf0]  ;;  %v2397_v1 = vld [vmem:[%s3115_s6 + $0x14] sm:$0xf]  ;;  %v2173_v2 = vld [vmem:[%s3115_s6 + $0x18] sm:$0xf0] }
  0x8a   : > { %938 = vmatpush.bf16.msra.mxu1 %v2440_v38  ;;  %2558 = vmatpush.bf16.msra.mxu3 %v2440_v38  ;;  %v2413_v3 = vld [vmem:[%s3115_s6 + $0x94] sm:$0xf]  ;;  %v2237_v4 = vld [vmem:[%s3115_s6 + $0x98] sm:$0xf0]  ;;  %v2236_v6 = vor.u32 %v2414_v0, %v2235_v63  ;;  %v2176_v7 = vor.u32 %v2397_v1, %v2173_v2  ;;  %v2179_v9 = vld [vmem:[%s3115_s6 + $0x20] sm:$0xf] }
  0x8b   : > { %v2240_v8 = vor.u32 %v2413_v3, %v2237_v4  ;;  %v2400_v10 = vld [vmem:[%s3115_s6 + $0x24] sm:$0xf0]  ;;  %v2243_v11 = vld [vmem:[%s3115_s6 + $0xa0] sm:$0xf]  ;;  %v2399_v13 = vld [vmem:[%s3115_s6 + $0x24] sm:$0xf] }
  0x8c   : > { %v2416_v12 = vld [vmem:[%s3115_s6 + $0xa4] sm:$0xf0]  ;;  %v2181_v14 = vld [vmem:[%s3115_s6 + $0x28] sm:$0xf0]  ;;  %v2415_v15 = vld [vmem:[%s3115_s6 + $0xa4] sm:$0xf]  ;;  %v2180_v17 = vor.u32 %v2400_v10, %v2179_v9 }
  0x8d   : > { %850 = vmatpush.bf16.msra.mxu0 %v2431_v39  ;;  %2551 = vmatpush.bf16.msra.mxu2 %v2431_v39  ;;  %v2245_v16 = vld [vmem:[%s3115_s6 + $0xa8] sm:$0xf0]  ;;  %v2244_v18 = vor.u32 %v2416_v12, %v2243_v11  ;;  %v2184_v19 = vor.u32 %v2399_v13, %v2181_v14  ;;  %v2187_v21 = vld [vmem:[%s3115_s6 + $0x30] sm:$0xf]  ;;  %v2402_v22 = vld [vmem:[%s3115_s6 + $0x34] sm:$0xf0] }
  0x8e   : > { %939 = vmatpush.bf16.msra.mxu1 %v2439_v40  ;;  %2559 = vmatpush.bf16.msra.mxu3 %v2439_v40  ;;  %v2248_v20 = vor.u32 %v2415_v15, %v2245_v16  ;;  %v2251_v23 = vld [vmem:[%s3115_s6 + $0xb0] sm:$0xf]  ;;  %v2418_v24 = vld [vmem:[%s3115_s6 + $0xb4] sm:$0xf0]  ;;  %v2401_v25 = vld [vmem:[%s3115_s6 + $0x34] sm:$0xf]  ;;  %v2188_v29 = vor.u32 %v2402_v22, %v2187_v21 }
  0x8f   : > { %v2189_v26 = vld [vmem:[%s3115_s6 + $0x38] sm:$0xf0]  ;;  %v2417_v27 = vld [vmem:[%s3115_s6 + $0xb4] sm:$0xf]  ;;  %v2252_v30 = vor.u32 %v2418_v24, %v2251_v23  ;;  %v2195_v33 = vld [vmem:[%s3115_s6 + $0x40] sm:$0xf] }
  0x90   : > { %v2253_v28 = vld [vmem:[%s3115_s6 + $0xb8] sm:$0xf0]  ;;  %v2192_v31 = vor.u32 %v2401_v25, %v2189_v26  ;;  %v2404_v34 = vld [vmem:[%s3115_s6 + $0x44] sm:$0xf0]  ;;  %v2259_v35 = vld [vmem:[%s3115_s6 + $0xc0] sm:$0xf] }
  0x91   : > { %851 = vmatpush.bf16.msra.mxu0 %v2430_v41  ;;  %2552 = vmatpush.bf16.msra.mxu2 %v2430_v41  ;;  %v2256_v32 = vor.u32 %v2417_v27, %v2253_v28  ;;  %v2420_v36 = vld [vmem:[%s3115_s6 + $0xc4] sm:$0xf0]  ;;  %v2403_v37 = vld [vmem:[%s3115_s6 + $0x44] sm:$0xf]  ;;  %v2197_v38 = vld [vmem:[%s3115_s6 + $0x48] sm:$0xf0]  ;;  %v2196_v41 = vor.u32 %v2404_v34, %v2195_v33 }
  0x92   : > { %940 = vmatpush.bf16.msra.mxu1 %v2438_v42  ;;  %2560 = vmatpush.bf16.msra.mxu3 %v2438_v42  ;;  %v2419_v39 = vld [vmem:[%s3115_s6 + $0xc4] sm:$0xf]  ;;  %v2261_v40 = vld [vmem:[%s3115_s6 + $0xc8] sm:$0xf0]  ;;  %v2260_v42 = vor.u32 %v2420_v36, %v2259_v35  ;;  %v2405_v49 = vld [vmem:[%s3115_s6 + $0x54] sm:$0xf] }
  0x93   : > { %v2205_v50 = vld [vmem:[%s3115_s6 + $0x58] sm:$0xf0]  ;;  %v2421_v51 = vld [vmem:[%s3115_s6 + $0xd4] sm:$0xf]  ;;  %v2407_v61 = vld [vmem:[%s3115_s6 + $0x64] sm:$0xf] }
  0x94   : > { %v2269_v52 = vld [vmem:[%s3115_s6 + $0xd8] sm:$0xf0]  ;;  %v2208_v55 = vor.u32 %v2405_v49, %v2205_v50  ;;  %v2213_v62 = vld [vmem:[%s3115_s6 + $0x68] sm:$0xf0]  ;;  %v2423_v63 = vld [vmem:[%s3115_s6 + $0xe4] sm:$0xf] }
  0x95   : > { %852 = vmatpush.bf16.msra.mxu0 %v2429_v43  ;;  %2553 = vmatpush.bf16.msra.mxu2 %v2429_v43  ;;  %v2200_v43 = vor.u32 %v2403_v37, %v2197_v38  ;;  %v2272_v56 = vor.u32 %v2421_v51, %v2269_v52  ;;  %v2277_v0 = vld [vmem:[%s3115_s6 + $0xe8] sm:$0xf0]  ;;  %v2216_v3 = vor.u32 %v2407_v61, %v2213_v62  ;;  %v2409_v9 = vld [vmem:[%s3115_s6 + $0x74] sm:$0xf]  ;;  %v2221_v10 = vld [vmem:[%s3115_s6 + $0x78] sm:$0xf0] }
  0x96   : > { %941 = vmatpush.bf16.msra.mxu1 %v2437_v44  ;;  %2561 = vmatpush.bf16.msra.mxu3 %v2437_v44  ;;  %v2264_v44 = vor.u32 %v2419_v39, %v2261_v40  ;;  %v2280_v4 = vor.u32 %v2423_v63, %v2277_v0  ;;  %v2425_v11 = vld [vmem:[%s3115_s6 + $0xf4] sm:$0xf]  ;;  %v2285_v12 = vld [vmem:[%s3115_s6 + $0xf8] sm:$0xf0]  ;;  %v2224_v15 = vor.u32 %v2409_v9, %v2221_v10  ;;  %v496_v27 = vld [vmem:[#allocation2] sm:$0xff] }
  0x97   : > { %v2288_v16 = vor.u32 %v2425_v11, %v2285_v12  ;;  %v511_v23 = vld [vmem:[#allocation2 + $0x38] sm:$0xff]  ;;  %v515_v63 = vld [vmem:[#allocation2 + $0xe0] sm:$0xff]  ;;  %v516_v9 = vld [vmem:[#allocation2 + $0x90] sm:$0xff] }
  0x98   : > { %v512_v33 = vld [vmem:[#allocation2 + $0x58] sm:$0xff] }
  0x99   : > { %853 = vmatpush.bf16.msra.mxu0 %v2428_v45  ;;  %2554 = vmatpush.bf16.msra.mxu2 %v2428_v45  ;;  %v2203_v45 = vld [vmem:[%s3115_s6 + $0x50] sm:$0xf]  ;;  %v497_v37 = vld [vmem:[#allocation2 + $0xd8] sm:$0xff] }
  0x9a   : > { %942 = vmatpush.bf16.msra.mxu1 %v2436_v46  ;;  %2562 = vmatpush.bf16.msra.mxu3 %v2436_v46  ;;  %v2406_v46 = vld [vmem:[%s3115_s6 + $0x54] sm:$0xf0] }
  0x9b   : > { %v2204_v53 = vor.u32 %v2406_v46, %v2203_v45 }
  0x9d   : > { %854 = vmatpush.bf16.msra.mxu0 %v2427_v47  ;;  %2555 = vmatpush.bf16.msra.mxu2 %v2427_v47  ;;  %v2267_v47 = vld [vmem:[%s3115_s6 + $0xd0] sm:$0xf] }
  0x9e   : > { %943 = vmatpush.bf16.msra.mxu1 %v2435_v48  ;;  %2563 = vmatpush.bf16.msra.mxu3 %v2435_v48  ;;  %v2422_v48 = vld [vmem:[%s3115_s6 + $0xd4] sm:$0xf0] }
  0x9f   : > { %v2268_v54 = vor.u32 %v2422_v48, %v2267_v47  ;;  %v498_v47 = vld [vmem:[#allocation2 + $0x18] sm:$0xff] }
  0xa0   : > { %855 = vmatmul.bf16.vlgmr.msra.gmra.mxu0 %v2164_v57  ;;  %895 = vmatmul.bf16.vlgmr.msra.gmra.mxu2 %v2228_v58  ;;  %v2211_v57 = vld [vmem:[%s3115_s6 + $0x60] sm:$0xf]  ;;  %v2408_v58 = vld [vmem:[%s3115_s6 + $0x64] sm:$0xf0] }
  0xa1   : > { %944 = vmatmul.bf16.vlgmr.msra.gmra.mxu1 %v2168_v59  ;;  %984 = vmatmul.bf16.vlgmr.msra.gmra.mxu3 %v2232_v60  ;;  %v2275_v59 = vld [vmem:[%s3115_s6 + $0xe0] sm:$0xf]  ;;  %v2424_v60 = vld [vmem:[%s3115_s6 + $0xe4] sm:$0xf0]  ;;  %v2212_v1 = vor.u32 %v2408_v58, %v2211_v57  ;;  %v499_v57 = vld [vmem:[#allocation2 + $0x50] sm:$0xff] }
  0xa2   : > { %v2276_v2 = vor.u32 %v2424_v60, %v2275_v59 }
  0xb0   : > { %860 = vmatmul.bf16.gmra.mxu0 %v2172_v5  ;;  %900 = vmatmul.bf16.gmra.mxu2 %v2236_v6  ;;  %v2219_v5 = vld [vmem:[%s3115_s6 + $0x70] sm:$0xf]  ;;  %v2410_v6 = vld [vmem:[%s3115_s6 + $0x74] sm:$0xf0] }
  0xb1   : > { %949 = vmatmul.bf16.gmra.mxu1 %v2176_v7  ;;  %989 = vmatmul.bf16.gmra.mxu3 %v2240_v8  ;;  %v2283_v7 = vld [vmem:[%s3115_s6 + $0xf0] sm:$0xf]  ;;  %v2426_v8 = vld [vmem:[%s3115_s6 + $0xf4] sm:$0xf0]  ;;  %v2220_v13 = vor.u32 %v2410_v6, %v2219_v5 }
  0xb2   : > { %v2284_v14 = vor.u32 %v2426_v8, %v2283_v7 }
  0xc0   : > { %865 = vmatmul.bf16.gmra.mxu0 %v2180_v17  ;;  %905 = vmatmul.bf16.gmra.mxu2 %v2244_v18  ;;  %v495_v18 = vld [vmem:[#allocation2 + $0xb0] sm:$0xff] }
  0xc1   : > { %954 = vmatmul.bf16.gmra.mxu1 %v2184_v19  ;;  %994 = vmatmul.bf16.gmra.mxu3 %v2248_v20 }
  0xd0   : > { %870 = vmatmul.bf16.gmra.mxu0 %v2188_v29  ;;  %910 = vmatmul.bf16.gmra.mxu2 %v2252_v30 }
  0xd1   : > { %959 = vmatmul.bf16.gmra.mxu1 %v2192_v31  ;;  %999 = vmatmul.bf16.gmra.mxu3 %v2256_v32 }
  0xe0   : > { %875 = vmatmul.bf16.gmra.mxu0 %v2196_v41  ;;  %915 = vmatmul.bf16.gmra.mxu2 %v2260_v42 }
  0xe1   : > { %964 = vmatmul.bf16.gmra.mxu1 %v2200_v43  ;;  %1004 = vmatmul.bf16.gmra.mxu3 %v2264_v44  ;;  %v513_v43 = vld [vmem:[#allocation2 + $0x40] sm:$0xff] }
  0xf0   : > { %880 = vmatmul.bf16.gmra.mxu0 %v2204_v53  ;;  %920 = vmatmul.bf16.gmra.mxu2 %v2268_v54  ;;  %v514_v53 = vld [vmem:[#allocation2 + $0xc8] sm:$0xff] }
  0xf1   : > { %969 = vmatmul.bf16.gmra.mxu1 %v2208_v55  ;;  %1009 = vmatmul.bf16.gmra.mxu3 %v2272_v56 }
 0x100   : > { %885 = vmatmul.bf16.gmra.mxu0 %v2212_v1  ;;  %925 = vmatmul.bf16.gmra.mxu2 %v2276_v2 }
 0x101   : > { %974 = vmatmul.bf16.gmra.mxu1 %v2216_v3  ;;  %1014 = vmatmul.bf16.gmra.mxu3 %v2280_v4  ;;  %v500_v3 = vld [vmem:[#allocation2 + $0x68] sm:$0xff] }
 0x110   : > { %890 = vmatmul.bf16.gmra.mxu0 %v2220_v13  ;;  %930 = vmatmul.bf16.gmra.mxu2 %v2284_v14  ;;  %v501_v13 = vld [vmem:[#allocation2 + $0x30] sm:$0xff] }
 0x111   : > { %979 = vmatmul.bf16.gmra.mxu1 %v2224_v15  ;;  %1019 = vmatmul.bf16.gmra.mxu3 %v2288_v16 }
 0x11d   : > { %v856_v17 = vpop.f32.mrf.mxu0 }
 0x11e   : > { %v945_v19 = vpop.f32.mrf.mxu1 }
 0x11f   : > { %v946_v20 = vadd.f32 %v945_v19, %v856_v17  ;;  %v517_v19 = vld [vmem:[#allocation2 + $0x70] sm:$0xff] }
 0x121   : > { %v1025_v21 = vadd.f32 %v946_v20, %v495_v18 }
 0x123   : > { %1057 = vst [vmem:[#allocation2 + $0xb0] sm:$0xff] %v1025_v21  ;;  %v896_v22 = vpop.f32.mrf.mxu2 }
 0x124   : > { %v985_v24 = vpop.f32.mrf.mxu3 }
 0x125   : > { %v986_v25 = vadd.f32 %v985_v24, %v896_v22  ;;  %v858_v26 = vpop.f32.mrf.mxu0 }
 0x126   : > { %v947_v28 = vpop.f32.mrf.mxu1 }
 0x127   : > { %v1041_v29 = vadd.f32 %v986_v25, %v511_v23  ;;  %v948_v30 = vadd.f32 %v947_v28, %v858_v26  ;;  %v502_v23 = vld [vmem:[#allocation2 + $0x48] sm:$0xff] }
 0x129   : > { %1073 = vst [vmem:[#allocation2 + $0x38] sm:$0xff] %v1041_v29  ;;  %v1026_v31 = vadd.f32 %v948_v30, %v496_v27  ;;  %v518_v29 = vld [vmem:[#allocation2 + $0xc0] sm:$0xff] }
 0x12b   : > { %1058 = vst [vmem:[#allocation2] sm:$0xff] %v1026_v31  ;;  %v898_v32 = vpop.f32.mrf.mxu2 }
 0x12c   : > { %v987_v34 = vpop.f32.mrf.mxu3 }
 0x12d   : > { %v988_v35 = vadd.f32 %v987_v34, %v898_v32  ;;  %v861_v36 = vpop.f32.mrf.mxu0 }
 0x12e   : > { %v950_v38 = vpop.f32.mrf.mxu1 }
 0x12f   : > { %v1042_v39 = vadd.f32 %v988_v35, %v512_v33  ;;  %v951_v40 = vadd.f32 %v950_v38, %v861_v36  ;;  %v503_v33 = vld [vmem:[#allocation2 + $0x80] sm:$0xff] }
 0x131   : > { %1074 = vst [vmem:[#allocation2 + $0x58] sm:$0xff] %v1042_v39  ;;  %v1027_v41 = vadd.f32 %v951_v40, %v497_v37  ;;  %v519_v39 = vld [vmem:[#allocation2 + $0xa8] sm:$0xff] }
 0x133   : > { %1059 = vst [vmem:[#allocation2 + $0xd8] sm:$0xff] %v1027_v41  ;;  %v901_v42 = vpop.f32.mrf.mxu2 }
 0x134   : > { %v990_v44 = vpop.f32.mrf.mxu3 }
 0x135   : > { %v991_v45 = vadd.f32 %v990_v44, %v901_v42  ;;  %v863_v46 = vpop.f32.mrf.mxu0 }
 0x136   : > { %v952_v48 = vpop.f32.mrf.mxu1 }
 0x137   : > { %v1043_v49 = vadd.f32 %v991_v45, %v513_v43  ;;  %v953_v50 = vadd.f32 %v952_v48, %v863_v46  ;;  %v504_v43 = vld [vmem:[#allocation2 + $0x88] sm:$0xff] }
 0x139   : > { %1075 = vst [vmem:[#allocation2 + $0x40] sm:$0xff] %v1043_v49  ;;  %v1028_v51 = vadd.f32 %v953_v50, %v498_v47  ;;  %v520_v49 = vld [vmem:[#allocation2 + $0xd0] sm:$0xff] }
 0x13b   : > { %1060 = vst [vmem:[#allocation2 + $0x18] sm:$0xff] %v1028_v51  ;;  %v903_v52 = vpop.f32.mrf.mxu2 }
 0x13c   : > { %v992_v54 = vpop.f32.mrf.mxu3 }
 0x13d   : > { %v993_v55 = vadd.f32 %v992_v54, %v903_v52  ;;  %v866_v56 = vpop.f32.mrf.mxu0 }
 0x13e   : > { %v955_v58 = vpop.f32.mrf.mxu1 }
 0x13f   : > { %v1044_v59 = vadd.f32 %v993_v55, %v514_v53  ;;  %v956_v60 = vadd.f32 %v955_v58, %v866_v56  ;;  %v505_v53 = vld [vmem:[#allocation2 + $0xe8] sm:$0xff] }
 0x141   : > { %1076 = vst [vmem:[#allocation2 + $0xc8] sm:$0xff] %v1044_v59  ;;  %v1029_v61 = vadd.f32 %v956_v60, %v499_v57  ;;  %v521_v59 = vld [vmem:[#allocation2 + $0x10] sm:$0xff] }
 0x143   : > { %1061 = vst [vmem:[#allocation2 + $0x50] sm:$0xff] %v1029_v61  ;;  %v906_v62 = vpop.f32.mrf.mxu2 }
 0x144   : > { %v995_v0 = vpop.f32.mrf.mxu3 }
 0x145   : > { %v996_v1 = vadd.f32 %v995_v0, %v906_v62  ;;  %v868_v2 = vpop.f32.mrf.mxu0 }
 0x146   : > { %v957_v4 = vpop.f32.mrf.mxu1 }
 0x147   : > { %v1045_v5 = vadd.f32 %v996_v1, %v515_v63  ;;  %v958_v6 = vadd.f32 %v957_v4, %v868_v2  ;;  %v506_v63 = vld [vmem:[#allocation2 + $0xb8] sm:$0xff] }
 0x149   : > { %1077 = vst [vmem:[#allocation2 + $0xe0] sm:$0xff] %v1045_v5  ;;  %v1030_v7 = vadd.f32 %v958_v6, %v500_v3  ;;  %v522_v5 = vld [vmem:[#allocation2 + $0x28] sm:$0xff] }
 0x14b   : > { %1062 = vst [vmem:[#allocation2 + $0x68] sm:$0xff] %v1030_v7  ;;  %v908_v8 = vpop.f32.mrf.mxu2 }
 0x14c   : > { %v997_v10 = vpop.f32.mrf.mxu3 }
 0x14d   : > { %v998_v11 = vadd.f32 %v997_v10, %v908_v8  ;;  %v871_v12 = vpop.f32.mrf.mxu0 }
 0x14e   : > { %v960_v14 = vpop.f32.mrf.mxu1 }
 0x14f   : > { %v1046_v15 = vadd.f32 %v998_v11, %v516_v9  ;;  %v961_v16 = vadd.f32 %v960_v14, %v871_v12  ;;  %v507_v9 = vld [vmem:[#allocation2 + $0x60] sm:$0xff] }
 0x151   : > { %1078 = vst [vmem:[#allocation2 + $0x90] sm:$0xff] %v1046_v15  ;;  %v1031_v17 = vadd.f32 %v961_v16, %v501_v13  ;;  %v523_v15 = vld [vmem:[#allocation2 + $0xa0] sm:$0xff] }
 0x153   : > { %1063 = vst [vmem:[#allocation2 + $0x30] sm:$0xff] %v1031_v17  ;;  %v911_v18 = vpop.f32.mrf.mxu2 }
 0x154   : > { %v1000_v20 = vpop.f32.mrf.mxu3 }
 0x155   : > { %v1001_v21 = vadd.f32 %v1000_v20, %v911_v18  ;;  %v873_v22 = vpop.f32.mrf.mxu0 }
 0x156   : > { %v962_v24 = vpop.f32.mrf.mxu1 }
 0x157   : > { %v1047_v25 = vadd.f32 %v1001_v21, %v517_v19  ;;  %v963_v26 = vadd.f32 %v962_v24, %v873_v22  ;;  %v508_v19 = vld [vmem:[#allocation2 + $0xf0] sm:$0xff] }
 0x159   : > { %1079 = vst [vmem:[#allocation2 + $0x70] sm:$0xff] %v1047_v25  ;;  %v1032_v27 = vadd.f32 %v963_v26, %v502_v23  ;;  %v524_v25 = vld [vmem:[#allocation2 + $0xf8] sm:$0xff] }
 0x15b   : > { %1064 = vst [vmem:[#allocation2 + $0x48] sm:$0xff] %v1032_v27  ;;  %v913_v28 = vpop.f32.mrf.mxu2 }
 0x15c   : > { %v1002_v30 = vpop.f32.mrf.mxu3 }
 0x15d   : > { %v1003_v31 = vadd.f32 %v1002_v30, %v913_v28  ;;  %v876_v32 = vpop.f32.mrf.mxu0 }
 0x15e   : > { %v965_v34 = vpop.f32.mrf.mxu1 }
 0x15f   : > { %v1048_v35 = vadd.f32 %v1003_v31, %v518_v29  ;;  %v966_v36 = vadd.f32 %v965_v34, %v876_v32  ;;  %v509_v29 = vld [vmem:[#allocation2 + $0x8] sm:$0xff] }
 0x161   : > { %1080 = vst [vmem:[#allocation2 + $0xc0] sm:$0xff] %v1048_v35  ;;  %v1033_v37 = vadd.f32 %v966_v36, %v503_v33  ;;  %v525_v35 = vld [vmem:[#allocation2 + $0x20] sm:$0xff] }
 0x163   : > { %1065 = vst [vmem:[#allocation2 + $0x80] sm:$0xff] %v1033_v37  ;;  %v916_v38 = vpop.f32.mrf.mxu2 }
 0x164   : > { %v1005_v40 = vpop.f32.mrf.mxu3 }
 0x165   : > { %v1006_v41 = vadd.f32 %v1005_v40, %v916_v38  ;;  %v878_v42 = vpop.f32.mrf.mxu0 }
 0x166   : > { %v967_v44 = vpop.f32.mrf.mxu1 }
 0x167   : > { %v1049_v45 = vadd.f32 %v1006_v41, %v519_v39  ;;  %v968_v46 = vadd.f32 %v967_v44, %v878_v42  ;;  %v510_v39 = vld [vmem:[#allocation2 + $0x78] sm:$0xff] }
 0x169   : > { %1081 = vst [vmem:[#allocation2 + $0xa8] sm:$0xff] %v1049_v45  ;;  %v1034_v47 = vadd.f32 %v968_v46, %v504_v43  ;;  %v526_v45 = vld [vmem:[#allocation2 + $0x98] sm:$0xff] }
 0x16b   : > { %1066 = vst [vmem:[#allocation2 + $0x88] sm:$0xff] %v1034_v47  ;;  %v918_v48 = vpop.f32.mrf.mxu2 }
 0x16c   : > { %v1007_v50 = vpop.f32.mrf.mxu3 }
 0x16d   : > { %v1008_v51 = vadd.f32 %v1007_v50, %v918_v48  ;;  %v881_v52 = vpop.f32.mrf.mxu0 }
 0x16e   : > { %v970_v54 = vpop.f32.mrf.mxu1 }
 0x16f   : > { %v1050_v55 = vadd.f32 %v1008_v51, %v520_v49  ;;  %v971_v56 = vadd.f32 %v970_v54, %v881_v52 }
 0x171   : > { %1082 = vst [vmem:[#allocation2 + $0xd0] sm:$0xff] %v1050_v55  ;;  %v1035_v57 = vadd.f32 %v971_v56, %v505_v53 }
 0x173   : > { %1067 = vst [vmem:[#allocation2 + $0xe8] sm:$0xff] %v1035_v57  ;;  %v921_v58 = vpop.f32.mrf.mxu2 }
 0x174   : > { %v1010_v60 = vpop.f32.mrf.mxu3 }
 0x175   : > { %v1011_v61 = vadd.f32 %v1010_v60, %v921_v58  ;;  %v883_v62 = vpop.f32.mrf.mxu0 }
 0x176   : > { %v972_v0 = vpop.f32.mrf.mxu1 }
 0x177   : > { %v1051_v1 = vadd.f32 %v1011_v61, %v521_v59  ;;  %v973_v2 = vadd.f32 %v972_v0, %v883_v62 }
 0x179   : > { %1083 = vst [vmem:[#allocation2 + $0x10] sm:$0xff] %v1051_v1  ;;  %v1036_v3 = vadd.f32 %v973_v2, %v506_v63 }
 0x17b   : > { %1068 = vst [vmem:[#allocation2 + $0xb8] sm:$0xff] %v1036_v3  ;;  %v923_v4 = vpop.f32.mrf.mxu2 }
 0x17c   : > { %v1012_v6 = vpop.f32.mrf.mxu3 }
 0x17d   : > { %v1013_v7 = vadd.f32 %v1012_v6, %v923_v4  ;;  %v886_v8 = vpop.f32.mrf.mxu0 }
 0x17e   : > { %v975_v10 = vpop.f32.mrf.mxu1 }
 0x17f   : > { %v1052_v11 = vadd.f32 %v1013_v7, %v522_v5  ;;  %v976_v12 = vadd.f32 %v975_v10, %v886_v8 }
 0x181   : > { %1084 = vst [vmem:[#allocation2 + $0x28] sm:$0xff] %v1052_v11  ;;  %v1037_v13 = vadd.f32 %v976_v12, %v507_v9 }
 0x183   : > { %1069 = vst [vmem:[#allocation2 + $0x60] sm:$0xff] %v1037_v13  ;;  %v926_v14 = vpop.f32.mrf.mxu2 }
 0x184   : > { %v1015_v16 = vpop.f32.mrf.mxu3 }
 0x185   : > { %v1016_v17 = vadd.f32 %v1015_v16, %v926_v14  ;;  %v888_v18 = vpop.f32.mrf.mxu0 }
 0x186   : > { %v977_v20 = vpop.f32.mrf.mxu1 }
 0x187   : > { %v1053_v21 = vadd.f32 %v1016_v17, %v523_v15  ;;  %v978_v22 = vadd.f32 %v977_v20, %v888_v18 }
 0x189   : > { %1085 = vst [vmem:[#allocation2 + $0xa0] sm:$0xff] %v1053_v21  ;;  %v1038_v23 = vadd.f32 %v978_v22, %v508_v19 }
 0x18b   : > { %1070 = vst [vmem:[#allocation2 + $0xf0] sm:$0xff] %v1038_v23  ;;  %v928_v24 = vpop.f32.mrf.mxu2 }
 0x18c   : > { %v1017_v26 = vpop.f32.mrf.mxu3 }
 0x18d   : > { %v1018_v27 = vadd.f32 %v1017_v26, %v928_v24  ;;  %v891_v28 = vpop.f32.mrf.mxu0 }
 0x18e   : > { %v980_v30 = vpop.f32.mrf.mxu1 }
 0x18f   : > { %v1054_v31 = vadd.f32 %v1018_v27, %v524_v25  ;;  %v981_v32 = vadd.f32 %v980_v30, %v891_v28 }
 0x191   : > { %1086 = vst [vmem:[#allocation2 + $0xf8] sm:$0xff] %v1054_v31  ;;  %v1039_v33 = vadd.f32 %v981_v32, %v509_v29 }
 0x193   : > { %1071 = vst [vmem:[#allocation2 + $0x8] sm:$0xff] %v1039_v33  ;;  %v931_v34 = vpop.f32.mrf.mxu2 }
 0x194   : > { %v1020_v36 = vpop.f32.mrf.mxu3 }
 0x195   : > { %v1021_v37 = vadd.f32 %v1020_v36, %v931_v34  ;;  %v893_v38 = vpop.f32.mrf.mxu0 }
 0x196   : > { %v982_v40 = vpop.f32.mrf.mxu1 }
 0x197   : > { %v1055_v41 = vadd.f32 %v1021_v37, %v525_v35  ;;  %v983_v42 = vadd.f32 %v982_v40, %v893_v38 }
 0x199   : > { %1087 = vst [vmem:[#allocation2 + $0x20] sm:$0xff] %v1055_v41  ;;  %v1040_v43 = vadd.f32 %v983_v42, %v510_v39 }
 0x19b   : > { %1072 = vst [vmem:[#allocation2 + $0x78] sm:$0xff] %v1040_v43  ;;  %v933_v44 = vpop.f32.mrf.mxu2 }
 0x19c   : > { %v1022_v46 = vpop.f32.mrf.mxu3 }
 0x19d   : > { %v1023_v47 = vadd.f32 %v1022_v46, %v933_v44  ;;  %1092 = sbr.rel (%p2353_p6) target bundleno = 818 (0x332), region = 82 }
 0x19f   : > { %v1056_v48 = vadd.f32 %v1023_v47, %v526_v45 }
 0x1a1   : > { %1088 = vst [vmem:[#allocation2 + $0x98] sm:$0xff] %v1056_v48 }
 0x1a2   : > { %v2450_v49 = vld [vmem:[%s3991_s2 + $0x38] sm:$0xff]  ;;  %v2449_v50 = vld [vmem:[%s3991_s2 + $0x30] sm:$0xff]  ;;  %v2448_v51 = vld [vmem:[%s3991_s2 + $0x28] sm:$0xff] }
 0x1a3   : > { %1205 = vmatpush.bf16.msra.mxu0 %v2450_v49  ;;  %2564 = vmatpush.bf16.msra.mxu1 %v2450_v49  ;;  %v2447_v52 = vld [vmem:[%s3991_s2 + $0x20] sm:$0xff]  ;;  %v2446_v53 = vld [vmem:[%s3991_s2 + $0x18] sm:$0xff]  ;;  %v2445_v54 = vld [vmem:[%s3991_s2 + $0x10] sm:$0xff] }
 0x1a4   : > { %2565 = vmatpush.bf16.msra.mxu2 %v2450_v49  ;;  %2566 = vmatpush.bf16.msra.mxu3 %v2450_v49  ;;  %v2444_v55 = vld [vmem:[%s3991_s2 + $0x8] sm:$0xff]  ;;  %v2443_v56 = vld [vmem:[%s3991_s2] sm:$0xff]  ;;  %v1093_v57 = vld [vmem:[#allocation2 + $0xb0] sm:$0xff] }
 0x1a5   : > { %v1094_v58 = vld [vmem:[#allocation2] sm:$0xff]  ;;  %v1102_v60 = vld [vmem:[#allocation2 + $0x88] sm:$0xff]  ;;  %v1109_v61 = vld [vmem:[#allocation2 + $0x38] sm:$0xff] }
 0x1a6   : > { %v1101_v59 = vld [vmem:[#allocation2 + $0x80] sm:$0xff]  ;;  %v1110_v62 = vld [vmem:[#allocation2 + $0x58] sm:$0xff]  ;;  %v1117_v63 = vld [vmem:[#allocation2 + $0xa8] sm:$0xff]  ;;  %v1125_v1 = vpack.c.bf16 %v1094_v58, %v1093_v57 }
 0x1a7   : > { %1206 = vmatpush.bf16.msra.mxu0 %v2449_v50  ;;  %2567 = vmatpush.bf16.msra.mxu1 %v2449_v50  ;;  %v1118_v0 = vld [vmem:[#allocation2 + $0xd0] sm:$0xff]  ;;  %v1129_v2 = vpack.c.bf16 %v1102_v60, %v1101_v59  ;;  %v1133_v3 = vpack.c.bf16 %v1110_v62, %v1109_v61  ;;  %v1095_v5 = vld [vmem:[#allocation2 + $0xd8] sm:$0xff]  ;;  %v1103_v8 = vld [vmem:[#allocation2 + $0xe8] sm:$0xff] }
 0x1a8   : > { %2568 = vmatpush.bf16.msra.mxu2 %v2449_v50  ;;  %2569 = vmatpush.bf16.msra.mxu3 %v2449_v50  ;;  %v1137_v4 = vpack.c.bf16 %v1118_v0, %v1117_v63  ;;  %v1096_v6 = vld [vmem:[#allocation2 + $0x18] sm:$0xff]  ;;  %v1119_v7 = vld [vmem:[#allocation2 + $0x10] sm:$0xff]  ;;  %v1120_v10 = vld [vmem:[#allocation2 + $0x28] sm:$0xff] }
 0x1a9   : > { %v1104_v9 = vld [vmem:[#allocation2 + $0xb8] sm:$0xff]  ;;  %v1111_v11 = vld [vmem:[#allocation2 + $0x40] sm:$0xff]  ;;  %v1112_v12 = vld [vmem:[#allocation2 + $0xc8] sm:$0xff]  ;;  %v1126_v13 = vpack.c.bf16 %v1096_v6, %v1095_v5  ;;  %v1138_v15 = vpack.c.bf16 %v1120_v10, %v1119_v7 }
 0x1aa   : > { %v1130_v14 = vpack.c.bf16 %v1104_v9, %v1103_v8  ;;  %v1134_v16 = vpack.c.bf16 %v1112_v12, %v1111_v11  ;;  %v1097_v17 = vld [vmem:[#allocation2 + $0x50] sm:$0xff]  ;;  %v1098_v18 = vld [vmem:[#allocation2 + $0x68] sm:$0xff]  ;;  %v1113_v19 = vld [vmem:[#allocation2 + $0xe0] sm:$0xff] }
 0x1ab   : > { %1207 = vmatpush.bf16.msra.mxu0 %v2448_v51  ;;  %2570 = vmatpush.bf16.msra.mxu1 %v2448_v51  ;;  %v1105_v20 = vld [vmem:[#allocation2 + $0x60] sm:$0xff]  ;;  %v1106_v21 = vld [vmem:[#allocation2 + $0xf0] sm:$0xff]  ;;  %v1122_v24 = vld [vmem:[#allocation2 + $0xf8] sm:$0xff]  ;;  %v1127_v25 = vpack.c.bf16 %v1098_v18, %v1097_v17 }
 0x1ac   : > { %2571 = vmatpush.bf16.msra.mxu2 %v2448_v51  ;;  %2572 = vmatpush.bf16.msra.mxu3 %v2448_v51  ;;  %v1114_v22 = vld [vmem:[#allocation2 + $0x90] sm:$0xff]  ;;  %v1121_v23 = vld [vmem:[#allocation2 + $0xa0] sm:$0xff]  ;;  %v1131_v26 = vpack.c.bf16 %v1106_v21, %v1105_v20  ;;  %v1100_v31 = vld [vmem:[#allocation2 + $0x48] sm:$0xff] }
 0x1ad   : > { %v1135_v27 = vpack.c.bf16 %v1114_v22, %v1113_v19  ;;  %v1139_v28 = vpack.c.bf16 %v1122_v24, %v1121_v23  ;;  %v1115_v29 = vld [vmem:[#allocation2 + $0x70] sm:$0xff]  ;;  %v1107_v32 = vld [vmem:[#allocation2 + $0x8] sm:$0xff]  ;;  %v1108_v33 = vld [vmem:[#allocation2 + $0x78] sm:$0xff] }
 0x1ae   : > { %v1099_v30 = vld [vmem:[#allocation2 + $0x30] sm:$0xff]  ;;  %v1116_v34 = vld [vmem:[#allocation2 + $0xc0] sm:$0xff]  ;;  %v1124_v36 = vld [vmem:[#allocation2 + $0x98] sm:$0xff]  ;;  %v1132_v38 = vpack.c.bf16 %v1108_v33, %v1107_v32 }
 0x1af   : > { %1208 = vmatpush.bf16.msra.mxu0 %v2447_v52  ;;  %2573 = vmatpush.bf16.msra.mxu1 %v2447_v52  ;;  %v1123_v35 = vld [vmem:[#allocation2 + $0x20] sm:$0xff]  ;;  %v1128_v37 = vpack.c.bf16 %v1100_v31, %v1099_v30  ;;  %v1136_v39 = vpack.c.bf16 %v1116_v34, %v1115_v29 }
 0x1b0   : > { %2574 = vmatpush.bf16.msra.mxu2 %v2447_v52  ;;  %2575 = vmatpush.bf16.msra.mxu3 %v2447_v52  ;;  %v1140_v40 = vpack.c.bf16 %v1124_v36, %v1123_v35 }
 0x1b3   : > { %1209 = vmatpush.bf16.msra.mxu0 %v2446_v53  ;;  %2576 = vmatpush.bf16.msra.mxu1 %v2446_v53 }
 0x1b4   : > { %2577 = vmatpush.bf16.msra.mxu2 %v2446_v53  ;;  %2578 = vmatpush.bf16.msra.mxu3 %v2446_v53 }
 0x1b7   : > { %1210 = vmatpush.bf16.msra.mxu0 %v2445_v54  ;;  %2579 = vmatpush.bf16.msra.mxu1 %v2445_v54 }
 0x1b8   : > { %2580 = vmatpush.bf16.msra.mxu2 %v2445_v54  ;;  %2581 = vmatpush.bf16.msra.mxu3 %v2445_v54 }
 0x1bb   : > { %1211 = vmatpush.bf16.msra.mxu0 %v2444_v55  ;;  %2582 = vmatpush.bf16.msra.mxu1 %v2444_v55 }
 0x1bc   : > { %2583 = vmatpush.bf16.msra.mxu2 %v2444_v55  ;;  %2584 = vmatpush.bf16.msra.mxu3 %v2444_v55 }
 0x1bf   : > { %1212 = vmatpush.bf16.msra.mxu0 %v2443_v56  ;;  %2585 = vmatpush.bf16.msra.mxu1 %v2443_v56 }
 0x1c0   : > { %2586 = vmatpush.bf16.msra.mxu2 %v2443_v56  ;;  %2587 = vmatpush.bf16.msra.mxu3 %v2443_v56 }
 0x1c2   : > { %1213 = vmatmul.bf16.vlgmr.msra.gmra.mxu0 %v1125_v1  ;;  %1233 = vmatmul.bf16.vlgmr.msra.gmra.mxu1 %v1129_v2 }
 0x1c3   : > { %1253 = vmatmul.bf16.vlgmr.msra.gmra.mxu2 %v1133_v3  ;;  %1273 = vmatmul.bf16.vlgmr.msra.gmra.mxu3 %v1137_v4 }
 0x1d2   : > { %1218 = vmatmul.bf16.gmra.mxu0 %v1126_v13  ;;  %1238 = vmatmul.bf16.gmra.mxu1 %v1130_v14 }
 0x1d3   : > { %1278 = vmatmul.bf16.gmra.mxu3 %v1138_v15  ;;  %1258 = vmatmul.bf16.gmra.mxu2 %v1134_v16 }
 0x1e2   : > { %1223 = vmatmul.bf16.gmra.mxu0 %v1127_v25  ;;  %1243 = vmatmul.bf16.gmra.mxu1 %v1131_v26 }
 0x1e3   : > { %1263 = vmatmul.bf16.gmra.mxu2 %v1135_v27  ;;  %1283 = vmatmul.bf16.gmra.mxu3 %v1139_v28 }
 0x1f2   : > { %1228 = vmatmul.bf16.gmra.mxu0 %v1128_v37  ;;  %1248 = vmatmul.bf16.gmra.mxu1 %v1132_v38 }
 0x1f3   : > { %1268 = vmatmul.bf16.gmra.mxu2 %v1136_v39  ;;  %1288 = vmatmul.bf16.gmra.mxu3 %v1140_v40 }
 0x23f   : > { %v3227_v41 = vpop.f32.mrf.mxu0  ;;  %v3229_v42 = vpop.f32.mrf.mxu1 }
 0x240   : > { %v1302_v43 = vmul.f32 %v3229_v42, %v3229_v42  ;;  %v1294_v44 = vmul.f32 %v3227_v41, %v3227_v41 }
 0x242   : > { %1342 = vadd.xlane.f32.xlu2 %v1302_v43  ;;  %1326 = vadd.xlane.f32.xlu0 %v1294_v44 }
 0x246   : > { %v3235_v45 = vpop.f32.mrf.mxu2  ;;  %v3237_v46 = vpop.f32.mrf.mxu3 }
 0x247   : > { %v3239_v47 = vpop.f32.mrf.mxu0  ;;  %v1310_v48 = vmul.f32 %v3235_v45, %v3235_v45  ;;  %v3243_v49 = vpop.f32.mrf.mxu1  ;;  %v1318_v51 = vmul.f32 %v3237_v46, %v3237_v46 }
 0x248   : > { %v2456_v50 = vpack.c.bf16 %v3239_v47, %v3227_v41  ;;  %v2476_v52 = vpack.c.bf16 %v3243_v49, %v3229_v42  ;;  %v1295_v61 = vmul.f32 %v3239_v47, %v3239_v47  ;;  %v1303_v5 = vmul.f32 %v3243_v49, %v3243_v49 }
 0x249   : > { %1358 = vadd.xlane.f32.xlu1 %v1310_v48 }
 0x24a   : > { %2457 = vst [vmem:[%s3117_s16] sm:$0xff] %v2456_v50   ;;  %1374 = vadd.xlane.f32.xlu0 %v1318_v51 }
 0x24b   : > { %2536 = vst [vmem:[%s3117_s16 + $0x20] sm:$0xff] %v2476_v52  }
 0x24e   : > { %v3253_v53 = vpop.f32.mrf.mxu2  ;;  %v3255_v54 = vpop.f32.mrf.mxu3 }
 0x24f   : > { %v2496_v55 = vpack.c.bf16 %v3253_v53, %v3235_v45  ;;  %v2516_v56 = vpack.c.bf16 %v3255_v54, %v3237_v46  ;;  %v3261_v57 = vpop.f32.mrf.mxu0  ;;  %v1319_v58 = vmul.f32 %v3255_v54, %v3255_v54  ;;  %v1311_v59 = vmul.f32 %v3253_v53, %v3253_v53  ;;  %v3267_v60 = vpop.f32.mrf.mxu1 }
 0x250   : > { %v1296_v62 = vmul.f32 %v3261_v57, %v3261_v57  ;;  %v1304_v8 = vmul.f32 %v3267_v60, %v3267_v60 }
 0x251   : > { %2540 = vst [vmem:[%s3117_s16 + $0x40] sm:$0xff] %v2496_v55   ;;  %1376 = vadd.xlane.f32.xlu1 %v1319_v58  ;;  %1360 = vadd.xlane.f32.xlu2 %v1311_v59 }
 0x252   : > { %2544 = vst [vmem:[%s3117_s16 + $0x60] sm:$0xff] %v2516_v56   ;;  %1328 = vadd.xlane.f32.xlu0 %v1295_v61 }
 0x256   : > { %v3275_v63 = vpop.f32.mrf.mxu3  ;;  %v3277_v0 = vpop.f32.mrf.mxu2 }
 0x257   : > { %v3279_v1 = vpop.f32.mrf.mxu0  ;;  %v1320_v2 = vmul.f32 %v3275_v63, %v3275_v63  ;;  %v3283_v3 = vpop.f32.mrf.mxu1  ;;  %v1312_v10 = vmul.f32 %v3277_v0, %v3277_v0 }
 0x258   : > { %v2461_v4 = vpack.c.bf16 %v3279_v1, %v3261_v57  ;;  %v2481_v6 = vpack.c.bf16 %v3283_v3, %v3267_v60  ;;  %v1305_v7 = vmul.f32 %v3283_v3, %v3283_v3  ;;  %v1297_v19 = vmul.f32 %v3279_v1, %v3279_v1 }
 0x259   : > { %1378 = vadd.xlane.f32.xlu2 %v1320_v2  ;;  %1330 = vadd.xlane.f32.xlu1 %v1296_v62 }
 0x25a   : > { %2533 = vst [vmem:[%s3117_s16 + $0x8] sm:$0xff] %v2461_v4   ;;  %1344 = vadd.xlane.f32.xlu0 %v1303_v5 }
 0x25b   : > { %2537 = vst [vmem:[%s3117_s16 + $0x28] sm:$0xff] %v2481_v6  }
 0x25e   : > { %v3297_v9 = vpop.f32.mrf.mxu3  ;;  %v3301_v11 = vpop.f32.mrf.mxu2 }
 0x25f   : > { %v2521_v12 = vpack.c.bf16 %v3297_v9, %v3275_v63  ;;  %v3305_v13 = vpop.f32.mrf.mxu0  ;;  %v2501_v14 = vpack.c.bf16 %v3301_v11, %v3277_v0  ;;  %v3309_v15 = vpop.f32.mrf.mxu1  ;;  %v1321_v22 = vmul.f32 %v3297_v9, %v3297_v9  ;;  %v1313_v29 = vmul.f32 %v3301_v11, %v3301_v11 }
 0x260   : > { %v1298_v16 = vmul.f32 %v3305_v13, %v3305_v13  ;;  %v1306_v26 = vmul.f32 %v3309_v15, %v3309_v15 }
 0x261   : > { %2545 = vst [vmem:[%s3117_s16 + $0x68] sm:$0xff] %v2521_v12   ;;  %1348 = vadd.xlane.f32.xlu2 %v1305_v7  ;;  %1346 = vadd.xlane.f32.xlu1 %v1304_v8 }
 0x262   : > { %1362 = vadd.xlane.f32.xlu0 %v1312_v10  ;;  %2541 = vst [vmem:[%s3117_s16 + $0x48] sm:$0xff] %v2501_v14  }
 0x266   : > { %v3315_v17 = vpop.f32.mrf.mxu2  ;;  %v3317_v18 = vpop.f32.mrf.mxu3 }
 0x267   : > { %v3321_v20 = vpop.f32.mrf.mxu0  ;;  %v3323_v21 = vpop.f32.mrf.mxu1  ;;  %v1314_v25 = vmul.f32 %v3315_v17, %v3315_v17  ;;  %v1322_v34 = vmul.f32 %v3317_v18, %v3317_v18 }
 0x268   : > { %v2466_v23 = vpack.c.bf16 %v3321_v20, %v3305_v13  ;;  %v2486_v24 = vpack.c.bf16 %v3323_v21, %v3309_v15  ;;  %v1299_v37 = vmul.f32 %v3321_v20, %v3321_v20  ;;  %v1307_v55 = vmul.f32 %v3323_v21, %v3323_v21 }
 0x269   : > { %1332 = vadd.xlane.f32.xlu1 %v1297_v19  ;;  %1334 = vadd.xlane.f32.xlu2 %v1298_v16 }
 0x26a   : > { %1380 = vadd.xlane.f32.xlu0 %v1321_v22  ;;  %2534 = vst [vmem:[%s3117_s16 + $0x10] sm:$0xff] %v2466_v23  }
 0x26b   : > { %2538 = vst [vmem:[%s3117_s16 + $0x30] sm:$0xff] %v2486_v24  }
 0x26e   : > { %v3337_v27 = vpop.f32.mrf.mxu2  ;;  %v3339_v28 = vpop.f32.mrf.mxu3 }
 0x26f   : > { %v2506_v30 = vpack.c.bf16 %v3337_v27, %v3315_v17  ;;  %v2526_v31 = vpack.c.bf16 %v3339_v28, %v3317_v18  ;;  %v3347_v32 = vpop.f32.mrf.mxu0  ;;  %v3349_v33 = vpop.f32.mrf.mxu1  ;;  %v1315_v40 = vmul.f32 %v3337_v27, %v3337_v27  ;;  %v1323_v2 = vmul.f32 %v3339_v28, %v3339_v28 }
 0x270   : > { %v1308_v48 = vmul.f32 %v3349_v33, %v3349_v33  ;;  %v1300_v50 = vmul.f32 %v3347_v32, %v3347_v32 }
 0x271   : > { %1364 = vadd.xlane.f32.xlu1 %v1313_v29  ;;  %1366 = vadd.xlane.f32.xlu2 %v1314_v25  ;;  %2542 = vst [vmem:[%s3117_s16 + $0x50] sm:$0xff] %v2506_v30  }
 0x272   : > { %1350 = vadd.xlane.f32.xlu0 %v1306_v26  ;;  %2546 = vst [vmem:[%s3117_s16 + $0x70] sm:$0xff] %v2526_v31  }
 0x276   : > { %v3355_v35 = vpop.f32.mrf.mxu2  ;;  %v3357_v36 = vpop.f32.mrf.mxu3 }
 0x277   : > { %v3361_v38 = vpop.f32.mrf.mxu0  ;;  %v3363_v39 = vpop.f32.mrf.mxu1  ;;  %v1316_v59 = vmul.f32 %v3355_v35, %v3355_v35  ;;  %v1324_v5 = vmul.f32 %v3357_v36, %v3357_v36 }
 0x278   : > { %v2471_v43 = vpack.c.bf16 %v3361_v38, %v3347_v32  ;;  %v2491_v44 = vpack.c.bf16 %v3363_v39, %v3349_v33  ;;  %v1309_v62 = vmul.f32 %v3363_v39, %v3363_v39  ;;  %v1301_v4 = vmul.f32 %v3361_v38, %v3361_v38 }
 0x279   : > { %1382 = vadd.xlane.f32.xlu1 %v1322_v34  ;;  %1336 = vadd.xlane.f32.xlu2 %v1299_v37 }
 0x27a   : > { %1368 = vadd.xlane.f32.xlu0 %v1315_v40  ;;  %2535 = vst [vmem:[%s3117_s16 + $0x18] sm:$0xff] %v2471_v43  }
 0x27b   : > { %2539 = vst [vmem:[%s3117_s16 + $0x38] sm:$0xff] %v2491_v44  }
 0x27e   : > { %v3377_v51 = vpop.f32.mrf.mxu2  ;;  %v3379_v52 = vpop.f32.mrf.mxu3 }
 0x27f   : > { %v2511_v56 = vpack.c.bf16 %v3377_v51, %v3355_v35  ;;  %v2531_v58 = vpack.c.bf16 %v3379_v52, %v3357_v36  ;;  %v1317_v61 = vmul.f32 %v3377_v51, %v3377_v51  ;;  %v1325_v6 = vmul.f32 %v3379_v52, %v3379_v52 }
 0x281   : > { %1352 = vadd.xlane.f32.xlu1 %v1307_v55  ;;  %1354 = vadd.xlane.f32.xlu2 %v1308_v48  ;;  %2543 = vst [vmem:[%s3117_s16 + $0x58] sm:$0xff] %v2511_v56  }
 0x282   : > { %1338 = vadd.xlane.f32.xlu0 %v1300_v50  ;;  %2547 = vst [vmem:[%s3117_s16 + $0x78] sm:$0xff] %v2531_v58  }
 0x289   : > { %1370 = vadd.xlane.f32.xlu1 %v1316_v59  ;;  %1372 = vadd.xlane.f32.xlu2 %v1317_v61 }
 0x28a   : > { %1356 = vadd.xlane.f32.xlu0 %v1309_v62 }
 0x291   : > { %1384 = vadd.xlane.f32.xlu2 %v1323_v2  ;;  %1340 = vadd.xlane.f32.xlu1 %v1301_v4 }
 0x292   : > { %1386 = vadd.xlane.f32.xlu0 %v1324_v5 }
 0x299   : > { %1388 = vadd.xlane.f32.xlu1 %v1325_v6 }
 0x2b5   : > { %v1343_v7 = vpop.xlane.xlu2 %1342  ;;  %v1327_v8 = vpop.xlane.xlu0 %1326 }
 0x2b6   : > { %v1398_v10 = vmax.f32 %v1343_v7, 1e-24  ;;  %v1390_v12 = vmax.f32 %v1327_v8, 1e-24 }
 0x2b8   : > { %2685 = vrsqrt.f32 %v1398_v10  ;;  %vm1508_vm0 = vweird.f32 %v1398_v10  ;;  %vm1428_vm2 = vweird.f32 %v1390_v12 }
 0x2b9   : > { %2687 = vrsqrt.f32 %v1390_v12 }
 0x2bc   : > { %v1359_v14 = vpop.xlane.xlu1 %1358 }
 0x2bd   : > { %v3403_v16 = vmax.f32 %v1359_v14, 1e-24  ;;  %v1375_v19 = vpop.xlane.xlu0 %1374 }
 0x2be   : > { %v2686_v22 = vpop.eup %2685  ;;  %v3405_v23 = vmax.f32 %v1375_v19, 1e-24  ;;  %v1782_v19 = vld [vmem:[%s3113_s25 + $0x40] sm:$0xff] }
 0x2bf   : > { %v2688_v24 = vpop.eup %2687  ;;  %v1503_v25 = vmul.f32 %v2686_v22, %v1398_v10  ;;  %2689 = vrsqrt.f32 %v3403_v16  ;;  %vm1509_vm1 = vweird.f32 %v2686_v22  ;;  %vm1588_vm8 = vweird.f32 %v3403_v16 }
 0x2c0   : > { %v1423_v26 = vmul.f32 %v2688_v24, %v1390_v12  ;;  %2691 = vrsqrt.f32 %v3405_v23  ;;  %vm1510_vm3 = vmor %vm1508_vm0, %vm1509_vm1  ;;  %vm1429_vm4 = vweird.f32 %v2688_v24  ;;  %vm1668_vm10 = vweird.f32 %v3405_v23 }
 0x2c1   : > { %v1504_v29 = vmul.f32 %v2686_v22, %v1503_v25  ;;  %vm1430_vm5 = vmor %vm1428_vm2, %vm1429_vm4 }
 0x2c2   : > { %v1424_v30 = vmul.f32 %v2688_v24, %v1423_v26 }
 0x2c3   : > { %v1505_v31 = vmul.f32 0.5, %v1504_v29 }
 0x2c4   : > { %v1425_v34 = vmul.f32 0.5, %v1424_v30  ;;  %v1377_v37 = vpop.xlane.xlu1 %1376  ;;  %v1361_v40 = vpop.xlane.xlu2 %1360  ;;  %v1774_v30 = vld [vmem:[%s3113_s25] sm:$0xff] }
 0x2c5   : > { %v2690_v43 = vpop.eup %2689  ;;  %v1506_v44 = vsub.f32 1.5, %v1505_v31  ;;  %v3409_v48 = vmax.f32 %v1377_v37, 1e-24  ;;  %v3411_v50 = vmax.f32 %v1361_v40, 1e-24  ;;  %v1329_v55 = vpop.xlane.xlu0 %1328 }
 0x2c6   : > { %v2692_v56 = vpop.eup %2691  ;;  %v1426_v58 = vsub.f32 1.5, %v1425_v34  ;;  %v1583_v59 = vmul.f32 %v2690_v43, %v3403_v16  ;;  %v3414_v61 = vmax.f32 %v1329_v55, 1e-24  ;;  %vm1589_vm6 = vweird.f32 %v2690_v43 }
 0x2c7   : > { %v1507_v62 = vmul.f32 %v2686_v22, %v1506_v44  ;;  %v1663_v2 = vmul.f32 %v2692_v56, %v3405_v23  ;;  %2693 = vrsqrt.f32 %v3409_v48  ;;  %vm1669_vm7 = vweird.f32 %v2692_v56  ;;  %vm1590_vm9 = vmor %vm1588_vm8, %vm1589_vm6 }
 0x2c8   : > { %v1427_v4 = vmul.f32 %v2688_v24, %v1426_v58  ;;  %v1584_v5 = vmul.f32 %v2690_v43, %v1583_v59  ;;  %2695 = vrsqrt.f32 %v3411_v50  ;;  %vm1670_vm11 = vmor %vm1668_vm10, %vm1669_vm7  ;;  %vm1678_vm12 = vweird.f32 %v3409_v48 }
 0x2c9   : > { %v1511_v6 = vsel %vm1510_vm3, %v2686_v22, %v1507_v62  ;;  %v1664_v7 = vmul.f32 %v2692_v56, %v1663_v2  ;;  %2697 = vrsqrt.f32 %v3414_v61  ;;  %vm1598_vm1 = vweird.f32 %v3411_v50 }
 0x2ca   : > { %v1750_v8 = vmul.f32 %v1511_v6, %v3229_v42  ;;  %v1431_v10 = vsel %vm1430_vm5, %v2688_v24, %v1427_v4  ;;  %v1585_v14 = vmul.f32 0.5, %v1584_v5  ;;  %vm1438_vm3 = vweird.f32 %v3414_v61 }
 0x2cb   : > { %v1742_v25 = vmul.f32 %v1431_v10, %v3227_v41  ;;  %v1665_v26 = vmul.f32 0.5, %v1664_v7  ;;  %v1790_v10 = vld [vmem:[%s3113_s25 + $0x80] sm:$0xff] }
 0x2cc   : > { %v1814_v29 = vmul.f32 0.33333334, %v1750_v8  ;;  %v1586_v31 = vsub.f32 1.5, %v1585_v14  ;;  %v1379_v34 = vpop.xlane.xlu2 %1378  ;;  %v1331_v37 = vpop.xlane.xlu1 %1330 }
 0x2cd   : > { %v3425_v22 = vpop.eup %2693  ;;  %v1806_v12 = vmul.f32 0.33333334, %v1742_v25  ;;  %v1666_v40 = vsub.f32 1.5, %v1665_v26  ;;  %v3427_v44 = vmax.f32 %v1379_v34, 1e-24  ;;  %v1345_v42 = vpop.xlane.xlu0 %1344  ;;  %v1798_v26 = vld [vmem:[%s3113_s25 + $0xc0] sm:$0xff] }
 0x2ce   : > { %v3429_v24 = vpop.eup %2695  ;;  %v1846_v55 = vadd.f32 %v1814_v29, %v1782_v19  ;;  %v1587_v41 = vmul.f32 %v2690_v43, %v1586_v31  ;;  %v1673_v58 = vmul.f32 %v3425_v22, %v3409_v48  ;;  %vm1679_vm13 = vweird.f32 %v3425_v22 }
 0x2cf   : > { %v3434_v59 = vpop.eup %2697  ;;  %v1838_v62 = vadd.f32 %v1806_v12, %v1774_v30  ;;  %v1667_v2 = vmul.f32 %v2692_v56, %v1666_v40  ;;  %v1593_v4 = vmul.f32 %v3429_v24, %v3411_v50  ;;  %2699 = vrsqrt.f32 %v3427_v44  ;;  %vm1680_vm0 = vmor %vm1678_vm12, %vm1679_vm13 }
 0x2d0   : > { %1878 = vst [vmem:[%s3119_s22 + $0x40] sm:$0xff] %v1846_v55  ;;  %v1591_v5 = vsel %vm1590_vm9, %v2690_v43, %v1587_v41  ;;  %v1674_v16 = vmul.f32 %v3425_v22, %v1673_v58  ;;  %v1433_v6 = vmul.f32 %v3434_v59, %v3414_v61  ;;  %vm1599_vm14 = vweird.f32 %v3429_v24 }
 0x2d1   : > { %1870 = vst [vmem:[%s3119_s22] sm:$0xff] %v1838_v62  ;;  %v1758_v7 = vmul.f32 %v1591_v5, %v3235_v45  ;;  %v1671_v8 = vsel %vm1670_vm11, %v2692_v56, %v1667_v2  ;;  %v1594_v23 = vmul.f32 %v3429_v24, %v1593_v4  ;;  %v3456_v30 = vmax.f32 %v1331_v37, 1e-24  ;;  %vm1600_vm2 = vmor %vm1598_vm1, %vm1599_vm14 }
 0x2d2   : > { %v1766_v43 = vmul.f32 %v1671_v8, %v3237_v46  ;;  %v1675_v14 = vmul.f32 0.5, %v1674_v16  ;;  %v1434_v19 = vmul.f32 %v3434_v59, %v1433_v6  ;;  %v3458_v34 = vmax.f32 %v1345_v42, 1e-24 }
 0x2d3   : > { %v1822_v25 = vmul.f32 0.33333334, %v1758_v7  ;;  %v1595_v29 = vmul.f32 0.5, %v1594_v23  ;;  %vm1439_vm15 = vweird.f32 %v3434_v59  ;;  %2701 = vrsqrt.f32 %v3456_v30 }
 0x2d4   : > { %v1830_v45 = vmul.f32 0.33333334, %v1766_v43  ;;  %v1676_v56 = vsub.f32 1.5, %v1675_v14  ;;  %v1435_v31 = vmul.f32 0.5, %v1434_v19  ;;  %v1349_v12 = vpop.xlane.xlu2 %1348  ;;  %v1347_v46 = vpop.xlane.xlu1 %1346  ;;  %2703 = vrsqrt.f32 %v3458_v34  ;;  %vm1440_vm4 = vmor %vm1438_vm3, %vm1439_vm15  ;;  %v1791_v43 = vld [vmem:[%s3113_s25 + $0x88] sm:$0xff] }
 0x2d5   : > { %v1854_v40 = vadd.f32 %v1822_v25, %v1790_v10  ;;  %v1596_v55 = vsub.f32 1.5, %v1595_v29  ;;  %v1363_v41 = vpop.xlane.xlu0 %1362  ;;  %v3464_v2 = vpop.eup %2699  ;;  %v3473_v4 = vmax.f32 %v1349_v12, 1e-24  ;;  %v3475_v5 = vmax.f32 %v1347_v46, 1e-24 }
 0x2d6   : > { %v1862_v58 = vadd.f32 %v1830_v45, %v1798_v26  ;;  %v1677_v37 = vmul.f32 %v3425_v22, %v1676_v56  ;;  %v1436_v62 = vsub.f32 1.5, %v1435_v31  ;;  %v1683_v48 = vmul.f32 %v3464_v2, %v3427_v44 }
 0x2d7   : > { %1886 = vst [vmem:[%s3119_s22 + $0x80] sm:$0xff] %v1854_v40  ;;  %v1597_v42 = vmul.f32 %v3429_v24, %v1596_v55  ;;  %2705 = vrsqrt.f32 %v3473_v4  ;;  %vm1688_vm5 = vweird.f32 %v3427_v44  ;;  %v3500_v14 = vmax.f32 %v1363_v41, 1e-24 }
 0x2d8   : > { %1894 = vst [vmem:[%s3119_s22 + $0xc0] sm:$0xff] %v1862_v58  ;;  %v1681_v16 = vsel %vm1680_vm0, %v3425_v22, %v1677_v37  ;;  %v1437_v6 = vmul.f32 %v3434_v59, %v1436_v62  ;;  %v1799_v22 = vld [vmem:[%s3113_s25 + $0xc8] sm:$0xff]  ;;  %v1684_v61 = vmul.f32 %v3464_v2, %v1683_v48  ;;  %2707 = vrsqrt.f32 %v3475_v5 }
 0x2d9   : > { %v1767_v50 = vmul.f32 %v1681_v16, %v3255_v54  ;;  %v1601_v7 = vsel %vm1600_vm2, %v3429_v24, %v1597_v42  ;;  %v3495_v10 = vpop.eup %2701  ;;  %vm1448_vm6 = vweird.f32 %v3456_v30  ;;  %vm1689_vm7 = vweird.f32 %v3464_v2 }
 0x2da   : > { %v1759_v8 = vmul.f32 %v1601_v7, %v3253_v53  ;;  %v1441_v23 = vsel %vm1440_vm4, %v3434_v59, %v1437_v6  ;;  %v3502_v19 = vpop.eup %2703  ;;  %v1775_v53 = vld [vmem:[%s3113_s25 + $0x8] sm:$0xff]  ;;  %v1685_v59 = vmul.f32 0.5, %v1684_v61  ;;  %v1443_v26 = vmul.f32 %v3495_v10, %v3456_v30  ;;  %vm1690_vm10 = vmor %vm1688_vm5, %vm1689_vm7 }
 0x2db   : > { %v1831_v54 = vmul.f32 0.33333334, %v1767_v50  ;;  %v1743_v24 = vmul.f32 %v1441_v23, %v3239_v47  ;;  %v1513_v31 = vmul.f32 %v3502_v19, %v3458_v34  ;;  %2709 = vrsqrt.f32 %v3500_v14 }
 0x2dc   : > { %v1823_v25 = vmul.f32 0.33333334, %v1759_v8  ;;  %v1333_v29 = vpop.xlane.xlu1 %1332  ;;  %v1335_v45 = vpop.xlane.xlu2 %1334  ;;  %v1686_v46 = vsub.f32 1.5, %v1685_v59  ;;  %v1444_v40 = vmul.f32 %v3495_v10, %v1443_v26  ;;  %vm1518_vm8 = vweird.f32 %v3458_v34 }
 0x2dd   : > { %v1863_v56 = vadd.f32 %v1831_v54, %v1799_v22  ;;  %v1807_v47 = vmul.f32 0.33333334, %v1743_v24  ;;  %v3513_v55 = vpop.eup %2705  ;;  %v1514_v58 = vmul.f32 %v3502_v19, %v1513_v31  ;;  %v3518_v37 = vmax.f32 %v1333_v29, 1e-24  ;;  %v1381_v62 = vpop.xlane.xlu0 %1380 }
 0x2de   : > { %v1855_v12 = vadd.f32 %v1823_v25, %v1791_v43  ;;  %v3520_v42 = vpop.eup %2707  ;;  %v1687_v16 = vmul.f32 %v3464_v2, %v1686_v46  ;;  %v1445_v6 = vmul.f32 0.5, %v1444_v40  ;;  %v1533_v48 = vmul.f32 %v3513_v55, %v3473_v4  ;;  %v1800_v25 = vld [vmem:[%s3113_s25 + $0xd0] sm:$0xff] }
 0x2df   : > { %1895 = vst [vmem:[%s3119_s22 + $0xc8] sm:$0xff] %v1863_v56  ;;  %v1839_v41 = vadd.f32 %v1807_v47, %v1775_v53  ;;  %vm1538_vm9 = vweird.f32 %v3473_v4  ;;  %vm1449_vm11 = vweird.f32 %v3495_v10  ;;  %v1515_v50 = vmul.f32 0.5, %v1514_v58 }
 0x2e0   : > { %1887 = vst [vmem:[%s3119_s22 + $0x88] sm:$0xff] %v1855_v12  ;;  %v1523_v7 = vmul.f32 %v3520_v42, %v3475_v5  ;;  %vm1528_vm12 = vweird.f32 %v3475_v5  ;;  %2711 = vrsqrt.f32 %v3518_v37  ;;  %v1691_v22 = vsel %vm1690_vm10, %v3464_v2, %v1687_v16  ;;  %vm1450_vm0 = vmor %vm1448_vm6, %vm1449_vm11 }
 0x2e1   : > { %1871 = vst [vmem:[%s3119_s22 + $0x8] sm:$0xff] %v1839_v41  ;;  %v1446_v8 = vsub.f32 1.5, %v1445_v6  ;;  %vm1519_vm13 = vweird.f32 %v3502_v19  ;;  %v1534_v23 = vmul.f32 %v3513_v55, %v1533_v48  ;;  %v1768_v44 = vmul.f32 %v1691_v22, %v3275_v63  ;;  %v3544_v24 = vpop.eup %2709 }
 0x2e2   : > { %v1516_v61 = vsub.f32 1.5, %v1515_v50  ;;  %v1524_v54 = vmul.f32 %v3520_v42, %v1523_v7  ;;  %v3542_v43 = vmax.f32 %v1335_v45, 1e-24  ;;  %vm1539_vm14 = vweird.f32 %v3513_v55  ;;  %vm1520_vm1 = vmor %vm1518_vm8, %vm1519_vm13  ;;  %v1783_v50 = vld [vmem:[%s3113_s25 + $0x48] sm:$0xff] }
 0x2e3   : > { %v1447_v53 = vmul.f32 %v3495_v10, %v1446_v8  ;;  %v1535_v59 = vmul.f32 0.5, %v1534_v23  ;;  %vm1529_vm15 = vweird.f32 %v3520_v42  ;;  %v1832_v29 = vmul.f32 0.33333334, %v1768_v44  ;;  %vm1540_vm2 = vmor %vm1538_vm9, %vm1539_vm14 }
 0x2e4   : > { %v1365_v2 = vpop.xlane.xlu1 %1364  ;;  %v1367_v26 = vpop.xlane.xlu2 %1366  ;;  %v1517_v63 = vmul.f32 %v3502_v19, %v1516_v61  ;;  %v1525_v45 = vmul.f32 0.5, %v1524_v54  ;;  %v1603_v56 = vmul.f32 %v3544_v24, %v3500_v14  ;;  %2713 = vrsqrt.f32 %v3542_v43  ;;  %vm1530_vm5 = vmor %vm1528_vm12, %vm1529_vm15  ;;  %v1785_v54 = vld [vmem:[%s3113_s25 + $0x58] sm:$0xff] }
 0x2e5   : > { %v1451_v47 = vsel %vm1450_vm0, %v3495_v10, %v1447_v53  ;;  %v1536_v31 = vsub.f32 1.5, %v1535_v59  ;;  %v3563_v30 = vmax.f32 %v1381_v62, 1e-24  ;;  %v1864_v46 = vadd.f32 %v1832_v29, %v1800_v25  ;;  %v1776_v10 = vld [vmem:[%s3113_s25 + $0x10] sm:$0xff] }
 0x2e6   : > { %v3565_v12 = vpop.eup %2711  ;;  %v1744_v40 = vmul.f32 %v1451_v47, %v3261_v57  ;;  %v1521_v41 = vsel %vm1520_vm1, %v3502_v19, %v1517_v63  ;;  %v1526_v58 = vsub.f32 1.5, %v1525_v45  ;;  %v1604_v6 = vmul.f32 %v3544_v24, %v1603_v56  ;;  %v1784_v63 = vld [vmem:[%s3113_s25 + $0x50] sm:$0xff] }
 0x2e7   : > { %v1751_v16 = vmul.f32 %v1521_v41, %v3243_v49  ;;  %v1537_v34 = vmul.f32 %v3513_v55, %v1536_v31  ;;  %v1453_v48 = vmul.f32 %v3565_v12, %v3518_v37  ;;  %1896 = vst [vmem:[%s3119_s22 + $0xd0] sm:$0xff] %v1864_v46  ;;  %vm1608_vm3 = vweird.f32 %v3500_v14  ;;  %v1351_v49 = vpop.xlane.xlu0 %1350 }
 0x2e8   : > { %v1808_v62 = vmul.f32 0.33333334, %v1744_v40  ;;  %v1527_v57 = vmul.f32 %v3520_v42, %v1526_v58  ;;  %vm1609_vm4 = vweird.f32 %v3544_v24  ;;  %v1605_v4 = vmul.f32 0.5, %v1604_v6 }
 0x2e9   : > { %v1815_v19 = vmul.f32 0.33333334, %v1751_v16  ;;  %v1541_v7 = vsel %vm1540_vm2, %v3513_v55, %v1537_v34  ;;  %v1454_v22 = vmul.f32 %v3565_v12, %v1453_v48  ;;  %2715 = vrsqrt.f32 %v3563_v30  ;;  %vm1610_vm8 = vmor %vm1608_vm3, %vm1609_vm4 }
 0x2ea   : > { %v1840_v8 = vadd.f32 %v1808_v62, %v1776_v10  ;;  %v1753_v23 = vmul.f32 %v1541_v7, %v3283_v3  ;;  %v1531_v44 = vsel %vm1530_vm5, %v3520_v42, %v1527_v57  ;;  %v3593_v61 = vpop.eup %2713  ;;  %v1606_v5 = vsub.f32 1.5, %v1605_v4 }
 0x2eb   : > { %v1847_v55 = vadd.f32 %v1815_v19, %v1783_v50  ;;  %v1752_v25 = vmul.f32 %v1531_v44, %v3267_v60  ;;  %v1455_v53 = vmul.f32 0.5, %v1454_v22  ;;  %vm1458_vm6 = vweird.f32 %v3518_v37  ;;  %v1777_v50 = vld [vmem:[%s3113_s25 + $0x18] sm:$0xff] }
 0x2ec   : > { %v1383_v59 = vpop.xlane.xlu1 %1382  ;;  %1872 = vst [vmem:[%s3119_s22 + $0x10] sm:$0xff] %v1840_v8  ;;  %v1817_v29 = vmul.f32 0.33333334, %v1753_v23  ;;  %vm1459_vm7 = vweird.f32 %v3565_v12  ;;  %v1463_v3 = vmul.f32 %v3593_v61, %v3542_v43  ;;  %v1607_v45 = vmul.f32 %v3544_v24, %v1606_v5  ;;  %v1337_v47 = vpop.xlane.xlu2 %1336 }
 0x2ed   : > { %1879 = vst [vmem:[%s3119_s22 + $0x48] sm:$0xff] %v1847_v55  ;;  %v1816_v42 = vmul.f32 0.33333334, %v1752_v25  ;;  %v1456_v56 = vsub.f32 1.5, %v1455_v53  ;;  %v3605_v60 = vmax.f32 %v1365_v2, 1e-24  ;;  %vm1460_vm9 = vmor %vm1458_vm6, %vm1459_vm7  ;;  %vm1468_vm10 = vweird.f32 %v3542_v43 }
 0x2ee   : > { %v1849_v31 = vadd.f32 %v1817_v29, %v1785_v54  ;;  %v1464_v46 = vmul.f32 %v3593_v61, %v1463_v3  ;;  %v3612_v40 = vmax.f32 %v1367_v26, 1e-24  ;;  %v3614_v41 = vmax.f32 %v1351_v49, 1e-24 }
 0x2ef   : > { %v1848_v58 = vadd.f32 %v1816_v42, %v1784_v63  ;;  %v1611_v10 = vsel %vm1610_vm8, %v3544_v24, %v1607_v45  ;;  %v1457_v2 = vmul.f32 %v3565_v12, %v1456_v56  ;;  %2717 = vrsqrt.f32 %v3605_v60  ;;  %v3619_v16 = vpop.eup %2715  ;;  %v1792_v24 = vld [vmem:[%s3113_s25 + $0x90] sm:$0xff]  ;;  %v1369_v37 = vpop.xlane.xlu0 %1368 }
 0x2f0   : > { %1881 = vst [vmem:[%s3119_s22 + $0x58] sm:$0xff] %v1849_v31  ;;  %v1760_v14 = vmul.f32 %v1611_v10, %v3277_v0  ;;  %v1465_v26 = vmul.f32 0.5, %v1464_v46  ;;  %2719 = vrsqrt.f32 %v3612_v40  ;;  %vm1469_vm11 = vweird.f32 %v3593_v61 }
 0x2f1   : > { %1880 = vst [vmem:[%s3119_s22 + $0x50] sm:$0xff] %v1848_v58  ;;  %v1461_v34 = vsel %vm1460_vm9, %v3565_v12, %v1457_v2  ;;  %v1693_v6 = vmul.f32 %v3619_v16, %v3563_v30  ;;  %2721 = vrsqrt.f32 %v3614_v41  ;;  %v3639_v49 = vmax.f32 %v1383_v59, 1e-24  ;;  %vm1470_vm12 = vmor %vm1468_vm10, %vm1469_vm11 }
 0x2f2   : > { %v1824_v0 = vmul.f32 0.33333334, %v1760_v14  ;;  %v1745_v48 = vmul.f32 %v1461_v34, %v3279_v1  ;;  %v1466_v62 = vsub.f32 1.5, %v1465_v26  ;;  %v3642_v4 = vmax.f32 %v1337_v47, 1e-24  ;;  %v1801_v34 = vld [vmem:[%s3113_s25 + $0xd8] sm:$0xff] }
 0x2f3   : > { %v1694_v57 = vmul.f32 %v3619_v16, %v1693_v6  ;;  %vm1698_vm13 = vweird.f32 %v3563_v30  ;;  %2723 = vrsqrt.f32 %v3639_v49  ;;  %vm1618_vm14 = vweird.f32 %v3605_v60 }
 0x2f4   : > { %v1856_v12 = vadd.f32 %v1824_v0, %v1792_v24  ;;  %v1809_v19 = vmul.f32 0.33333334, %v1745_v48  ;;  %v1467_v7 = vmul.f32 %v3593_v61, %v1466_v62  ;;  %v1353_v8 = vpop.xlane.xlu1 %1352  ;;  %v3659_v43 = vmax.f32 %v1369_v37, 1e-24  ;;  %v1355_v59 = vpop.xlane.xlu2 %1354 }
 0x2f5   : > { %v3644_v22 = vpop.eup %2717  ;;  %v1695_v1 = vmul.f32 0.5, %v1694_v57  ;;  %vm1699_vm15 = vweird.f32 %v3619_v16  ;;  %vm1628_vm0 = vweird.f32 %v3612_v40  ;;  %2725 = vrsqrt.f32 %v3642_v4 }
 0x2f6   : > { %v3652_v23 = vpop.eup %2719  ;;  %1888 = vst [vmem:[%s3119_s22 + $0x90] sm:$0xff] %v1856_v12  ;;  %v1841_v44 = vadd.f32 %v1809_v19, %v1777_v50  ;;  %v1471_v55 = vsel %vm1470_vm12, %v3593_v61, %v1467_v7  ;;  %v1613_v54 = vmul.f32 %v3644_v22, %v3605_v60  ;;  %v1778_v61 = vld [vmem:[%s3113_s25 + $0x20] sm:$0xff]  ;;  %v3672_v3 = vmax.f32 %v1353_v8, 1e-24  ;;  %vm1700_vm1 = vmor %vm1698_vm13, %vm1699_vm15 }
 0x2f7   : > { %v1746_v25 = vmul.f32 %v1471_v55, %v3305_v13  ;;  %v1696_v5 = vsub.f32 1.5, %v1695_v1  ;;  %v1623_v53 = vmul.f32 %v3652_v23, %v3612_v40  ;;  %v3665_v29 = vpop.eup %2721  ;;  %vm1619_vm2 = vweird.f32 %v3644_v22  ;;  %v1339_v24 = vpop.xlane.xlu0 %1338 }
 0x2f8   : > { %1873 = vst [vmem:[%s3119_s22 + $0x18] sm:$0xff] %v1841_v44  ;;  %v1614_v63 = vmul.f32 %v3644_v22, %v1613_v54  ;;  %v1543_v56 = vmul.f32 %v3665_v29, %v3614_v41  ;;  %vm1548_vm3 = vweird.f32 %v3614_v41  ;;  %2727 = vrsqrt.f32 %v3659_v43  ;;  %vm1620_vm7 = vmor %vm1618_vm14, %vm1619_vm2 }
 0x2f9   : > { %v1810_v13 = vmul.f32 0.33333334, %v1746_v25  ;;  %v1697_v42 = vmul.f32 %v3619_v16, %v1696_v5  ;;  %v1624_v45 = vmul.f32 %v3652_v23, %v1623_v53  ;;  %v3683_v31 = vpop.eup %2723  ;;  %vm1629_vm4 = vweird.f32 %v3652_v23 }
 0x2fa   : > { %v1615_v47 = vmul.f32 0.5, %v1614_v63  ;;  %v1544_v2 = vmul.f32 %v3665_v29, %v1543_v56  ;;  %v1703_v26 = vmul.f32 %v3683_v31, %v3639_v49  ;;  %vm1708_vm5 = vweird.f32 %v3639_v49  ;;  %vm1630_vm10 = vmor %vm1628_vm0, %vm1629_vm4  ;;  %v1794_v63 = vld [vmem:[%s3113_s25 + $0xa0] sm:$0xff] }
 0x2fb   : > { %v1842_v46 = vadd.f32 %v1810_v13, %v1778_v61  ;;  %v1701_v58 = vsel %vm1700_vm1, %v3619_v16, %v1697_v42  ;;  %v1625_v10 = vmul.f32 0.5, %v1624_v45  ;;  %2729 = vrsqrt.f32 %v3672_v3  ;;  %v3697_v48 = vpop.eup %2725 }
 0x2fc   : > { %v1769_v30 = vmul.f32 %v1701_v58, %v3297_v9  ;;  %v1616_v14 = vsub.f32 1.5, %v1615_v47  ;;  %v1545_v0 = vmul.f32 0.5, %v1544_v2  ;;  %v3695_v16 = vmax.f32 %v1355_v59, 1e-24  ;;  %v1371_v25 = vpop.xlane.xlu1 %1370  ;;  %v1373_v5 = vpop.xlane.xlu2 %1372 }
 0x2fd   : > { %1874 = vst [vmem:[%s3119_s22 + $0x20] sm:$0xff] %v1842_v46  ;;  %v1626_v6 = vsub.f32 1.5, %v1625_v10  ;;  %vm1549_vm6 = vweird.f32 %v3665_v29  ;;  %v1704_v37 = vmul.f32 %v3683_v31, %v1703_v26  ;;  %vm1709_vm8 = vweird.f32 %v3683_v31  ;;  %v1786_v46 = vld [vmem:[%s3113_s25 + $0x60] sm:$0xff] }
 0x2fe   : > { %v1833_v9 = vmul.f32 0.33333334, %v1769_v30  ;;  %v1617_v62 = vmul.f32 %v3644_v22, %v1616_v14  ;;  %v1546_v57 = vsub.f32 1.5, %v1545_v0  ;;  %v1473_v12 = vmul.f32 %v3697_v48, %v3642_v4  ;;  %v3711_v19 = vpop.eup %2727  ;;  %vm1550_vm11 = vmor %vm1548_vm3, %vm1549_vm6 }
 0x2ff   : > { %v1627_v50 = vmul.f32 %v3652_v23, %v1626_v6  ;;  %vm1478_vm9 = vweird.f32 %v3642_v4  ;;  %v1705_v60 = vmul.f32 0.5, %v1704_v37  ;;  %2731 = vrsqrt.f32 %v3695_v16  ;;  %vm1710_vm14 = vmor %vm1708_vm5, %vm1709_vm8  ;;  %v1357_v26 = vpop.xlane.xlu0 %1356 }
 0x300   : > { %v1865_v7 = vadd.f32 %v1833_v9, %v1801_v34  ;;  %v1621_v1 = vsel %vm1620_vm7, %v3644_v22, %v1617_v62  ;;  %v1547_v55 = vmul.f32 %v3665_v29, %v1546_v57  ;;  %v1474_v54 = vmul.f32 %v3697_v48, %v1473_v12  ;;  %v1793_v22 = vld [vmem:[%s3113_s25 + $0x98] sm:$0xff]  ;;  %v1802_v9 = vld [vmem:[%s3113_s25 + $0xe0] sm:$0xff] }
 0x301   : > { %v1761_v8 = vmul.f32 %v1621_v1, %v3301_v11  ;;  %v1631_v44 = vsel %vm1630_vm10, %v3652_v23, %v1627_v50  ;;  %v1706_v11 = vsub.f32 1.5, %v1705_v60  ;;  %v1633_v40 = vmul.f32 %v3711_v19, %v3659_v43  ;;  %v3735_v59 = vpop.eup %2729  ;;  %v1779_v1 = vld [vmem:[%s3113_s25 + $0x28] sm:$0xff] }
 0x302   : > { %1897 = vst [vmem:[%s3119_s22 + $0xd8] sm:$0xff] %v1865_v7  ;;  %v1762_v53 = vmul.f32 %v1631_v44, %v3315_v17  ;;  %vm1638_vm12 = vweird.f32 %v3659_v43  ;;  %v3733_v23 = vmax.f32 %v1339_v24, 1e-24  ;;  %v1551_v17 = vsel %vm1550_vm11, %v3665_v29, %v1547_v55 }
 0x303   : > { %v1825_v61 = vmul.f32 0.33333334, %v1761_v8  ;;  %v1475_v13 = vmul.f32 0.5, %v1474_v54  ;;  %vm1479_vm13 = vweird.f32 %v3697_v48  ;;  %v1754_v42 = vmul.f32 %v1551_v17, %v3309_v15 }
 0x304   : > { %v1826_v41 = vmul.f32 0.33333334, %v1762_v53  ;;  %v1707_v45 = vmul.f32 %v3683_v31, %v1706_v11  ;;  %v1634_v56 = vmul.f32 %v3711_v19, %v1633_v40  ;;  %vm1639_vm15 = vweird.f32 %v3711_v19  ;;  %vm1480_vm1 = vmor %vm1478_vm9, %vm1479_vm13  ;;  %v1341_v44 = vpop.xlane.xlu1 %1340  ;;  %v1795_v11 = vld [vmem:[%s3113_s25 + $0xa8] sm:$0xff] }
 0x305   : > { %v1857_v47 = vadd.f32 %v1825_v61, %v1793_v22  ;;  %v1476_v29 = vsub.f32 1.5, %v1475_v13  ;;  %v1553_v15 = vmul.f32 %v3735_v59, %v3672_v3  ;;  %vm1558_vm0 = vweird.f32 %v3672_v3  ;;  %v3752_v58 = vpop.eup %2731  ;;  %vm1640_vm4 = vmor %vm1638_vm12, %vm1639_vm15 }
 0x306   : > { %v1858_v10 = vadd.f32 %v1826_v41, %v1794_v63  ;;  %v1818_v2 = vmul.f32 0.33333334, %v1754_v42  ;;  %v1711_v30 = vsel %vm1710_vm14, %v3683_v31, %v1707_v45  ;;  %v1635_v14 = vmul.f32 0.5, %v1634_v56  ;;  %v1787_v42 = vld [vmem:[%s3113_s25 + $0x68] sm:$0xff] }
 0x307   : > { %1889 = vst [vmem:[%s3119_s22 + $0x98] sm:$0xff] %v1857_v47  ;;  %v1770_v49 = vmul.f32 %v1711_v30, %v3317_v18  ;;  %v1477_v24 = vmul.f32 %v3697_v48, %v1476_v29  ;;  %v1554_v34 = vmul.f32 %v3735_v59, %v1553_v15  ;;  %v1563_v6 = vmul.f32 %v3752_v58, %v3695_v16  ;;  %v1387_v3 = vpop.xlane.xlu0 %1386 }
 0x308   : > { %1890 = vst [vmem:[%s3119_s22 + $0xa0] sm:$0xff] %v1858_v10  ;;  %v1850_v0 = vadd.f32 %v1818_v2, %v1786_v46  ;;  %v1636_v31 = vsub.f32 1.5, %v1635_v14  ;;  %vm1568_vm2 = vweird.f32 %v3695_v16  ;;  %2733 = vrsqrt.f32 %v3733_v23  ;;  %v1788_v16 = vld [vmem:[%s3113_s25 + $0x70] sm:$0xff] }
 0x309   : > { %v1834_v18 = vmul.f32 0.33333334, %v1770_v49  ;;  %v1481_v62 = vsel %vm1480_vm1, %v3697_v48, %v1477_v24  ;;  %v1555_v37 = vmul.f32 0.5, %v1554_v34  ;;  %v1564_v50 = vmul.f32 %v3752_v58, %v1563_v6 }
 0x30a   : > { %1882 = vst [vmem:[%s3119_s22 + $0x60] sm:$0xff] %v1850_v0  ;;  %v1747_v57 = vmul.f32 %v1481_v62, %v3321_v20  ;;  %v1637_v12 = vmul.f32 %v3711_v19, %v1636_v31  ;;  %vm1559_vm3 = vweird.f32 %v3735_v59  ;;  %v3775_v4 = vmax.f32 %v1371_v25, 1e-24  ;;  %v1385_v20 = vpop.xlane.xlu2 %1384 }
 0x30b   : > { %v1866_v7 = vadd.f32 %v1834_v18, %v1802_v9  ;;  %v1556_v48 = vsub.f32 1.5, %v1555_v37  ;;  %v1565_v60 = vmul.f32 0.5, %v1564_v50  ;;  %v3782_v8 = vmax.f32 %v1373_v5, 1e-24  ;;  %vm1560_vm6 = vmor %vm1558_vm0, %vm1559_vm3 }
 0x30c   : > { %v1811_v55 = vmul.f32 0.33333334, %v1747_v57  ;;  %v1641_v54 = vsel %vm1640_vm4, %v3711_v19, %v1637_v12  ;;  %vm1569_vm5 = vweird.f32 %v3752_v58  ;;  %2735 = vrsqrt.f32 %v3775_v4  ;;  %v1389_v49 = vpop.xlane.xlu1 %1388 }
 0x30d   : > { %1898 = vst [vmem:[%s3119_s22 + $0xe0] sm:$0xff] %v1866_v7  ;;  %v1763_v25 = vmul.f32 %v1641_v54, %v3337_v27  ;;  %v1557_v43 = vmul.f32 %v3735_v59, %v1556_v48  ;;  %v1566_v22 = vsub.f32 1.5, %v1565_v60  ;;  %2737 = vrsqrt.f32 %v3782_v8  ;;  %vm1570_vm7 = vmor %vm1568_vm2, %vm1569_vm5 }
 0x30e   : > { %v2734_v5 = vpop.eup %2733  ;;  %v1843_v53 = vadd.f32 %v1811_v55, %v1779_v1  ;;  %v3796_v19 = vmax.f32 %v1357_v26, 1e-24  ;;  %v3798_v40 = vmax.f32 %v1385_v20, 1e-24  ;;  %v3816_v46 = vmax.f32 %v1341_v44, 1e-24 }
 0x30f   : > { %v1827_v61 = vmul.f32 0.33333334, %v1763_v25  ;;  %v1561_v27 = vsel %vm1560_vm6, %v3735_v59, %v1557_v43  ;;  %v1567_v63 = vmul.f32 %v3752_v58, %v1566_v22  ;;  %v1483_v17 = vmul.f32 %v2734_v5, %v3733_v23  ;;  %v1780_v20 = vld [vmem:[%s3113_s25 + $0x30] sm:$0xff] }
 0x310   : > { %1875 = vst [vmem:[%s3119_s22 + $0x28] sm:$0xff] %v1843_v53  ;;  %v1755_v13 = vmul.f32 %v1561_v27, %v3323_v21  ;;  %2739 = vrsqrt.f32 %v3796_v19  ;;  %vm1488_vm8 = vweird.f32 %v3733_v23  ;;  %v3825_v10 = vmax.f32 %v1387_v3, 1e-24 }
 0x311   : > { %v1859_v41 = vadd.f32 %v1827_v61, %v1795_v11  ;;  %v1571_v59 = vsel %vm1570_vm7, %v3752_v58, %v1567_v63  ;;  %v1484_v45 = vmul.f32 %v2734_v5, %v1483_v17  ;;  %2741 = vrsqrt.f32 %v3798_v40  ;;  %v1796_v17 = vld [vmem:[%s3113_s25 + $0xb0] sm:$0xff] }
 0x312   : > { %v3813_v56 = vpop.eup %2735  ;;  %v1819_v47 = vmul.f32 0.33333334, %v1755_v13  ;;  %v1756_v21 = vmul.f32 %v1571_v59, %v3349_v33  ;;  %vm1648_vm9 = vweird.f32 %v3775_v4  ;;  %vm1489_vm10 = vweird.f32 %v2734_v5 }
 0x313   : > { %v3818_v29 = vpop.eup %2737  ;;  %1891 = vst [vmem:[%s3119_s22 + $0xa8] sm:$0xff] %v1859_v41  ;;  %v1485_v15 = vmul.f32 0.5, %v1484_v45  ;;  %v1643_v58 = vmul.f32 %v3813_v56, %v3775_v4  ;;  %2743 = vrsqrt.f32 %v3816_v46  ;;  %vm1658_vm11 = vweird.f32 %v3782_v8  ;;  %vm1490_vm13 = vmor %vm1488_vm8, %vm1489_vm10  ;;  %v1797_v45 = vld [vmem:[%s3113_s25 + $0xb8] sm:$0xff] }
 0x314   : > { %v1851_v2 = vadd.f32 %v1819_v47, %v1787_v42  ;;  %v1820_v30 = vmul.f32 0.33333334, %v1756_v21  ;;  %v1653_v33 = vmul.f32 %v3818_v29, %v3782_v8  ;;  %2745 = vrsqrt.f32 %v3825_v10 }
 0x315   : > { %v1486_v14 = vsub.f32 1.5, %v1485_v15  ;;  %v1644_v26 = vmul.f32 %v3813_v56, %v1643_v58  ;;  %vm1578_vm12 = vweird.f32 %v3796_v19  ;;  %vm1649_vm14 = vweird.f32 %v3813_v56 }
 0x316   : > { %v3832_v24 = vpop.eup %2739  ;;  %1883 = vst [vmem:[%s3119_s22 + $0x68] sm:$0xff] %v1851_v2  ;;  %v1852_v34 = vadd.f32 %v1820_v30, %v1788_v16  ;;  %v1654_v6 = vmul.f32 %v3818_v29, %v1653_v33  ;;  %v3850_v50 = vmax.f32 %v1389_v49, 1e-24  ;;  %vm1659_vm15 = vweird.f32 %v3818_v29  ;;  %vm1650_vm2 = vmor %vm1648_vm9, %vm1649_vm14  ;;  %v1789_v2 = vld [vmem:[%s3113_s25 + $0x78] sm:$0xff] }
 0x317   : > { %v3838_v0 = vpop.eup %2741  ;;  %v1487_v9 = vmul.f32 %v2734_v5, %v1486_v14  ;;  %v1645_v31 = vmul.f32 0.5, %v1644_v26  ;;  %v1573_v18 = vmul.f32 %v3832_v24, %v3796_v19  ;;  %vm1579_vm0 = vweird.f32 %v3832_v24  ;;  %vm1660_vm3 = vmor %vm1658_vm11, %vm1659_vm15 }
 0x318   : > { %1884 = vst [vmem:[%s3119_s22 + $0x70] sm:$0xff] %v1852_v34  ;;  %v1655_v62 = vmul.f32 0.5, %v1654_v6  ;;  %v1713_v37 = vmul.f32 %v3838_v0, %v3798_v40  ;;  %2747 = vrsqrt.f32 %v3850_v50  ;;  %vm1718_vm1 = vweird.f32 %v3798_v40  ;;  %vm1580_vm5 = vmor %vm1578_vm12, %vm1579_vm0  ;;  %v1803_v40 = vld [vmem:[%s3113_s25 + $0xe8] sm:$0xff] }
 0x319   : > { %v1491_v57 = vsel %vm1490_vm13, %v2734_v5, %v1487_v9  ;;  %v1646_v12 = vsub.f32 1.5, %v1645_v31  ;;  %v1574_v7 = vmul.f32 %v3832_v24, %v1573_v18  ;;  %v3857_v60 = vpop.eup %2743  ;;  %vm1719_vm4 = vweird.f32 %v3838_v0 }
 0x31a   : > { %v1748_v1 = vmul.f32 %v1491_v57, %v3347_v32  ;;  %v1656_v48 = vsub.f32 1.5, %v1655_v62  ;;  %v1714_v23 = vmul.f32 %v3838_v0, %v1713_v37  ;;  %v2746_v54 = vpop.eup %2745  ;;  %v1493_v22 = vmul.f32 %v3857_v60, %v3816_v46  ;;  %vm1720_vm8 = vmor %vm1718_vm1, %vm1719_vm4  ;;  %v1804_v37 = vld [vmem:[%s3113_s25 + $0xf0] sm:$0xff] }
 0x31b   : > { %v1647_v44 = vmul.f32 %v3813_v56, %v1646_v12  ;;  %v1575_v55 = vmul.f32 0.5, %v1574_v7  ;;  %v1723_v4 = vmul.f32 %v2746_v54, %v3825_v10  ;;  %vm1499_vm6 = vweird.f32 %v3857_v60 }
 0x31c   : > { %v1812_v25 = vmul.f32 0.33333334, %v1748_v1  ;;  %v1657_v32 = vmul.f32 %v3818_v29, %v1656_v48  ;;  %v1715_v43 = vmul.f32 0.5, %v1714_v23  ;;  %v1494_v8 = vmul.f32 %v3857_v60, %v1493_v22 }
 0x31d   : > { %v1651_v5 = vsel %vm1650_vm2, %v3813_v56, %v1647_v44  ;;  %v1576_v53 = vsub.f32 1.5, %v1575_v55  ;;  %v1724_v41 = vmul.f32 %v2746_v54, %v1723_v4  ;;  %vm1729_vm7 = vweird.f32 %v2746_v54 }
 0x31e   : > { %v1844_v11 = vadd.f32 %v1812_v25, %v1780_v20  ;;  %v1764_v61 = vmul.f32 %v1651_v5, %v3355_v35  ;;  %v1661_v27 = vsel %vm1660_vm3, %v3818_v29, %v1657_v32  ;;  %v1716_v63 = vsub.f32 1.5, %v1715_v43  ;;  %v2748_v42 = vpop.eup %2747 }
 0x31f   : > { %v1765_v13 = vmul.f32 %v1661_v27, %v3377_v51  ;;  %v1577_v3 = vmul.f32 %v3832_v24, %v1576_v53  ;;  %v1495_v47 = vmul.f32 0.5, %v1494_v8  ;;  %v1725_v21 = vmul.f32 0.5, %v1724_v41 }
 0x320   : > { %1876 = vst [vmem:[%s3119_s22 + $0x30] sm:$0xff] %v1844_v11  ;;  %v1828_v59 = vmul.f32 0.33333334, %v1764_v61  ;;  %v1717_v35 = vmul.f32 %v3838_v0, %v1716_v63  ;;  %v1733_v15 = vmul.f32 %v2748_v42, %v3850_v50  ;;  %vm1498_vm9 = vweird.f32 %v3816_v46 }
 0x321   : > { %v1829_v51 = vmul.f32 0.33333334, %v1765_v13  ;;  %v1581_v56 = vsel %vm1580_vm5, %v3832_v24, %v1577_v3  ;;  %v1496_v33 = vsub.f32 1.5, %v1495_v47  ;;  %v1726_v14 = vsub.f32 1.5, %v1725_v21  ;;  %vm1500_vm10 = vmor %vm1498_vm9, %vm1499_vm6 }
 0x322   : > { %v1860_v19 = vadd.f32 %v1828_v59, %v1796_v17  ;;  %v1757_v29 = vmul.f32 %v1581_v56, %v3363_v39  ;;  %v1721_v16 = vsel %vm1720_vm8, %v3838_v0, %v1717_v35  ;;  %v1734_v49 = vmul.f32 %v2748_v42, %v1733_v15 }
 0x323   : > { %v1861_v58 = vadd.f32 %v1829_v51, %v1797_v45  ;;  %v1771_v30 = vmul.f32 %v1721_v16, %v3339_v28  ;;  %v1497_v39 = vmul.f32 %v3857_v60, %v1496_v33  ;;  %v1727_v28 = vmul.f32 %v2746_v54, %v1726_v14 }
 0x324   : > { %1892 = vst [vmem:[%s3119_s22 + $0xb0] sm:$0xff] %v1860_v19  ;;  %v1821_v26 = vmul.f32 0.33333334, %v1757_v29  ;;  %vm1728_vm11 = vweird.f32 %v3825_v10  ;;  %v1735_v6 = vmul.f32 0.5, %v1734_v49  ;;  %vm1739_vm13 = vweird.f32 %v2748_v42  ;;  %v1781_v10 = vld [vmem:[%s3113_s25 + $0x38] sm:$0xff] }
 0x325   : > { %1893 = vst [vmem:[%s3119_s22 + $0xb8] sm:$0xff] %v1861_v58  ;;  %v1835_v24 = vmul.f32 0.33333334, %v1771_v30  ;;  %vm1730_vm12 = vmor %vm1728_vm11, %vm1729_vm7  ;;  %v1501_v46 = vsel %vm1500_vm10, %v3857_v60, %v1497_v39  ;;  %vm1738_vm14 = vweird.f32 %v3850_v50 }
 0x326   : > { %v1853_v34 = vadd.f32 %v1821_v26, %v1789_v2  ;;  %v1731_v9 = vsel %vm1730_vm12, %v2746_v54, %v1727_v28  ;;  %v1749_v31 = vmul.f32 %v1501_v46, %v3361_v38  ;;  %v1736_v62 = vsub.f32 1.5, %v1735_v6  ;;  %vm1740_vm15 = vmor %vm1738_vm14, %vm1739_vm13 }
 0x327   : > { %v1867_v0 = vadd.f32 %v1835_v24, %v1803_v40  ;;  %v1772_v18 = vmul.f32 %v1731_v9, %v3357_v36  ;;  %v1805_v36 = vld [vmem:[%s3113_s25 + $0xf8] sm:$0xff] }
 0x328   : > { %1885 = vst [vmem:[%s3119_s22 + $0x78] sm:$0xff] %v1853_v34  ;;  %v1813_v57 = vmul.f32 0.33333334, %v1749_v31  ;;  %v1737_v7 = vmul.f32 %v2748_v42, %v1736_v62 }
 0x329   : > { %1899 = vst [vmem:[%s3119_s22 + $0xe8] sm:$0xff] %v1867_v0  ;;  %v1836_v12 = vmul.f32 0.33333334, %v1772_v18 }
 0x32a   : > { %v1845_v1 = vadd.f32 %v1813_v57, %v1781_v10  ;;  %v1741_v38 = vsel %vm1740_vm15, %v2748_v42, %v1737_v7 }
 0x32b   : > { %v1868_v48 = vadd.f32 %v1836_v12, %v1804_v37  ;;  %v1773_v23 = vmul.f32 %v1741_v38, %v3379_v52 }
 0x32c   : > { %1877 = vst [vmem:[%s3119_s22 + $0x38] sm:$0xff] %v1845_v1 }
 0x32d   : > { %1900 = vst [vmem:[%s3119_s22 + $0xf0] sm:$0xff] %v1868_v48  ;;  %v1837_v60 = vmul.f32 0.33333334, %v1773_v23 }
 0x32f   : > { %v1869_v20 = vadd.f32 %v1837_v60, %v1805_v36 }
 0x331   : > { %1901 = vst [vmem:[%s3119_s22 + $0xf8] sm:$0xff] %v1869_v20 }
 0x332 PF: > { %s2451_s30 = sshll.u32 %s2879_s24, 7  ;;  %s1984_s23 = sshll.u32 %s3117_s16, 4  ;;  %s1985_s23 = int_to_ptr.vmem [resolvable:$true] %s1984_s23 }
 0x333   : > { %s1983_s8 = scalar_lea.hbm %s3993_s4, %s2451_s30  ;;  %s1967_s13 = scalar_lea.sflag [#allocation5], %s3099_s17 }
 0x334   : > { %s1986_s12 = sshll.u32 %s1983_s8, 4  ;;  %s2769_s21 = scalar_lea.hbm %s3993_s4, 512  ;;  %s1987_s12 = int_to_ptr.hbm [resolvable:$true] %s1986_s12 }
 0x335   : > { %s2763_s25 = sshra.s32 %s1987_s12, 4  ;;  %s2764_s25 = int_to_ptr.hbm [resolvable:$true] %s2763_s25 }
 0x336   : > { %s2765_s10 = scalar_lea.hbm %s2764_s25, 128  ;;  %p2770_p11 = scmp.lt.s32.totalorder %s2764_s25, %s3993_s4 }
 0x337   : > { %p2766_p8 = scmp.ne.s32.totalorder %s2764_s25, %s2765_s10  ;;  %p2771_p13 = scmp.lt.s32.totalorder %s2769_s21, %s2765_s10 }
 0x339   : > { %p2767_p9 = pnand %p2766_p8, %p3000_p7  ;;  %p2772_p0 = por %p2771_p13, %p2770_p11 }
 0x33b   : > { %p2768_p10 = pneg %p2767_p9 }
 0x33d   : > { %p2773_p1 = pnand %p2772_p0, %p2768_p10 }
 0x33f   : > { %2776 = shalt.err (!%p2773_p1)
}
 0x340   : > { %s2894_s16 = smov 64   ;;  %s2895_s26 = smov 4  }
 0x341   : > { %2588 = dma.vmem_to_hbm [thread:$0]  (%p3000_p7), %s1985_s23, 2048, %s1987_s12, %s1967_s13, %s2894_s16, %s2894_s16, %s2895_s26  }
 0x342   : > { %s2452_s30 = sshll.u32 %s2879_s24, 8  ;;  %s2001_s28 = sshll.u32 %s3119_s22, 4  ;;  %s2002_s28 = int_to_ptr.vmem [resolvable:$true] %s2001_s28 }
 0x343   : > { %s2000_s7 = scalar_lea.hbm %s3994_s5, %s2452_s30  ;;  %s1972_s10 = scalar_lea.sflag [#allocation7], %s3099_s17 }
 0x344   : > { %s2003_s25 = sshll.u32 %s2000_s7, 4  ;;  %s2797_s24 = scalar_lea.hbm %s3994_s5, 1024  ;;  %s2004_s25 = int_to_ptr.hbm [resolvable:$true] %s2003_s25 }
 0x345   : > { %s2791_s9 = sshra.s32 %s2004_s25, 4  ;;  %s2792_s9 = int_to_ptr.hbm [resolvable:$true] %s2791_s9 }
 0x346   : > { %s2793_s21 = scalar_lea.hbm %s2792_s9, 256  ;;  %p2798_p5 = scmp.lt.s32.totalorder %s2792_s9, %s3994_s5 }
 0x347   : > { %p2794_p2 = scmp.ne.s32.totalorder %s2792_s9, %s2793_s21  ;;  %p2799_p6 = scmp.lt.s32.totalorder %s2797_s24, %s2793_s21 }
 0x349   : > { %p2795_p3 = pnand %p2794_p2, %p3000_p7  ;;  %p2800_p8 = por %p2799_p6, %p2798_p5 }
 0x34b   : > { %p2796_p4 = pneg %p2795_p3 }
 0x34d   : > { %p2801_p9 = pnand %p2800_p8, %p2796_p4 }
 0x34f   : > { %2804 = shalt.err (!%p2801_p9)
}
 0x350   : > { %s2896_s17 = smov 128   ;;  %s2897_s12 = smov 8  }
 0x351   : > { %2589 = dma.vmem_to_hbm [thread:$0]  (%p3000_p7), %s2002_s28, 4096, %s2004_s25, %s1972_s10, %s2896_s17, %s2896_s17, %s2897_s12  }
 0x352 PF: > { %p2599_p10 = scmp.ge.s32.totalorder %s2891_s27, 2  ;;  %s2018_s13 = sand.u32 1, %s2855_s18  }
 0x353   : > { %s2019_s16 = scalar_lea.sflag [#allocation5], %s2018_s13 }
 0x354   : > { %p2593_p11 = pnand %p2599_p10, %p3008_p12 }
 0x356   : > { %p2594_p13 = pneg %p2593_p11 }
 0x358   : > { %2846 = dma.done.wait (%p2594_p13), %s2019_s16, 2048  }
 0x359   : > { %2848 = vsyncadd (%p2594_p13), %s2019_s16, 4294965248  ;;  %s2029_s26 = scalar_lea.sflag [#allocation7], %s2018_s13 }
 0x35a   : > { %2850 = dma.done.wait (%p2594_p13), %s2029_s26, 4096  }
 0x35b   : > { %2852 = vsyncadd (%p2594_p13), %s2029_s26, 4294963200  ;;  %s22_s27 = sadd.s32 1, %s2891_s27   ;;  %s4011_s21 = sld [smem:[#allocation10_spill]] }
 0x35c   : > { %p19_p0 = scmp.ge.s32.totalorder %s22_s27, 18   ;;  %s4012_s22 = sld [smem:[#allocation15_spill]] }
 0x35d   : > { %s4013_s23 = sld [smem:[#allocation11_spill]]  ;;  %s4017_s18 = smov %s2859_s19 }
 0x35e   : > { %s4014_s24 = sld [smem:[#allocation12_spill]]  ;;  %s4018_s19 = smov %s2863_s20 }
 0x35f   : > { %s4015_s25 = sld [smem:[#allocation13_spill]]  ;;  %s4019_s20 = smov %s3013_s15 }
 0x360   : > { %s4016_s26 = sld [smem:[#allocation14_spill]]  ;;  %21 = sbr.rel (!%p19_p0) target bundleno = 10 (0xa), region = 145 }
 0x365   :  { %2035 = vsyncpa [#allocation5], 1 }
 0x366   :  { %2037 = vsyncpa [#allocation5 + $0x1], 1 }
 0x367   :  { %2038 = vsyncpa [#allocation7], 1 }
 0x368   :  { %2040 = vsyncpa [#allocation7 + $0x1], 1 }

// kernel: item_conv_forward.2
= control target key start
LH: loop header
LB: loop body
LE: loop exit
PB: predicated region body
PF: predicated region fallthrough
CT: control target
= control target key end

     0   :  { %s2784_s18 = smov 0   ;;  %s2786_s19 = smov 0   ;;  %s3757_s0 = inlined_call_operand.vmem [shape: bf16[1024,1024], index: 0, kind: input, shape index: {}]   ;;  %s3758_s1 = inlined_call_operand.vmem [shape: bf16[1024,128], index: 1, kind: input, shape index: {}]   ;;  %s3759_s2 = inlined_call_operand.vmem [shape: bf16[128,128], index: 2, kind: input, shape index: {}]   ;;  %s3760_s3 = inlined_call_operand.vmem [shape: f32[1024,128], index: 3, kind: input, shape index: {}]   ;;  %s3761_s4 = inlined_call_operand.vmem [shape: bf16[1024,128], index: 4, kind: output, shape index: {0}]   ;;  %s3762_s5 = inlined_call_operand.vmem [shape: f32[1024,128], index: 5, kind: output, shape index: {1}]  }
   0x1   :  { %s2788_s20 = smov 0   ;;  %s2790_s21 = smov 0  }
   0x2   :  { %s2792_s22 = smov 0   ;;  %s2794_s23 = smov 0  }
   0x3   :  { %s2796_s24 = smov 0  }
   0x4 LB: > { %s25_s25 = sadd.s32 1, %s2743_s22  ;;  %s28_s26 = sadd.s32 1, %s2747_s23  ;;  %s2751_s24 = sphi %s2796_s24, %s16_s24   ;;  %s2747_s23 = sphi %s2794_s23, %s3770_s23   ;;  %s2743_s22 = sphi %s2792_s22, %s3769_s22   ;;  %s2739_s21 = sphi %s2790_s21, %s3768_s21   ;;  %s2735_s20 = sphi %s2788_s20, %s3767_s20   ;;  %s2731_s19 = sphi %s2786_s19, %s3766_s19   ;;  %s2727_s18 = sphi %s2784_s18, %s3765_s18  }
   0x5   : > { %p26_p0 = scmp.ge.s32.totalorder %s25_s25, 4  ;;  %p44_p1 = scmp.ne.s32.totalorder %s2731_s19, %s2727_s18 }
   0x6   : > { %p45_p2 = scmp.eq.s32.totalorder %s2751_s24, 0  ;;  %s37_s30 = sadd.s32 1, %s2731_s19 }
   0x7   : > { %s3772_s25 = smov (%p26_p0, %s25_s25), 0  ;;  %s3774_s26 = smov (!%p26_p0, %s28_s26), %s2747_s23 }
   0x8   : > { %p46_p3 = por %p45_p2, %p44_p1  ;;  %p30_p4 = scmp.ge.s32.totalorder %s3774_s26, 4 }
   0x9   : > { %s33_s27 = ssub.s32 %s2743_s22, %s3772_s25  ;;  %p2140_p6 = scmp.ge.s32.totalorder %s2751_s24, 16 }
   0xa   : > { %s3776_s26 = smov (%p30_p4, %s3774_s26), 0 }
   0xb   : > { %s32_s28 = ssub.s32 %s2747_s23, %s3776_s26  ;;  %198 = sbr.rel (%p2140_p6) target bundleno = 55 (0x37), region = 20 }
   0xc   : > { %s34_s29 = sor.u32 %s33_s27, %s32_s28 }
   0xd   : > { %p35_p5 = scmp.eq.s32.totalorder %s34_s29, 0 }
   0xf   : > { %s2835_s6 = scalar_select %p35_p5, %s2731_s19, %s37_s30  }
  0x10   : > { %201 = sbr.rel (!%p46_p3) target bundleno = 55 (0x37), region = 24  ;;  %s203_s7 = sand.u32 (%p46_p3), 1, %s2731_s19  }
  0x11   : > { %s2143_s8 = sshll.u32 (%p46_p3), %s2743_s22, 1  ;;  %s2141_s9 = sshll.u32 (%p46_p3), %s203_s7, 8 }
  0x12   : > { %s2384_s10 = sshll.u32 (%p46_p3), %s2747_s23, 8  ;;  %s2849_s16 = scalar_lea.vmem (%p46_p3), [#allocation3], %s2141_s9 }
  0x13   : > { %s209_s11 = sadd.s32 (%p46_p3), %s2384_s10, %s2143_s8 }
  0x14   : > { %s2145_s12 = sshll.u32 (%p46_p3), %s209_s11, 2 }
  0x15   : > { %s2844_s15 = scalar_lea.vmem %s3757_s0, %s2145_s12 }
  0x16   : > { %v302_v0 = vld [vmem:[%s2844_s15] sm:$0xff] }
  0x17   : > { %v304_v1 = vld [vmem:[%s2844_s15 + $0x20] sm:$0xff]  ;;  %303 = vst [vmem:[%s2849_s16] sm:$0xff] %v302_v0 }
  0x18   : > { %v306_v2 = vld [vmem:[%s2844_s15 + $0x40] sm:$0xff]  ;;  %305 = vst [vmem:[%s2849_s16 + $0x8] sm:$0xff] %v304_v1 }
  0x19   : > { %v308_v3 = vld [vmem:[%s2844_s15 + $0x60] sm:$0xff]  ;;  %307 = vst [vmem:[%s2849_s16 + $0x10] sm:$0xff] %v306_v2 }
  0x1a   : > { %v310_v4 = vld [vmem:[%s2844_s15 + $0x80] sm:$0xff]  ;;  %309 = vst [vmem:[%s2849_s16 + $0x18] sm:$0xff] %v308_v3 }
  0x1b   : > { %v312_v5 = vld [vmem:[%s2844_s15 + $0xa0] sm:$0xff]  ;;  %311 = vst [vmem:[%s2849_s16 + $0x20] sm:$0xff] %v310_v4 }
  0x1c   : > { %v314_v6 = vld [vmem:[%s2844_s15 + $0xc0] sm:$0xff]  ;;  %313 = vst [vmem:[%s2849_s16 + $0x28] sm:$0xff] %v312_v5 }
  0x1d   : > { %v316_v7 = vld [vmem:[%s2844_s15 + $0xe0] sm:$0xff]  ;;  %315 = vst [vmem:[%s2849_s16 + $0x30] sm:$0xff] %v314_v6 }
  0x1e   : > { %v318_v8 = vld [vmem:[%s2844_s15 + $0x100] sm:$0xff]  ;;  %317 = vst [vmem:[%s2849_s16 + $0x38] sm:$0xff] %v316_v7 }
  0x1f   : > { %v320_v9 = vld [vmem:[%s2844_s15 + $0x120] sm:$0xff]  ;;  %319 = vst [vmem:[%s2849_s16 + $0x40] sm:$0xff] %v318_v8 }
  0x20   : > { %v322_v10 = vld [vmem:[%s2844_s15 + $0x140] sm:$0xff]  ;;  %321 = vst [vmem:[%s2849_s16 + $0x48] sm:$0xff] %v320_v9 }
  0x21   : > { %v324_v11 = vld [vmem:[%s2844_s15 + $0x160] sm:$0xff]  ;;  %323 = vst [vmem:[%s2849_s16 + $0x50] sm:$0xff] %v322_v10 }
  0x22   : > { %v326_v12 = vld [vmem:[%s2844_s15 + $0x180] sm:$0xff]  ;;  %325 = vst [vmem:[%s2849_s16 + $0x58] sm:$0xff] %v324_v11 }
  0x23   : > { %v328_v13 = vld [vmem:[%s2844_s15 + $0x1a0] sm:$0xff]  ;;  %327 = vst [vmem:[%s2849_s16 + $0x60] sm:$0xff] %v326_v12 }
  0x24   : > { %v330_v14 = vld [vmem:[%s2844_s15 + $0x1c0] sm:$0xff]  ;;  %329 = vst [vmem:[%s2849_s16 + $0x68] sm:$0xff] %v328_v13 }
  0x25   : > { %v332_v15 = vld [vmem:[%s2844_s15 + $0x1e0] sm:$0xff]  ;;  %331 = vst [vmem:[%s2849_s16 + $0x70] sm:$0xff] %v330_v14 }
  0x26   : > { %v334_v16 = vld [vmem:[%s2844_s15 + $0x200] sm:$0xff]  ;;  %333 = vst [vmem:[%s2849_s16 + $0x78] sm:$0xff] %v332_v15 }
  0x27   : > { %v336_v17 = vld [vmem:[%s2844_s15 + $0x220] sm:$0xff]  ;;  %335 = vst [vmem:[%s2849_s16 + $0x80] sm:$0xff] %v334_v16 }
  0x28   : > { %v338_v18 = vld [vmem:[%s2844_s15 + $0x240] sm:$0xff]  ;;  %337 = vst [vmem:[%s2849_s16 + $0x88] sm:$0xff] %v336_v17 }
  0x29   : > { %v340_v19 = vld [vmem:[%s2844_s15 + $0x260] sm:$0xff]  ;;  %339 = vst [vmem:[%s2849_s16 + $0x90] sm:$0xff] %v338_v18 }
  0x2a   : > { %v342_v20 = vld [vmem:[%s2844_s15 + $0x280] sm:$0xff]  ;;  %341 = vst [vmem:[%s2849_s16 + $0x98] sm:$0xff] %v340_v19 }
  0x2b   : > { %v344_v21 = vld [vmem:[%s2844_s15 + $0x2a0] sm:$0xff]  ;;  %343 = vst [vmem:[%s2849_s16 + $0xa0] sm:$0xff] %v342_v20 }
  0x2c   : > { %v346_v22 = vld [vmem:[%s2844_s15 + $0x2c0] sm:$0xff]  ;;  %345 = vst [vmem:[%s2849_s16 + $0xa8] sm:$0xff] %v344_v21 }
  0x2d   : > { %v348_v23 = vld [vmem:[%s2844_s15 + $0x2e0] sm:$0xff]  ;;  %347 = vst [vmem:[%s2849_s16 + $0xb0] sm:$0xff] %v346_v22 }
  0x2e   : > { %v350_v24 = vld [vmem:[%s2844_s15 + $0x300] sm:$0xff]  ;;  %349 = vst [vmem:[%s2849_s16 + $0xb8] sm:$0xff] %v348_v23 }
  0x2f   : > { %v352_v25 = vld [vmem:[%s2844_s15 + $0x320] sm:$0xff]  ;;  %351 = vst [vmem:[%s2849_s16 + $0xc0] sm:$0xff] %v350_v24 }
  0x30   : > { %v354_v26 = vld [vmem:[%s2844_s15 + $0x340] sm:$0xff]  ;;  %353 = vst [vmem:[%s2849_s16 + $0xc8] sm:$0xff] %v352_v25 }
  0x31   : > { %v356_v27 = vld [vmem:[%s2844_s15 + $0x360] sm:$0xff]  ;;  %355 = vst [vmem:[%s2849_s16 + $0xd0] sm:$0xff] %v354_v26 }
  0x32   : > { %v358_v28 = vld [vmem:[%s2844_s15 + $0x380] sm:$0xff]  ;;  %357 = vst [vmem:[%s2849_s16 + $0xd8] sm:$0xff] %v356_v27 }
  0x33   : > { %v360_v29 = vld [vmem:[%s2844_s15 + $0x3a0] sm:$0xff]  ;;  %359 = vst [vmem:[%s2849_s16 + $0xe0] sm:$0xff] %v358_v28 }
  0x34   : > { %v362_v30 = vld [vmem:[%s2844_s15 + $0x3c0] sm:$0xff]  ;;  %361 = vst [vmem:[%s2849_s16 + $0xe8] sm:$0xff] %v360_v29 }
  0x35   : > { %v364_v31 = vld [vmem:[%s2844_s15 + $0x3e0] sm:$0xff]  ;;  %363 = vst [vmem:[%s2849_s16 + $0xf0] sm:$0xff] %v362_v30 }
  0x36   : > { %365 = vst [vmem:[%s2849_s16 + $0xf8] sm:$0xff] %v364_v31 }
  0x37 PF: > { %p2146_p7 = scmp.ge.s32.totalorder %s2751_s24, 1  ;;  %p388_p8 = scmp.lt.s32.totalorder %s2751_s24, 17 }
  0x39   : > { %p389_p9 = pnand %p2146_p7, %p388_p8 }
  0x3a   : > { %s395_s17 = sand.u32 (!%p389_p9), 1, %s2727_s18   ;;  %s2148_s27 = sshll.u32 (!%p389_p9), %s2735_s20, 5 }
  0x3b   : > { %392 = sbr.rel (%p389_p9) target bundleno = 804 (0x324), region = 70  ;;  %s2147_s28 = sshll.u32 (!%p389_p9), %s395_s17, 8 }
  0x3c   : > { %p440_p10 = scmp.lt.s32.totalorder (!%p389_p9), %s2148_s27, 127  ;;  %s2150_s29 = sshll.u32 (!%p389_p9), %s2739_s21, 5 }
  0x3d   : > { %p446_p11 = scmp.lt.s32.totalorder (!%p389_p9), %s2150_s29, 127  ;;  %p2156_p12 = scmp.ne.s32.totalorder (!%p389_p9), %s2735_s20, 0 }
  0x40   : > { %s3778_s27 = smov (!%p440_p10, %s2148_s27), 127  ;;  %s3780_s29 = smov (!%p446_p11, %s2150_s29), 127 }
  0x41   : > { %s2149_s30 = sshll.u32 %s3778_s27, 2  ;;  %s2151_s10 = sshll.u32 %s3780_s29, 3 }
  0x42   : > { %s2920_s9 = scalar_lea.vmem %s3758_s1, %s2149_s30  ;;  %s2153_s11 = sshll.u32 %s3780_s29, 2 }
  0x43   : > { %s2925_s14 = scalar_lea.vmem %s3760_s3, %s2151_s10  ;;  %s2930_s21 = scalar_lea.vmem %s3761_s4, %s2153_s11 }
  0x44   : > { %s2935_s27 = scalar_lea.vmem %s3762_s5, %s2151_s10  ;;  %s2937_s30 = scalar_lea.vmem [#allocation3], %s2147_s28 }
  0x45   : > { %466 = sbr.rel (%p2156_p12) target bundleno = 107 (0x6b), region = 78 }
  0x4a   : > { %v2753_v32 = vmov 0.0  }
  0x4b   : > { %467 = vst [vmem:[#allocation2 + $0xb0] sm:$0xff] %v2753_v32 }
  0x4c   : > { %468 = vst [vmem:[#allocation2] sm:$0xff] %v2753_v32 }
  0x4d   : > { %469 = vst [vmem:[#allocation2 + $0xd8] sm:$0xff] %v2753_v32 }
  0x4e   : > { %470 = vst [vmem:[#allocation2 + $0x18] sm:$0xff] %v2753_v32 }
  0x4f   : > { %471 = vst [vmem:[#allocation2 + $0x50] sm:$0xff] %v2753_v32 }
  0x50   : > { %472 = vst [vmem:[#allocation2 + $0x68] sm:$0xff] %v2753_v32 }
  0x51   : > { %473 = vst [vmem:[#allocation2 + $0x30] sm:$0xff] %v2753_v32 }
  0x52   : > { %474 = vst [vmem:[#allocation2 + $0x48] sm:$0xff] %v2753_v32 }
  0x53   : > { %475 = vst [vmem:[#allocation2 + $0x80] sm:$0xff] %v2753_v32 }
  0x54   : > { %476 = vst [vmem:[#allocation2 + $0x88] sm:$0xff] %v2753_v32 }
  0x55   : > { %477 = vst [vmem:[#allocation2 + $0xe8] sm:$0xff] %v2753_v32 }
  0x56   : > { %478 = vst [vmem:[#allocation2 + $0xb8] sm:$0xff] %v2753_v32 }
  0x57   : > { %479 = vst [vmem:[#allocation2 + $0x60] sm:$0xff] %v2753_v32 }
  0x58   : > { %480 = vst [vmem:[#allocation2 + $0xf0] sm:$0xff] %v2753_v32 }
  0x59   : > { %481 = vst [vmem:[#allocation2 + $0x8] sm:$0xff] %v2753_v32 }
  0x5a   : > { %482 = vst [vmem:[#allocation2 + $0x78] sm:$0xff] %v2753_v32 }
  0x5b   : > { %483 = vst [vmem:[#allocation2 + $0x38] sm:$0xff] %v2753_v32 }
  0x5c   : > { %484 = vst [vmem:[#allocation2 + $0x58] sm:$0xff] %v2753_v32 }
  0x5d   : > { %485 = vst [vmem:[#allocation2 + $0x40] sm:$0xff] %v2753_v32 }
  0x5e   : > { %486 = vst [vmem:[#allocation2 + $0xc8] sm:$0xff] %v2753_v32 }
  0x5f   : > { %487 = vst [vmem:[#allocation2 + $0xe0] sm:$0xff] %v2753_v32 }
  0x60   : > { %488 = vst [vmem:[#allocation2 + $0x90] sm:$0xff] %v2753_v32 }
  0x61   : > { %489 = vst [vmem:[#allocation2 + $0x70] sm:$0xff] %v2753_v32 }
  0x62   : > { %490 = vst [vmem:[#allocation2 + $0xc0] sm:$0xff] %v2753_v32 }
  0x63   : > { %491 = vst [vmem:[#allocation2 + $0xa8] sm:$0xff] %v2753_v32 }
  0x64   : > { %492 = vst [vmem:[#allocation2 + $0xd0] sm:$0xff] %v2753_v32 }
  0x65   : > { %493 = vst [vmem:[#allocation2 + $0x10] sm:$0xff] %v2753_v32 }
  0x66   : > { %494 = vst [vmem:[#allocation2 + $0x28] sm:$0xff] %v2753_v32 }
  0x67   : > { %495 = vst [vmem:[#allocation2 + $0xa0] sm:$0xff] %v2753_v32 }
  0x68   : > { %496 = vst [vmem:[#allocation2 + $0xf8] sm:$0xff] %v2753_v32 }
  0x69   : > { %497 = vst [vmem:[#allocation2 + $0x20] sm:$0xff] %v2753_v32 }
  0x6a   : > { %498 = vst [vmem:[#allocation2 + $0x98] sm:$0xff] %v2753_v32 }
  0x6b PF: > { %v2424_v33 = vld [vmem:[%s2920_s9 + $0x38] sm:$0xff]  ;;  %v2423_v35 = vld [vmem:[%s2920_s9 + $0x30] sm:$0xff]  ;;  %v2422_v37 = vld [vmem:[%s2920_s9 + $0x28] sm:$0xff]  ;;  %p2349_p13 = scmp.ne.s32.totalorder %s2735_s20, 3 }
  0x6c   : > { %v2432_v34 = vld [vmem:[%s2920_s9 + $0x78] sm:$0xff]  ;;  %851 = vmatpush.bf16.msra.mxu0 %v2424_v33  ;;  %2536 = vmatpush.bf16.msra.mxu2 %v2424_v33  ;;  %v2431_v36 = vld [vmem:[%s2920_s9 + $0x70] sm:$0xff]  ;;  %v2430_v38 = vld [vmem:[%s2920_s9 + $0x68] sm:$0xff] }
  0x6d   : > { %940 = vmatpush.bf16.msra.mxu1 %v2432_v34  ;;  %2544 = vmatpush.bf16.msra.mxu3 %v2432_v34  ;;  %v2421_v39 = vld [vmem:[%s2920_s9 + $0x20] sm:$0xff]  ;;  %v2420_v41 = vld [vmem:[%s2920_s9 + $0x18] sm:$0xff]  ;;  %v2419_v43 = vld [vmem:[%s2920_s9 + $0x10] sm:$0xff] }
  0x6e   : > { %v2429_v40 = vld [vmem:[%s2920_s9 + $0x60] sm:$0xff]  ;;  %v2428_v42 = vld [vmem:[%s2920_s9 + $0x58] sm:$0xff]  ;;  %v2427_v44 = vld [vmem:[%s2920_s9 + $0x50] sm:$0xff] }
  0x6f   : > { %v2418_v45 = vld [vmem:[%s2920_s9 + $0x8] sm:$0xff]  ;;  %v2417_v47 = vld [vmem:[%s2920_s9] sm:$0xff]  ;;  %v2167_v61 = vld [vmem:[%s2937_s30 + $0x10] sm:$0xf] }
  0x70   : > { %852 = vmatpush.bf16.msra.mxu0 %v2423_v35  ;;  %2537 = vmatpush.bf16.msra.mxu2 %v2423_v35  ;;  %v2426_v46 = vld [vmem:[%s2920_s9 + $0x48] sm:$0xff]  ;;  %v2425_v48 = vld [vmem:[%s2920_s9 + $0x40] sm:$0xff]  ;;  %v2388_v62 = vld [vmem:[%s2937_s30 + $0x14] sm:$0xf0] }
  0x71   : > { %941 = vmatpush.bf16.msra.mxu1 %v2431_v36  ;;  %2545 = vmatpush.bf16.msra.mxu3 %v2431_v36  ;;  %v2159_v49 = vld [vmem:[%s2937_s30] sm:$0xf]  ;;  %v2386_v50 = vld [vmem:[%s2937_s30 + $0x4] sm:$0xf0]  ;;  %v2385_v53 = vld [vmem:[%s2937_s30 + $0x4] sm:$0xf]  ;;  %v2168_v5 = vor.u32 %v2388_v62, %v2167_v61 }
  0x72   : > { %v2223_v51 = vld [vmem:[%s2937_s30 + $0x80] sm:$0xf]  ;;  %v2402_v52 = vld [vmem:[%s2937_s30 + $0x84] sm:$0xf0]  ;;  %v2161_v54 = vld [vmem:[%s2937_s30 + $0x8] sm:$0xf0]  ;;  %v2160_v57 = vor.u32 %v2386_v50, %v2159_v49 }
  0x73   : > { %v2401_v55 = vld [vmem:[%s2937_s30 + $0x84] sm:$0xf]  ;;  %v2225_v56 = vld [vmem:[%s2937_s30 + $0x88] sm:$0xf0]  ;;  %v2224_v58 = vor.u32 %v2402_v52, %v2223_v51  ;;  %v2164_v59 = vor.u32 %v2385_v53, %v2161_v54  ;;  %v2231_v63 = vld [vmem:[%s2937_s30 + $0x90] sm:$0xf] }
  0x74   : > { %853 = vmatpush.bf16.msra.mxu0 %v2422_v37  ;;  %2538 = vmatpush.bf16.msra.mxu2 %v2422_v37  ;;  %v2228_v60 = vor.u32 %v2401_v55, %v2225_v56  ;;  %v2404_v0 = vld [vmem:[%s2937_s30 + $0x94] sm:$0xf0]  ;;  %v2387_v1 = vld [vmem:[%s2937_s30 + $0x14] sm:$0xf]  ;;  %v2169_v2 = vld [vmem:[%s2937_s30 + $0x18] sm:$0xf0] }
  0x75   : > { %942 = vmatpush.bf16.msra.mxu1 %v2430_v38  ;;  %2546 = vmatpush.bf16.msra.mxu3 %v2430_v38  ;;  %v2403_v3 = vld [vmem:[%s2937_s30 + $0x94] sm:$0xf]  ;;  %v2233_v4 = vld [vmem:[%s2937_s30 + $0x98] sm:$0xf0]  ;;  %v2232_v6 = vor.u32 %v2404_v0, %v2231_v63  ;;  %v2172_v7 = vor.u32 %v2387_v1, %v2169_v2  ;;  %v2175_v9 = vld [vmem:[%s2937_s30 + $0x20] sm:$0xf] }
  0x76   : > { %v2236_v8 = vor.u32 %v2403_v3, %v2233_v4  ;;  %v2390_v10 = vld [vmem:[%s2937_s30 + $0x24] sm:$0xf0]  ;;  %v2239_v11 = vld [vmem:[%s2937_s30 + $0xa0] sm:$0xf]  ;;  %v2389_v13 = vld [vmem:[%s2937_s30 + $0x24] sm:$0xf] }
  0x77   : > { %v2406_v12 = vld [vmem:[%s2937_s30 + $0xa4] sm:$0xf0]  ;;  %v2177_v14 = vld [vmem:[%s2937_s30 + $0x28] sm:$0xf0]  ;;  %v2405_v15 = vld [vmem:[%s2937_s30 + $0xa4] sm:$0xf]  ;;  %v2176_v17 = vor.u32 %v2390_v10, %v2175_v9 }
  0x78   : > { %854 = vmatpush.bf16.msra.mxu0 %v2421_v39  ;;  %2539 = vmatpush.bf16.msra.mxu2 %v2421_v39  ;;  %v2241_v16 = vld [vmem:[%s2937_s30 + $0xa8] sm:$0xf0]  ;;  %v2240_v18 = vor.u32 %v2406_v12, %v2239_v11  ;;  %v2180_v19 = vor.u32 %v2389_v13, %v2177_v14  ;;  %v2183_v21 = vld [vmem:[%s2937_s30 + $0x30] sm:$0xf]  ;;  %v2392_v22 = vld [vmem:[%s2937_s30 + $0x34] sm:$0xf0] }
  0x79   : > { %943 = vmatpush.bf16.msra.mxu1 %v2429_v40  ;;  %2547 = vmatpush.bf16.msra.mxu3 %v2429_v40  ;;  %v2244_v20 = vor.u32 %v2405_v15, %v2241_v16  ;;  %v2247_v23 = vld [vmem:[%s2937_s30 + $0xb0] sm:$0xf]  ;;  %v2408_v24 = vld [vmem:[%s2937_s30 + $0xb4] sm:$0xf0]  ;;  %v2391_v25 = vld [vmem:[%s2937_s30 + $0x34] sm:$0xf]  ;;  %v2184_v29 = vor.u32 %v2392_v22, %v2183_v21 }
  0x7a   : > { %v2185_v26 = vld [vmem:[%s2937_s30 + $0x38] sm:$0xf0]  ;;  %v2407_v27 = vld [vmem:[%s2937_s30 + $0xb4] sm:$0xf]  ;;  %v2248_v30 = vor.u32 %v2408_v24, %v2247_v23  ;;  %v2191_v33 = vld [vmem:[%s2937_s30 + $0x40] sm:$0xf] }
  0x7b   : > { %v2249_v28 = vld [vmem:[%s2937_s30 + $0xb8] sm:$0xf0]  ;;  %v2188_v31 = vor.u32 %v2391_v25, %v2185_v26  ;;  %v2394_v34 = vld [vmem:[%s2937_s30 + $0x44] sm:$0xf0]  ;;  %v2255_v35 = vld [vmem:[%s2937_s30 + $0xc0] sm:$0xf] }
  0x7c   : > { %855 = vmatpush.bf16.msra.mxu0 %v2420_v41  ;;  %2540 = vmatpush.bf16.msra.mxu2 %v2420_v41  ;;  %v2252_v32 = vor.u32 %v2407_v27, %v2249_v28  ;;  %v2410_v36 = vld [vmem:[%s2937_s30 + $0xc4] sm:$0xf0]  ;;  %v2393_v37 = vld [vmem:[%s2937_s30 + $0x44] sm:$0xf]  ;;  %v2193_v38 = vld [vmem:[%s2937_s30 + $0x48] sm:$0xf0]  ;;  %v2192_v41 = vor.u32 %v2394_v34, %v2191_v33 }
  0x7d   : > { %944 = vmatpush.bf16.msra.mxu1 %v2428_v42  ;;  %2548 = vmatpush.bf16.msra.mxu3 %v2428_v42  ;;  %v2409_v39 = vld [vmem:[%s2937_s30 + $0xc4] sm:$0xf]  ;;  %v2257_v40 = vld [vmem:[%s2937_s30 + $0xc8] sm:$0xf0]  ;;  %v2256_v42 = vor.u32 %v2410_v36, %v2255_v35  ;;  %v2395_v49 = vld [vmem:[%s2937_s30 + $0x54] sm:$0xf] }
  0x7e   : > { %v2201_v50 = vld [vmem:[%s2937_s30 + $0x58] sm:$0xf0]  ;;  %v2411_v51 = vld [vmem:[%s2937_s30 + $0xd4] sm:$0xf]  ;;  %v2397_v61 = vld [vmem:[%s2937_s30 + $0x64] sm:$0xf] }
  0x7f   : > { %v2265_v52 = vld [vmem:[%s2937_s30 + $0xd8] sm:$0xf0]  ;;  %v2204_v55 = vor.u32 %v2395_v49, %v2201_v50  ;;  %v2209_v62 = vld [vmem:[%s2937_s30 + $0x68] sm:$0xf0]  ;;  %v2413_v63 = vld [vmem:[%s2937_s30 + $0xe4] sm:$0xf] }
  0x80   : > { %856 = vmatpush.bf16.msra.mxu0 %v2419_v43  ;;  %2541 = vmatpush.bf16.msra.mxu2 %v2419_v43  ;;  %v2196_v43 = vor.u32 %v2393_v37, %v2193_v38  ;;  %v2268_v56 = vor.u32 %v2411_v51, %v2265_v52  ;;  %v2273_v0 = vld [vmem:[%s2937_s30 + $0xe8] sm:$0xf0]  ;;  %v2212_v3 = vor.u32 %v2397_v61, %v2209_v62  ;;  %v2399_v9 = vld [vmem:[%s2937_s30 + $0x74] sm:$0xf]  ;;  %v2217_v10 = vld [vmem:[%s2937_s30 + $0x78] sm:$0xf0] }
  0x81   : > { %945 = vmatpush.bf16.msra.mxu1 %v2427_v44  ;;  %2549 = vmatpush.bf16.msra.mxu3 %v2427_v44  ;;  %v2260_v44 = vor.u32 %v2409_v39, %v2257_v40  ;;  %v2276_v4 = vor.u32 %v2413_v63, %v2273_v0  ;;  %v2415_v11 = vld [vmem:[%s2937_s30 + $0xf4] sm:$0xf]  ;;  %v2281_v12 = vld [vmem:[%s2937_s30 + $0xf8] sm:$0xf0]  ;;  %v2220_v15 = vor.u32 %v2399_v9, %v2217_v10  ;;  %v500_v27 = vld [vmem:[#allocation2] sm:$0xff] }
  0x82   : > { %v2284_v16 = vor.u32 %v2415_v11, %v2281_v12  ;;  %v515_v23 = vld [vmem:[#allocation2 + $0x38] sm:$0xff]  ;;  %v519_v63 = vld [vmem:[#allocation2 + $0xe0] sm:$0xff]  ;;  %v520_v9 = vld [vmem:[#allocation2 + $0x90] sm:$0xff] }
  0x83   : > { %v516_v33 = vld [vmem:[#allocation2 + $0x58] sm:$0xff] }
  0x84   : > { %857 = vmatpush.bf16.msra.mxu0 %v2418_v45  ;;  %2542 = vmatpush.bf16.msra.mxu2 %v2418_v45  ;;  %v2199_v45 = vld [vmem:[%s2937_s30 + $0x50] sm:$0xf]  ;;  %v501_v37 = vld [vmem:[#allocation2 + $0xd8] sm:$0xff] }
  0x85   : > { %946 = vmatpush.bf16.msra.mxu1 %v2426_v46  ;;  %2550 = vmatpush.bf16.msra.mxu3 %v2426_v46  ;;  %v2396_v46 = vld [vmem:[%s2937_s30 + $0x54] sm:$0xf0] }
  0x86   : > { %v2200_v53 = vor.u32 %v2396_v46, %v2199_v45 }
  0x88   : > { %858 = vmatpush.bf16.msra.mxu0 %v2417_v47  ;;  %2543 = vmatpush.bf16.msra.mxu2 %v2417_v47  ;;  %v2263_v47 = vld [vmem:[%s2937_s30 + $0xd0] sm:$0xf] }
  0x89   : > { %947 = vmatpush.bf16.msra.mxu1 %v2425_v48  ;;  %2551 = vmatpush.bf16.msra.mxu3 %v2425_v48  ;;  %v2412_v48 = vld [vmem:[%s2937_s30 + $0xd4] sm:$0xf0] }
  0x8a   : > { %v2264_v54 = vor.u32 %v2412_v48, %v2263_v47  ;;  %v502_v47 = vld [vmem:[#allocation2 + $0x18] sm:$0xff] }
  0x8b   : > { %859 = vmatmul.bf16.vlgmr.msra.gmra.mxu0 %v2160_v57  ;;  %899 = vmatmul.bf16.vlgmr.msra.gmra.mxu2 %v2224_v58  ;;  %v2207_v57 = vld [vmem:[%s2937_s30 + $0x60] sm:$0xf]  ;;  %v2398_v58 = vld [vmem:[%s2937_s30 + $0x64] sm:$0xf0] }
  0x8c   : > { %948 = vmatmul.bf16.vlgmr.msra.gmra.mxu1 %v2164_v59  ;;  %988 = vmatmul.bf16.vlgmr.msra.gmra.mxu3 %v2228_v60  ;;  %v2271_v59 = vld [vmem:[%s2937_s30 + $0xe0] sm:$0xf]  ;;  %v2414_v60 = vld [vmem:[%s2937_s30 + $0xe4] sm:$0xf0]  ;;  %v2208_v1 = vor.u32 %v2398_v58, %v2207_v57  ;;  %v503_v57 = vld [vmem:[#allocation2 + $0x50] sm:$0xff] }
  0x8d   : > { %v2272_v2 = vor.u32 %v2414_v60, %v2271_v59 }
  0x9b   : > { %864 = vmatmul.bf16.gmra.mxu0 %v2168_v5  ;;  %904 = vmatmul.bf16.gmra.mxu2 %v2232_v6  ;;  %v2215_v5 = vld [vmem:[%s2937_s30 + $0x70] sm:$0xf]  ;;  %v2400_v6 = vld [vmem:[%s2937_s30 + $0x74] sm:$0xf0] }
  0x9c   : > { %953 = vmatmul.bf16.gmra.mxu1 %v2172_v7  ;;  %993 = vmatmul.bf16.gmra.mxu3 %v2236_v8  ;;  %v2279_v7 = vld [vmem:[%s2937_s30 + $0xf0] sm:$0xf]  ;;  %v2416_v8 = vld [vmem:[%s2937_s30 + $0xf4] sm:$0xf0]  ;;  %v2216_v13 = vor.u32 %v2400_v6, %v2215_v5 }
  0x9d   : > { %v2280_v14 = vor.u32 %v2416_v8, %v2279_v7 }
  0xab   : > { %869 = vmatmul.bf16.gmra.mxu0 %v2176_v17  ;;  %909 = vmatmul.bf16.gmra.mxu2 %v2240_v18  ;;  %v499_v18 = vld [vmem:[#allocation2 + $0xb0] sm:$0xff] }
  0xac   : > { %958 = vmatmul.bf16.gmra.mxu1 %v2180_v19  ;;  %998 = vmatmul.bf16.gmra.mxu3 %v2244_v20 }
  0xbb   : > { %874 = vmatmul.bf16.gmra.mxu0 %v2184_v29  ;;  %914 = vmatmul.bf16.gmra.mxu2 %v2248_v30 }
  0xbc   : > { %963 = vmatmul.bf16.gmra.mxu1 %v2188_v31  ;;  %1003 = vmatmul.bf16.gmra.mxu3 %v2252_v32 }
  0xcb   : > { %879 = vmatmul.bf16.gmra.mxu0 %v2192_v41  ;;  %919 = vmatmul.bf16.gmra.mxu2 %v2256_v42 }
  0xcc   : > { %968 = vmatmul.bf16.gmra.mxu1 %v2196_v43  ;;  %1008 = vmatmul.bf16.gmra.mxu3 %v2260_v44  ;;  %v517_v43 = vld [vmem:[#allocation2 + $0x40] sm:$0xff] }
  0xdb   : > { %884 = vmatmul.bf16.gmra.mxu0 %v2200_v53  ;;  %924 = vmatmul.bf16.gmra.mxu2 %v2264_v54  ;;  %v518_v53 = vld [vmem:[#allocation2 + $0xc8] sm:$0xff] }
  0xdc   : > { %973 = vmatmul.bf16.gmra.mxu1 %v2204_v55  ;;  %1013 = vmatmul.bf16.gmra.mxu3 %v2268_v56 }
  0xeb   : > { %889 = vmatmul.bf16.gmra.mxu0 %v2208_v1  ;;  %929 = vmatmul.bf16.gmra.mxu2 %v2272_v2 }
  0xec   : > { %978 = vmatmul.bf16.gmra.mxu1 %v2212_v3  ;;  %1018 = vmatmul.bf16.gmra.mxu3 %v2276_v4  ;;  %v504_v3 = vld [vmem:[#allocation2 + $0x68] sm:$0xff] }
  0xfb   : > { %894 = vmatmul.bf16.gmra.mxu0 %v2216_v13  ;;  %934 = vmatmul.bf16.gmra.mxu2 %v2280_v14  ;;  %v505_v13 = vld [vmem:[#allocation2 + $0x30] sm:$0xff] }
  0xfc   : > { %983 = vmatmul.bf16.gmra.mxu1 %v2220_v15  ;;  %1023 = vmatmul.bf16.gmra.mxu3 %v2284_v16 }
 0x108   : > { %v860_v17 = vpop.f32.mrf.mxu0 }
 0x109   : > { %v949_v19 = vpop.f32.mrf.mxu1 }
 0x10a   : > { %v950_v20 = vadd.f32 %v949_v19, %v860_v17  ;;  %v521_v19 = vld [vmem:[#allocation2 + $0x70] sm:$0xff] }
 0x10c   : > { %v1029_v21 = vadd.f32 %v950_v20, %v499_v18 }
 0x10e   : > { %1061 = vst [vmem:[#allocation2 + $0xb0] sm:$0xff] %v1029_v21  ;;  %v900_v22 = vpop.f32.mrf.mxu2 }
 0x10f   : > { %v989_v24 = vpop.f32.mrf.mxu3 }
 0x110   : > { %v990_v25 = vadd.f32 %v989_v24, %v900_v22  ;;  %v862_v26 = vpop.f32.mrf.mxu0 }
 0x111   : > { %v951_v28 = vpop.f32.mrf.mxu1 }
 0x112   : > { %v1045_v29 = vadd.f32 %v990_v25, %v515_v23  ;;  %v952_v30 = vadd.f32 %v951_v28, %v862_v26  ;;  %v506_v23 = vld [vmem:[#allocation2 + $0x48] sm:$0xff] }
 0x114   : > { %1077 = vst [vmem:[#allocation2 + $0x38] sm:$0xff] %v1045_v29  ;;  %v1030_v31 = vadd.f32 %v952_v30, %v500_v27  ;;  %v522_v29 = vld [vmem:[#allocation2 + $0xc0] sm:$0xff] }
 0x116   : > { %1062 = vst [vmem:[#allocation2] sm:$0xff] %v1030_v31  ;;  %v902_v32 = vpop.f32.mrf.mxu2 }
 0x117   : > { %v991_v34 = vpop.f32.mrf.mxu3 }
 0x118   : > { %v992_v35 = vadd.f32 %v991_v34, %v902_v32  ;;  %v865_v36 = vpop.f32.mrf.mxu0 }
 0x119   : > { %v954_v38 = vpop.f32.mrf.mxu1 }
 0x11a   : > { %v1046_v39 = vadd.f32 %v992_v35, %v516_v33  ;;  %v955_v40 = vadd.f32 %v954_v38, %v865_v36  ;;  %v507_v33 = vld [vmem:[#allocation2 + $0x80] sm:$0xff] }
 0x11c   : > { %1078 = vst [vmem:[#allocation2 + $0x58] sm:$0xff] %v1046_v39  ;;  %v1031_v41 = vadd.f32 %v955_v40, %v501_v37  ;;  %v523_v39 = vld [vmem:[#allocation2 + $0xa8] sm:$0xff] }
 0x11e   : > { %1063 = vst [vmem:[#allocation2 + $0xd8] sm:$0xff] %v1031_v41  ;;  %v905_v42 = vpop.f32.mrf.mxu2 }
 0x11f   : > { %v994_v44 = vpop.f32.mrf.mxu3 }
 0x120   : > { %v995_v45 = vadd.f32 %v994_v44, %v905_v42  ;;  %v867_v46 = vpop.f32.mrf.mxu0 }
 0x121   : > { %v956_v48 = vpop.f32.mrf.mxu1 }
 0x122   : > { %v1047_v49 = vadd.f32 %v995_v45, %v517_v43  ;;  %v957_v50 = vadd.f32 %v956_v48, %v867_v46  ;;  %v508_v43 = vld [vmem:[#allocation2 + $0x88] sm:$0xff] }
 0x124   : > { %1079 = vst [vmem:[#allocation2 + $0x40] sm:$0xff] %v1047_v49  ;;  %v1032_v51 = vadd.f32 %v957_v50, %v502_v47  ;;  %v524_v49 = vld [vmem:[#allocation2 + $0xd0] sm:$0xff] }
 0x126   : > { %1064 = vst [vmem:[#allocation2 + $0x18] sm:$0xff] %v1032_v51  ;;  %v907_v52 = vpop.f32.mrf.mxu2 }
 0x127   : > { %v996_v54 = vpop.f32.mrf.mxu3 }
 0x128   : > { %v997_v55 = vadd.f32 %v996_v54, %v907_v52  ;;  %v870_v56 = vpop.f32.mrf.mxu0 }
 0x129   : > { %v959_v58 = vpop.f32.mrf.mxu1 }
 0x12a   : > { %v1048_v59 = vadd.f32 %v997_v55, %v518_v53  ;;  %v960_v60 = vadd.f32 %v959_v58, %v870_v56  ;;  %v509_v53 = vld [vmem:[#allocation2 + $0xe8] sm:$0xff] }
 0x12c   : > { %1080 = vst [vmem:[#allocation2 + $0xc8] sm:$0xff] %v1048_v59  ;;  %v1033_v61 = vadd.f32 %v960_v60, %v503_v57  ;;  %v525_v59 = vld [vmem:[#allocation2 + $0x10] sm:$0xff] }
 0x12e   : > { %1065 = vst [vmem:[#allocation2 + $0x50] sm:$0xff] %v1033_v61  ;;  %v910_v62 = vpop.f32.mrf.mxu2 }
 0x12f   : > { %v999_v0 = vpop.f32.mrf.mxu3 }
 0x130   : > { %v1000_v1 = vadd.f32 %v999_v0, %v910_v62  ;;  %v872_v2 = vpop.f32.mrf.mxu0 }
 0x131   : > { %v961_v4 = vpop.f32.mrf.mxu1 }
 0x132   : > { %v1049_v5 = vadd.f32 %v1000_v1, %v519_v63  ;;  %v962_v6 = vadd.f32 %v961_v4, %v872_v2  ;;  %v510_v63 = vld [vmem:[#allocation2 + $0xb8] sm:$0xff] }
 0x134   : > { %1081 = vst [vmem:[#allocation2 + $0xe0] sm:$0xff] %v1049_v5  ;;  %v1034_v7 = vadd.f32 %v962_v6, %v504_v3  ;;  %v526_v5 = vld [vmem:[#allocation2 + $0x28] sm:$0xff] }
 0x136   : > { %1066 = vst [vmem:[#allocation2 + $0x68] sm:$0xff] %v1034_v7  ;;  %v912_v8 = vpop.f32.mrf.mxu2 }
 0x137   : > { %v1001_v10 = vpop.f32.mrf.mxu3 }
 0x138   : > { %v1002_v11 = vadd.f32 %v1001_v10, %v912_v8  ;;  %v875_v12 = vpop.f32.mrf.mxu0 }
 0x139   : > { %v964_v14 = vpop.f32.mrf.mxu1 }
 0x13a   : > { %v1050_v15 = vadd.f32 %v1002_v11, %v520_v9  ;;  %v965_v16 = vadd.f32 %v964_v14, %v875_v12  ;;  %v511_v9 = vld [vmem:[#allocation2 + $0x60] sm:$0xff] }
 0x13c   : > { %1082 = vst [vmem:[#allocation2 + $0x90] sm:$0xff] %v1050_v15  ;;  %v1035_v17 = vadd.f32 %v965_v16, %v505_v13  ;;  %v527_v15 = vld [vmem:[#allocation2 + $0xa0] sm:$0xff] }
 0x13e   : > { %1067 = vst [vmem:[#allocation2 + $0x30] sm:$0xff] %v1035_v17  ;;  %v915_v18 = vpop.f32.mrf.mxu2 }
 0x13f   : > { %v1004_v20 = vpop.f32.mrf.mxu3 }
 0x140   : > { %v1005_v21 = vadd.f32 %v1004_v20, %v915_v18  ;;  %v877_v22 = vpop.f32.mrf.mxu0 }
 0x141   : > { %v966_v24 = vpop.f32.mrf.mxu1 }
 0x142   : > { %v1051_v25 = vadd.f32 %v1005_v21, %v521_v19  ;;  %v967_v26 = vadd.f32 %v966_v24, %v877_v22  ;;  %v512_v19 = vld [vmem:[#allocation2 + $0xf0] sm:$0xff] }
 0x144   : > { %1083 = vst [vmem:[#allocation2 + $0x70] sm:$0xff] %v1051_v25  ;;  %v1036_v27 = vadd.f32 %v967_v26, %v506_v23  ;;  %v528_v25 = vld [vmem:[#allocation2 + $0xf8] sm:$0xff] }
 0x146   : > { %1068 = vst [vmem:[#allocation2 + $0x48] sm:$0xff] %v1036_v27  ;;  %v917_v28 = vpop.f32.mrf.mxu2 }
 0x147   : > { %v1006_v30 = vpop.f32.mrf.mxu3 }
 0x148   : > { %v1007_v31 = vadd.f32 %v1006_v30, %v917_v28  ;;  %v880_v32 = vpop.f32.mrf.mxu0 }
 0x149   : > { %v969_v34 = vpop.f32.mrf.mxu1 }
 0x14a   : > { %v1052_v35 = vadd.f32 %v1007_v31, %v522_v29  ;;  %v970_v36 = vadd.f32 %v969_v34, %v880_v32  ;;  %v513_v29 = vld [vmem:[#allocation2 + $0x8] sm:$0xff] }
 0x14c   : > { %1084 = vst [vmem:[#allocation2 + $0xc0] sm:$0xff] %v1052_v35  ;;  %v1037_v37 = vadd.f32 %v970_v36, %v507_v33  ;;  %v529_v35 = vld [vmem:[#allocation2 + $0x20] sm:$0xff] }
 0x14e   : > { %1069 = vst [vmem:[#allocation2 + $0x80] sm:$0xff] %v1037_v37  ;;  %v920_v38 = vpop.f32.mrf.mxu2 }
 0x14f   : > { %v1009_v40 = vpop.f32.mrf.mxu3 }
 0x150   : > { %v1010_v41 = vadd.f32 %v1009_v40, %v920_v38  ;;  %v882_v42 = vpop.f32.mrf.mxu0 }
 0x151   : > { %v971_v44 = vpop.f32.mrf.mxu1 }
 0x152   : > { %v1053_v45 = vadd.f32 %v1010_v41, %v523_v39  ;;  %v972_v46 = vadd.f32 %v971_v44, %v882_v42  ;;  %v514_v39 = vld [vmem:[#allocation2 + $0x78] sm:$0xff] }
 0x154   : > { %1085 = vst [vmem:[#allocation2 + $0xa8] sm:$0xff] %v1053_v45  ;;  %v1038_v47 = vadd.f32 %v972_v46, %v508_v43  ;;  %v530_v45 = vld [vmem:[#allocation2 + $0x98] sm:$0xff] }
 0x156   : > { %1070 = vst [vmem:[#allocation2 + $0x88] sm:$0xff] %v1038_v47  ;;  %v922_v48 = vpop.f32.mrf.mxu2 }
 0x157   : > { %v1011_v50 = vpop.f32.mrf.mxu3 }
 0x158   : > { %v1012_v51 = vadd.f32 %v1011_v50, %v922_v48  ;;  %v885_v52 = vpop.f32.mrf.mxu0 }
 0x159   : > { %v974_v54 = vpop.f32.mrf.mxu1 }
 0x15a   : > { %v1054_v55 = vadd.f32 %v1012_v51, %v524_v49  ;;  %v975_v56 = vadd.f32 %v974_v54, %v885_v52 }
 0x15c   : > { %1086 = vst [vmem:[#allocation2 + $0xd0] sm:$0xff] %v1054_v55  ;;  %v1039_v57 = vadd.f32 %v975_v56, %v509_v53 }
 0x15e   : > { %1071 = vst [vmem:[#allocation2 + $0xe8] sm:$0xff] %v1039_v57  ;;  %v925_v58 = vpop.f32.mrf.mxu2 }
 0x15f   : > { %v1014_v60 = vpop.f32.mrf.mxu3 }
 0x160   : > { %v1015_v61 = vadd.f32 %v1014_v60, %v925_v58  ;;  %v887_v62 = vpop.f32.mrf.mxu0 }
 0x161   : > { %v976_v0 = vpop.f32.mrf.mxu1 }
 0x162   : > { %v1055_v1 = vadd.f32 %v1015_v61, %v525_v59  ;;  %v977_v2 = vadd.f32 %v976_v0, %v887_v62 }
 0x164   : > { %1087 = vst [vmem:[#allocation2 + $0x10] sm:$0xff] %v1055_v1  ;;  %v1040_v3 = vadd.f32 %v977_v2, %v510_v63 }
 0x166   : > { %1072 = vst [vmem:[#allocation2 + $0xb8] sm:$0xff] %v1040_v3  ;;  %v927_v4 = vpop.f32.mrf.mxu2 }
 0x167   : > { %v1016_v6 = vpop.f32.mrf.mxu3 }
 0x168   : > { %v1017_v7 = vadd.f32 %v1016_v6, %v927_v4  ;;  %v890_v8 = vpop.f32.mrf.mxu0 }
 0x169   : > { %v979_v10 = vpop.f32.mrf.mxu1 }
 0x16a   : > { %v1056_v11 = vadd.f32 %v1017_v7, %v526_v5  ;;  %v980_v12 = vadd.f32 %v979_v10, %v890_v8 }
 0x16c   : > { %1088 = vst [vmem:[#allocation2 + $0x28] sm:$0xff] %v1056_v11  ;;  %v1041_v13 = vadd.f32 %v980_v12, %v511_v9 }
 0x16e   : > { %1073 = vst [vmem:[#allocation2 + $0x60] sm:$0xff] %v1041_v13  ;;  %v930_v14 = vpop.f32.mrf.mxu2 }
 0x16f   : > { %v1019_v16 = vpop.f32.mrf.mxu3 }
 0x170   : > { %v1020_v17 = vadd.f32 %v1019_v16, %v930_v14  ;;  %v892_v18 = vpop.f32.mrf.mxu0 }
 0x171   : > { %v981_v20 = vpop.f32.mrf.mxu1 }
 0x172   : > { %v1057_v21 = vadd.f32 %v1020_v17, %v527_v15  ;;  %v982_v22 = vadd.f32 %v981_v20, %v892_v18 }
 0x174   : > { %1089 = vst [vmem:[#allocation2 + $0xa0] sm:$0xff] %v1057_v21  ;;  %v1042_v23 = vadd.f32 %v982_v22, %v512_v19 }
 0x176   : > { %1074 = vst [vmem:[#allocation2 + $0xf0] sm:$0xff] %v1042_v23  ;;  %v932_v24 = vpop.f32.mrf.mxu2 }
 0x177   : > { %v1021_v26 = vpop.f32.mrf.mxu3 }
 0x178   : > { %v1022_v27 = vadd.f32 %v1021_v26, %v932_v24  ;;  %v895_v28 = vpop.f32.mrf.mxu0 }
 0x179   : > { %v984_v30 = vpop.f32.mrf.mxu1 }
 0x17a   : > { %v1058_v31 = vadd.f32 %v1022_v27, %v528_v25  ;;  %v985_v32 = vadd.f32 %v984_v30, %v895_v28 }
 0x17c   : > { %1090 = vst [vmem:[#allocation2 + $0xf8] sm:$0xff] %v1058_v31  ;;  %v1043_v33 = vadd.f32 %v985_v32, %v513_v29 }
 0x17e   : > { %1075 = vst [vmem:[#allocation2 + $0x8] sm:$0xff] %v1043_v33  ;;  %v935_v34 = vpop.f32.mrf.mxu2 }
 0x17f   : > { %v1024_v36 = vpop.f32.mrf.mxu3 }
 0x180   : > { %v1025_v37 = vadd.f32 %v1024_v36, %v935_v34  ;;  %v897_v38 = vpop.f32.mrf.mxu0 }
 0x181   : > { %v986_v40 = vpop.f32.mrf.mxu1 }
 0x182   : > { %v1059_v41 = vadd.f32 %v1025_v37, %v529_v35  ;;  %v987_v42 = vadd.f32 %v986_v40, %v897_v38 }
 0x184   : > { %1091 = vst [vmem:[#allocation2 + $0x20] sm:$0xff] %v1059_v41  ;;  %v1044_v43 = vadd.f32 %v987_v42, %v514_v39 }
 0x186   : > { %1076 = vst [vmem:[#allocation2 + $0x78] sm:$0xff] %v1044_v43  ;;  %v937_v44 = vpop.f32.mrf.mxu2 }
 0x187   : > { %v1026_v46 = vpop.f32.mrf.mxu3 }
 0x188   : > { %v1027_v47 = vadd.f32 %v1026_v46, %v937_v44  ;;  %1096 = sbr.rel (%p2349_p13) target bundleno = 804 (0x324), region = 82 }
 0x18a   : > { %v1060_v48 = vadd.f32 %v1027_v47, %v530_v45 }
 0x18c   : > { %1092 = vst [vmem:[#allocation2 + $0x98] sm:$0xff] %v1060_v48 }
 0x18d   : > { %v2440_v49 = vld [vmem:[%s3759_s2 + $0x38] sm:$0xff]  ;;  %v2439_v50 = vld [vmem:[%s3759_s2 + $0x30] sm:$0xff]  ;;  %v2438_v51 = vld [vmem:[%s3759_s2 + $0x28] sm:$0xff] }
 0x18e   : > { %1209 = vmatpush.bf16.msra.mxu0 %v2440_v49  ;;  %2552 = vmatpush.bf16.msra.mxu1 %v2440_v49  ;;  %v2437_v52 = vld [vmem:[%s3759_s2 + $0x20] sm:$0xff]  ;;  %v2436_v53 = vld [vmem:[%s3759_s2 + $0x18] sm:$0xff]  ;;  %v2435_v54 = vld [vmem:[%s3759_s2 + $0x10] sm:$0xff] }
 0x18f   : > { %2553 = vmatpush.bf16.msra.mxu2 %v2440_v49  ;;  %2554 = vmatpush.bf16.msra.mxu3 %v2440_v49  ;;  %v2434_v55 = vld [vmem:[%s3759_s2 + $0x8] sm:$0xff]  ;;  %v2433_v56 = vld [vmem:[%s3759_s2] sm:$0xff]  ;;  %v1097_v57 = vld [vmem:[#allocation2 + $0xb0] sm:$0xff] }
 0x190   : > { %v1098_v58 = vld [vmem:[#allocation2] sm:$0xff]  ;;  %v1106_v60 = vld [vmem:[#allocation2 + $0x88] sm:$0xff]  ;;  %v1113_v61 = vld [vmem:[#allocation2 + $0x38] sm:$0xff] }
 0x191   : > { %v1105_v59 = vld [vmem:[#allocation2 + $0x80] sm:$0xff]  ;;  %v1114_v62 = vld [vmem:[#allocation2 + $0x58] sm:$0xff]  ;;  %v1121_v63 = vld [vmem:[#allocation2 + $0xa8] sm:$0xff]  ;;  %v1129_v1 = vpack.c.bf16 %v1098_v58, %v1097_v57 }
 0x192   : > { %1210 = vmatpush.bf16.msra.mxu0 %v2439_v50  ;;  %2555 = vmatpush.bf16.msra.mxu1 %v2439_v50  ;;  %v1122_v0 = vld [vmem:[#allocation2 + $0xd0] sm:$0xff]  ;;  %v1133_v2 = vpack.c.bf16 %v1106_v60, %v1105_v59  ;;  %v1137_v3 = vpack.c.bf16 %v1114_v62, %v1113_v61  ;;  %v1099_v5 = vld [vmem:[#allocation2 + $0xd8] sm:$0xff]  ;;  %v1107_v8 = vld [vmem:[#allocation2 + $0xe8] sm:$0xff] }
 0x193   : > { %2556 = vmatpush.bf16.msra.mxu2 %v2439_v50  ;;  %2557 = vmatpush.bf16.msra.mxu3 %v2439_v50  ;;  %v1141_v4 = vpack.c.bf16 %v1122_v0, %v1121_v63  ;;  %v1100_v6 = vld [vmem:[#allocation2 + $0x18] sm:$0xff]  ;;  %v1123_v7 = vld [vmem:[#allocation2 + $0x10] sm:$0xff]  ;;  %v1124_v10 = vld [vmem:[#allocation2 + $0x28] sm:$0xff] }
 0x194   : > { %v1108_v9 = vld [vmem:[#allocation2 + $0xb8] sm:$0xff]  ;;  %v1115_v11 = vld [vmem:[#allocation2 + $0x40] sm:$0xff]  ;;  %v1116_v12 = vld [vmem:[#allocation2 + $0xc8] sm:$0xff]  ;;  %v1130_v13 = vpack.c.bf16 %v1100_v6, %v1099_v5  ;;  %v1142_v15 = vpack.c.bf16 %v1124_v10, %v1123_v7 }
 0x195   : > { %v1134_v14 = vpack.c.bf16 %v1108_v9, %v1107_v8  ;;  %v1138_v16 = vpack.c.bf16 %v1116_v12, %v1115_v11  ;;  %v1101_v17 = vld [vmem:[#allocation2 + $0x50] sm:$0xff]  ;;  %v1102_v18 = vld [vmem:[#allocation2 + $0x68] sm:$0xff]  ;;  %v1117_v19 = vld [vmem:[#allocation2 + $0xe0] sm:$0xff] }
 0x196   : > { %1211 = vmatpush.bf16.msra.mxu0 %v2438_v51  ;;  %2558 = vmatpush.bf16.msra.mxu1 %v2438_v51  ;;  %v1109_v20 = vld [vmem:[#allocation2 + $0x60] sm:$0xff]  ;;  %v1110_v21 = vld [vmem:[#allocation2 + $0xf0] sm:$0xff]  ;;  %v1126_v24 = vld [vmem:[#allocation2 + $0xf8] sm:$0xff]  ;;  %v1131_v25 = vpack.c.bf16 %v1102_v18, %v1101_v17 }
 0x197   : > { %2559 = vmatpush.bf16.msra.mxu2 %v2438_v51  ;;  %2560 = vmatpush.bf16.msra.mxu3 %v2438_v51  ;;  %v1118_v22 = vld [vmem:[#allocation2 + $0x90] sm:$0xff]  ;;  %v1125_v23 = vld [vmem:[#allocation2 + $0xa0] sm:$0xff]  ;;  %v1135_v26 = vpack.c.bf16 %v1110_v21, %v1109_v20  ;;  %v1104_v31 = vld [vmem:[#allocation2 + $0x48] sm:$0xff] }
 0x198   : > { %v1139_v27 = vpack.c.bf16 %v1118_v22, %v1117_v19  ;;  %v1143_v28 = vpack.c.bf16 %v1126_v24, %v1125_v23  ;;  %v1119_v29 = vld [vmem:[#allocation2 + $0x70] sm:$0xff]  ;;  %v1111_v32 = vld [vmem:[#allocation2 + $0x8] sm:$0xff]  ;;  %v1112_v33 = vld [vmem:[#allocation2 + $0x78] sm:$0xff] }
 0x199   : > { %v1103_v30 = vld [vmem:[#allocation2 + $0x30] sm:$0xff]  ;;  %v1120_v34 = vld [vmem:[#allocation2 + $0xc0] sm:$0xff]  ;;  %v1128_v36 = vld [vmem:[#allocation2 + $0x98] sm:$0xff]  ;;  %v1136_v38 = vpack.c.bf16 %v1112_v33, %v1111_v32 }
 0x19a   : > { %1212 = vmatpush.bf16.msra.mxu0 %v2437_v52  ;;  %2561 = vmatpush.bf16.msra.mxu1 %v2437_v52  ;;  %v1127_v35 = vld [vmem:[#allocation2 + $0x20] sm:$0xff]  ;;  %v1132_v37 = vpack.c.bf16 %v1104_v31, %v1103_v30  ;;  %v1140_v39 = vpack.c.bf16 %v1120_v34, %v1119_v29 }
 0x19b   : > { %2562 = vmatpush.bf16.msra.mxu2 %v2437_v52  ;;  %2563 = vmatpush.bf16.msra.mxu3 %v2437_v52  ;;  %v1144_v40 = vpack.c.bf16 %v1128_v36, %v1127_v35 }
 0x19e   : > { %1213 = vmatpush.bf16.msra.mxu0 %v2436_v53  ;;  %2564 = vmatpush.bf16.msra.mxu1 %v2436_v53 }
 0x19f   : > { %2565 = vmatpush.bf16.msra.mxu2 %v2436_v53  ;;  %2566 = vmatpush.bf16.msra.mxu3 %v2436_v53 }
 0x1a2   : > { %1214 = vmatpush.bf16.msra.mxu0 %v2435_v54  ;;  %2567 = vmatpush.bf16.msra.mxu1 %v2435_v54 }
 0x1a3   : > { %2568 = vmatpush.bf16.msra.mxu2 %v2435_v54  ;;  %2569 = vmatpush.bf16.msra.mxu3 %v2435_v54 }
 0x1a6   : > { %1215 = vmatpush.bf16.msra.mxu0 %v2434_v55  ;;  %2570 = vmatpush.bf16.msra.mxu1 %v2434_v55 }
 0x1a7   : > { %2571 = vmatpush.bf16.msra.mxu2 %v2434_v55  ;;  %2572 = vmatpush.bf16.msra.mxu3 %v2434_v55 }
 0x1aa   : > { %1216 = vmatpush.bf16.msra.mxu0 %v2433_v56  ;;  %2573 = vmatpush.bf16.msra.mxu1 %v2433_v56 }
 0x1ab   : > { %2574 = vmatpush.bf16.msra.mxu2 %v2433_v56  ;;  %2575 = vmatpush.bf16.msra.mxu3 %v2433_v56 }
 0x1ad   : > { %1217 = vmatmul.bf16.vlgmr.msra.gmra.mxu0 %v1129_v1  ;;  %1237 = vmatmul.bf16.vlgmr.msra.gmra.mxu1 %v1133_v2 }
 0x1ae   : > { %1257 = vmatmul.bf16.vlgmr.msra.gmra.mxu2 %v1137_v3  ;;  %1277 = vmatmul.bf16.vlgmr.msra.gmra.mxu3 %v1141_v4 }
 0x1bd   : > { %1222 = vmatmul.bf16.gmra.mxu0 %v1130_v13  ;;  %1242 = vmatmul.bf16.gmra.mxu1 %v1134_v14 }
 0x1be   : > { %1282 = vmatmul.bf16.gmra.mxu3 %v1142_v15  ;;  %1262 = vmatmul.bf16.gmra.mxu2 %v1138_v16 }
 0x1cd   : > { %1227 = vmatmul.bf16.gmra.mxu0 %v1131_v25  ;;  %1247 = vmatmul.bf16.gmra.mxu1 %v1135_v26 }
 0x1ce   : > { %1267 = vmatmul.bf16.gmra.mxu2 %v1139_v27  ;;  %1287 = vmatmul.bf16.gmra.mxu3 %v1143_v28 }
 0x1dd   : > { %1232 = vmatmul.bf16.gmra.mxu0 %v1132_v37  ;;  %1252 = vmatmul.bf16.gmra.mxu1 %v1136_v38 }
 0x1de   : > { %1272 = vmatmul.bf16.gmra.mxu2 %v1140_v39  ;;  %1292 = vmatmul.bf16.gmra.mxu3 %v1144_v40 }
 0x22a   : > { %v3045_v41 = vpop.f32.mrf.mxu0  ;;  %v3047_v42 = vpop.f32.mrf.mxu1 }
 0x22b   : > { %v1306_v43 = vmul.f32 %v3047_v42, %v3047_v42  ;;  %v1298_v44 = vmul.f32 %v3045_v41, %v3045_v41 }
 0x22d   : > { %1346 = vadd.xlane.f32.xlu2 %v1306_v43  ;;  %1330 = vadd.xlane.f32.xlu0 %v1298_v44 }
 0x231   : > { %v3053_v45 = vpop.f32.mrf.mxu2  ;;  %v3055_v46 = vpop.f32.mrf.mxu3 }
 0x232   : > { %v3057_v47 = vpop.f32.mrf.mxu0  ;;  %v1314_v48 = vmul.f32 %v3053_v45, %v3053_v45  ;;  %v3061_v49 = vpop.f32.mrf.mxu1  ;;  %v1322_v51 = vmul.f32 %v3055_v46, %v3055_v46 }
 0x233   : > { %v2444_v50 = vpack.c.bf16 %v3057_v47, %v3045_v41  ;;  %v2464_v52 = vpack.c.bf16 %v3061_v49, %v3047_v42  ;;  %v1299_v61 = vmul.f32 %v3057_v47, %v3057_v47  ;;  %v1307_v5 = vmul.f32 %v3061_v49, %v3061_v49 }
 0x234   : > { %1362 = vadd.xlane.f32.xlu1 %v1314_v48 }
 0x235   : > { %2445 = vst [vmem:[%s2930_s21] sm:$0xff] %v2444_v50   ;;  %1378 = vadd.xlane.f32.xlu0 %v1322_v51 }
 0x236   : > { %2524 = vst [vmem:[%s2930_s21 + $0x20] sm:$0xff] %v2464_v52  }
 0x239   : > { %v3071_v53 = vpop.f32.mrf.mxu2  ;;  %v3073_v54 = vpop.f32.mrf.mxu3 }
 0x23a   : > { %v2484_v55 = vpack.c.bf16 %v3071_v53, %v3053_v45  ;;  %v2504_v56 = vpack.c.bf16 %v3073_v54, %v3055_v46  ;;  %v3079_v57 = vpop.f32.mrf.mxu0  ;;  %v1323_v58 = vmul.f32 %v3073_v54, %v3073_v54  ;;  %v1315_v59 = vmul.f32 %v3071_v53, %v3071_v53  ;;  %v3085_v60 = vpop.f32.mrf.mxu1 }
 0x23b   : > { %v1300_v62 = vmul.f32 %v3079_v57, %v3079_v57  ;;  %v1308_v8 = vmul.f32 %v3085_v60, %v3085_v60 }
 0x23c   : > { %2528 = vst [vmem:[%s2930_s21 + $0x40] sm:$0xff] %v2484_v55   ;;  %1380 = vadd.xlane.f32.xlu1 %v1323_v58  ;;  %1364 = vadd.xlane.f32.xlu2 %v1315_v59 }
 0x23d   : > { %2532 = vst [vmem:[%s2930_s21 + $0x60] sm:$0xff] %v2504_v56   ;;  %1332 = vadd.xlane.f32.xlu0 %v1299_v61 }
 0x241   : > { %v3093_v63 = vpop.f32.mrf.mxu3  ;;  %v3095_v0 = vpop.f32.mrf.mxu2 }
 0x242   : > { %v3097_v1 = vpop.f32.mrf.mxu0  ;;  %v1324_v2 = vmul.f32 %v3093_v63, %v3093_v63  ;;  %v3101_v3 = vpop.f32.mrf.mxu1  ;;  %v1316_v10 = vmul.f32 %v3095_v0, %v3095_v0 }
 0x243   : > { %v2449_v4 = vpack.c.bf16 %v3097_v1, %v3079_v57  ;;  %v2469_v6 = vpack.c.bf16 %v3101_v3, %v3085_v60  ;;  %v1309_v7 = vmul.f32 %v3101_v3, %v3101_v3  ;;  %v1301_v19 = vmul.f32 %v3097_v1, %v3097_v1 }
 0x244   : > { %1382 = vadd.xlane.f32.xlu2 %v1324_v2  ;;  %1334 = vadd.xlane.f32.xlu1 %v1300_v62 }
 0x245   : > { %2521 = vst [vmem:[%s2930_s21 + $0x8] sm:$0xff] %v2449_v4   ;;  %1348 = vadd.xlane.f32.xlu0 %v1307_v5 }
 0x246   : > { %2525 = vst [vmem:[%s2930_s21 + $0x28] sm:$0xff] %v2469_v6  }
 0x249   : > { %v3115_v9 = vpop.f32.mrf.mxu3  ;;  %v3119_v11 = vpop.f32.mrf.mxu2 }
 0x24a   : > { %v2509_v12 = vpack.c.bf16 %v3115_v9, %v3093_v63  ;;  %v3123_v13 = vpop.f32.mrf.mxu0  ;;  %v2489_v14 = vpack.c.bf16 %v3119_v11, %v3095_v0  ;;  %v3127_v15 = vpop.f32.mrf.mxu1  ;;  %v1325_v22 = vmul.f32 %v3115_v9, %v3115_v9  ;;  %v1317_v29 = vmul.f32 %v3119_v11, %v3119_v11 }
 0x24b   : > { %v1302_v16 = vmul.f32 %v3123_v13, %v3123_v13  ;;  %v1310_v26 = vmul.f32 %v3127_v15, %v3127_v15 }
 0x24c   : > { %2533 = vst [vmem:[%s2930_s21 + $0x68] sm:$0xff] %v2509_v12   ;;  %1352 = vadd.xlane.f32.xlu2 %v1309_v7  ;;  %1350 = vadd.xlane.f32.xlu1 %v1308_v8 }
 0x24d   : > { %1366 = vadd.xlane.f32.xlu0 %v1316_v10  ;;  %2529 = vst [vmem:[%s2930_s21 + $0x48] sm:$0xff] %v2489_v14  }
 0x251   : > { %v3133_v17 = vpop.f32.mrf.mxu2  ;;  %v3135_v18 = vpop.f32.mrf.mxu3 }
 0x252   : > { %v3139_v20 = vpop.f32.mrf.mxu0  ;;  %v3141_v21 = vpop.f32.mrf.mxu1  ;;  %v1318_v25 = vmul.f32 %v3133_v17, %v3133_v17  ;;  %v1326_v34 = vmul.f32 %v3135_v18, %v3135_v18 }
 0x253   : > { %v2454_v23 = vpack.c.bf16 %v3139_v20, %v3123_v13  ;;  %v2474_v24 = vpack.c.bf16 %v3141_v21, %v3127_v15  ;;  %v1303_v37 = vmul.f32 %v3139_v20, %v3139_v20  ;;  %v1311_v55 = vmul.f32 %v3141_v21, %v3141_v21 }
 0x254   : > { %1336 = vadd.xlane.f32.xlu1 %v1301_v19  ;;  %1338 = vadd.xlane.f32.xlu2 %v1302_v16 }
 0x255   : > { %1384 = vadd.xlane.f32.xlu0 %v1325_v22  ;;  %2522 = vst [vmem:[%s2930_s21 + $0x10] sm:$0xff] %v2454_v23  }
 0x256   : > { %2526 = vst [vmem:[%s2930_s21 + $0x30] sm:$0xff] %v2474_v24  }
 0x259   : > { %v3155_v27 = vpop.f32.mrf.mxu2  ;;  %v3157_v28 = vpop.f32.mrf.mxu3 }
 0x25a   : > { %v2494_v30 = vpack.c.bf16 %v3155_v27, %v3133_v17  ;;  %v2514_v31 = vpack.c.bf16 %v3157_v28, %v3135_v18  ;;  %v3165_v32 = vpop.f32.mrf.mxu0  ;;  %v3167_v33 = vpop.f32.mrf.mxu1  ;;  %v1319_v40 = vmul.f32 %v3155_v27, %v3155_v27  ;;  %v1327_v2 = vmul.f32 %v3157_v28, %v3157_v28 }
 0x25b   : > { %v1312_v48 = vmul.f32 %v3167_v33, %v3167_v33  ;;  %v1304_v50 = vmul.f32 %v3165_v32, %v3165_v32 }
 0x25c   : > { %1368 = vadd.xlane.f32.xlu1 %v1317_v29  ;;  %1370 = vadd.xlane.f32.xlu2 %v1318_v25  ;;  %2530 = vst [vmem:[%s2930_s21 + $0x50] sm:$0xff] %v2494_v30  }
 0x25d   : > { %1354 = vadd.xlane.f32.xlu0 %v1310_v26  ;;  %2534 = vst [vmem:[%s2930_s21 + $0x70] sm:$0xff] %v2514_v31  }
 0x261   : > { %v3173_v35 = vpop.f32.mrf.mxu2  ;;  %v3175_v36 = vpop.f32.mrf.mxu3 }
 0x262   : > { %v3179_v38 = vpop.f32.mrf.mxu0  ;;  %v3181_v39 = vpop.f32.mrf.mxu1  ;;  %v1320_v59 = vmul.f32 %v3173_v35, %v3173_v35  ;;  %v1328_v5 = vmul.f32 %v3175_v36, %v3175_v36 }
 0x263   : > { %v2459_v43 = vpack.c.bf16 %v3179_v38, %v3165_v32  ;;  %v2479_v44 = vpack.c.bf16 %v3181_v39, %v3167_v33  ;;  %v1313_v62 = vmul.f32 %v3181_v39, %v3181_v39  ;;  %v1305_v4 = vmul.f32 %v3179_v38, %v3179_v38 }
 0x264   : > { %1386 = vadd.xlane.f32.xlu1 %v1326_v34  ;;  %1340 = vadd.xlane.f32.xlu2 %v1303_v37 }
 0x265   : > { %1372 = vadd.xlane.f32.xlu0 %v1319_v40  ;;  %2523 = vst [vmem:[%s2930_s21 + $0x18] sm:$0xff] %v2459_v43  }
 0x266   : > { %2527 = vst [vmem:[%s2930_s21 + $0x38] sm:$0xff] %v2479_v44  }
 0x269   : > { %v3195_v51 = vpop.f32.mrf.mxu2  ;;  %v3197_v52 = vpop.f32.mrf.mxu3 }
 0x26a   : > { %v2499_v56 = vpack.c.bf16 %v3195_v51, %v3173_v35  ;;  %v2519_v58 = vpack.c.bf16 %v3197_v52, %v3175_v36  ;;  %v1321_v61 = vmul.f32 %v3195_v51, %v3195_v51  ;;  %v1329_v6 = vmul.f32 %v3197_v52, %v3197_v52 }
 0x26c   : > { %1356 = vadd.xlane.f32.xlu1 %v1311_v55  ;;  %1358 = vadd.xlane.f32.xlu2 %v1312_v48  ;;  %2531 = vst [vmem:[%s2930_s21 + $0x58] sm:$0xff] %v2499_v56  }
 0x26d   : > { %1342 = vadd.xlane.f32.xlu0 %v1304_v50  ;;  %2535 = vst [vmem:[%s2930_s21 + $0x78] sm:$0xff] %v2519_v58   ;;  %v1786_v58 = vld [vmem:[%s2925_s14 + $0x40] sm:$0xff] }
 0x274   : > { %1374 = vadd.xlane.f32.xlu1 %v1320_v59  ;;  %1376 = vadd.xlane.f32.xlu2 %v1321_v61 }
 0x275   : > { %1360 = vadd.xlane.f32.xlu0 %v1313_v62 }
 0x27c   : > { %1388 = vadd.xlane.f32.xlu2 %v1327_v2  ;;  %1344 = vadd.xlane.f32.xlu1 %v1305_v4 }
 0x27d   : > { %1390 = vadd.xlane.f32.xlu0 %v1328_v5  ;;  %v1778_v5 = vld [vmem:[%s2925_s14] sm:$0xff] }
 0x284   : > { %1392 = vadd.xlane.f32.xlu1 %v1329_v6 }
 0x2a0   : > { %v1347_v7 = vpop.xlane.xlu2 %1346  ;;  %v1331_v8 = vpop.xlane.xlu0 %1330 }
 0x2a1   : > { %v1402_v10 = vmax.f32 %v1347_v7, 1e-24  ;;  %v1394_v12 = vmax.f32 %v1331_v8, 1e-24  ;;  %v1794_v8 = vld [vmem:[%s2925_s14 + $0x80] sm:$0xff] }
 0x2a3   : > { %2633 = vrsqrt.f32 %v1402_v10  ;;  %vm1512_vm0 = vweird.f32 %v1402_v10  ;;  %vm1432_vm2 = vweird.f32 %v1394_v12 }
 0x2a4   : > { %2635 = vrsqrt.f32 %v1394_v12 }
 0x2a7   : > { %v1363_v14 = vpop.xlane.xlu1 %1362 }
 0x2a8   : > { %v3221_v16 = vmax.f32 %v1363_v14, 1e-24  ;;  %v1379_v19 = vpop.xlane.xlu0 %1378  ;;  %v1802_v14 = vld [vmem:[%s2925_s14 + $0xc0] sm:$0xff] }
 0x2a9   : > { %v2634_v22 = vpop.eup %2633  ;;  %v3223_v23 = vmax.f32 %v1379_v19, 1e-24  ;;  %v1818_v19 = vmul.f32 0.33333334, %v1786_v58 }
 0x2aa   : > { %v2636_v24 = vpop.eup %2635  ;;  %v1507_v25 = vmul.f32 %v2634_v22, %v1402_v10  ;;  %2637 = vrsqrt.f32 %v3221_v16  ;;  %vm1513_vm1 = vweird.f32 %v2634_v22  ;;  %vm1592_vm8 = vweird.f32 %v3221_v16 }
 0x2ab   : > { %v1427_v26 = vmul.f32 %v2636_v24, %v1394_v12  ;;  %2639 = vrsqrt.f32 %v3223_v23  ;;  %vm3236_vm3 = vmor %vm1512_vm0, %vm1513_vm1  ;;  %vm1433_vm4 = vweird.f32 %v2636_v24  ;;  %vm1672_vm10 = vweird.f32 %v3223_v23 }
 0x2ac   : > { %v1508_v29 = vmul.f32 %v2634_v22, %v1507_v25  ;;  %vm1434_vm5 = vmor %vm1432_vm2, %vm1433_vm4 }
 0x2ad   : > { %v1428_v30 = vmul.f32 %v2636_v24, %v1427_v26 }
 0x2ae   : > { %v1509_v31 = vmul.f32 0.5, %v1508_v29  ;;  %v1803_v29 = vld [vmem:[%s2925_s14 + $0xc8] sm:$0xff] }
 0x2af   : > { %v1429_v34 = vmul.f32 0.5, %v1428_v30  ;;  %v1381_v37 = vpop.xlane.xlu1 %1380  ;;  %v1365_v40 = vpop.xlane.xlu2 %1364  ;;  %v3261_v12 = vmul.f32 0.33333334, %v1803_v29 }
 0x2b0   : > { %v3227_v43 = vpop.eup %2637  ;;  %v1510_v44 = vsub.f32 1.5, %v1509_v31  ;;  %v3229_v48 = vmax.f32 %v1381_v37, 1e-24  ;;  %v3231_v50 = vmax.f32 %v1365_v40, 1e-24  ;;  %v1333_v55 = vpop.xlane.xlu0 %1332 }
 0x2b1   : > { %v3233_v56 = vpop.eup %2639  ;;  %v1430_v61 = vsub.f32 1.5, %v1429_v34  ;;  %v1587_v62 = vmul.f32 %v3227_v43, %v3221_v16  ;;  %v3242_v2 = vmax.f32 %v1333_v55, 1e-24  ;;  %v1810_v31 = vmul.f32 0.33333334, %v1778_v5 }
 0x2b2   : > { %v1511_v4 = vmul.f32 %v2634_v22, %v1510_v44  ;;  %v1667_v6 = vmul.f32 %v3233_v56, %v3223_v23  ;;  %2641 = vrsqrt.f32 %v3229_v48  ;;  %v1826_v44 = vmul.f32 0.33333334, %v1794_v8 }
 0x2b3   : > { %v1431_v7 = vmul.f32 %v2636_v24, %v1430_v61  ;;  %v1588_v10 = vmul.f32 %v3227_v43, %v1587_v62  ;;  %2643 = vrsqrt.f32 %v3231_v50  ;;  %v1834_v55 = vmul.f32 0.33333334, %v1802_v14 }
 0x2b4   : > { %v1515_v25 = vsel %vm3236_vm3, %v2634_v22, %v1511_v4  ;;  %v1668_v26 = vmul.f32 %v3233_v56, %v1667_v6  ;;  %2645 = vrsqrt.f32 %v3242_v2  ;;  %vm1593_vm6 = vweird.f32 %v3227_v43 }
 0x2b5   : > { %v1754_v30 = vmul.f32 %v1515_v25, %v3047_v42  ;;  %v1435_v34 = vsel %vm1434_vm5, %v2636_v24, %v1431_v7  ;;  %v1589_v37 = vmul.f32 0.5, %v1588_v10  ;;  %vm1673_vm7 = vweird.f32 %v3233_v56  ;;  %vm1594_vm9 = vmor %vm1592_vm8, %vm1593_vm6 }
 0x2b6   : > { %v1746_v40 = vmul.f32 %v1435_v34, %v3045_v41  ;;  %v1669_v58 = vmul.f32 0.5, %v1668_v26  ;;  %vm1674_vm11 = vmor %vm1672_vm10, %vm1673_vm7  ;;  %vm1682_vm12 = vweird.f32 %v3229_v48  ;;  %vm1602_vm1 = vweird.f32 %v3231_v50 }
 0x2b7   : > { %v1850_v61 = vmul.f32 0.33333334, %v1754_v30  ;;  %v1590_v59 = vsub.f32 1.5, %v1589_v37  ;;  %v1383_v22 = vpop.xlane.xlu2 %1382  ;;  %v1335_v62 = vpop.xlane.xlu1 %1334  ;;  %vm1442_vm3 = vweird.f32 %v3242_v2 }
 0x2b8   : > { %v3263_v4 = vpop.eup %2641  ;;  %v1842_v42 = vmul.f32 0.33333334, %v1746_v40  ;;  %v1670_v5 = vsub.f32 1.5, %v1669_v58  ;;  %v3266_v24 = vmax.f32 %v1383_v22, 1e-24 }
 0x2b9   : > { %v3268_v41 = vpop.eup %2643  ;;  %v1882_v6 = vadd.f32 %v1850_v61, %v1818_v19  ;;  %v1591_v7 = vmul.f32 %v3227_v43, %v1590_v59  ;;  %v1677_v8 = vmul.f32 %v3263_v4, %v3229_v48  ;;  %vm1683_vm13 = vweird.f32 %v3263_v4  ;;  %v1795_v61 = vld [vmem:[%s2925_s14 + $0x88] sm:$0xff] }
 0x2ba   : > { %v3274_v10 = vpop.eup %2645  ;;  %v1874_v14 = vadd.f32 %v1842_v42, %v1810_v31  ;;  %v1671_v25 = vmul.f32 %v3233_v56, %v1670_v5  ;;  %v1597_v19 = vmul.f32 %v3268_v41, %v3231_v50  ;;  %2647 = vrsqrt.f32 %v3266_v24  ;;  %vm1684_vm0 = vmor %vm1682_vm12, %vm1683_vm13 }
 0x2bb   : > { %1914 = vst [vmem:[%s2935_s27 + $0x40] sm:$0xff] %v1882_v6  ;;  %v1595_v26 = vsel %vm1594_vm9, %v3227_v43, %v1591_v7  ;;  %v1678_v16 = vmul.f32 %v3263_v4, %v1677_v8  ;;  %v1437_v29 = vmul.f32 %v3274_v10, %v3242_v2  ;;  %v1349_v43 = vpop.xlane.xlu0 %1348  ;;  %vm1603_vm14 = vweird.f32 %v3268_v41 }
 0x2bc   : > { %1906 = vst [vmem:[%s2935_s27] sm:$0xff] %v1874_v14  ;;  %v1762_v23 = vmul.f32 %v1595_v26, %v3053_v45  ;;  %v1675_v30 = vsel %vm1674_vm11, %v3233_v56, %v1671_v25  ;;  %v1598_v31 = vmul.f32 %v3268_v41, %v1597_v19  ;;  %v3300_v45 = vmax.f32 %v1335_v62, 1e-24  ;;  %v1779_v25 = vld [vmem:[%s2925_s14 + $0x8] sm:$0xff]  ;;  %vm1604_vm2 = vmor %vm1602_vm1, %vm1603_vm14 }
 0x2bd   : > { %v1770_v34 = vmul.f32 %v1675_v30, %v3055_v46  ;;  %v1679_v37 = vmul.f32 0.5, %v1678_v16  ;;  %v1438_v40 = vmul.f32 %v3274_v10, %v1437_v29  ;;  %v3302_v5 = vmax.f32 %v1349_v43, 1e-24 }
 0x2be   : > { %v1858_v58 = vmul.f32 0.33333334, %v1762_v23  ;;  %v1599_v59 = vmul.f32 0.5, %v1598_v31  ;;  %vm1443_vm15 = vweird.f32 %v3274_v10  ;;  %2649 = vrsqrt.f32 %v3300_v45  ;;  %v1780_v31 = vld [vmem:[%s2925_s14 + $0x10] sm:$0xff] }
 0x2bf   : > { %v1866_v56 = vmul.f32 0.33333334, %v1770_v34  ;;  %v1680_v22 = vsub.f32 1.5, %v1679_v37  ;;  %v1439_v42 = vmul.f32 0.5, %v1438_v40  ;;  %v1353_v46 = vpop.xlane.xlu2 %1352  ;;  %v1351_v8 = vpop.xlane.xlu1 %1350  ;;  %2651 = vrsqrt.f32 %v3302_v5  ;;  %vm1444_vm4 = vmor %vm1442_vm3, %vm1443_vm15 }
 0x2c0   : > { %v1890_v6 = vadd.f32 %v1858_v58, %v1826_v44  ;;  %v1600_v7 = vsub.f32 1.5, %v1599_v59  ;;  %v3309_v26 = vpop.eup %2647  ;;  %v1827_v44 = vmul.f32 0.33333334, %v1795_v61  ;;  %v3319_v29 = vmax.f32 %v1353_v46, 1e-24 }
 0x2c1   : > { %v1898_v14 = vadd.f32 %v1866_v56, %v1834_v55  ;;  %v1681_v62 = vmul.f32 %v3263_v4, %v1680_v22  ;;  %v1440_v19 = vsub.f32 1.5, %v1439_v42  ;;  %v1804_v55 = vld [vmem:[%s2925_s14 + $0xd0] sm:$0xff]  ;;  %v1687_v48 = vmul.f32 %v3309_v26, %v3266_v24  ;;  %v1787_v42 = vld [vmem:[%s2925_s14 + $0x48] sm:$0xff] }
 0x2c2   : > { %1922 = vst [vmem:[%s2935_s27 + $0x80] sm:$0xff] %v1890_v6  ;;  %v1601_v16 = vmul.f32 %v3268_v41, %v1600_v7  ;;  %v1811_v34 = vmul.f32 0.33333334, %v1779_v25  ;;  %2653 = vrsqrt.f32 %v3319_v29  ;;  %v3337_v2 = vmul.f32 0.33333334, %v1804_v55 }
 0x2c3   : > { %1930 = vst [vmem:[%s2935_s27 + $0xc0] sm:$0xff] %v1898_v14  ;;  %v1685_v23 = vsel %vm1684_vm0, %v3263_v4, %v1681_v62  ;;  %v1441_v30 = vmul.f32 %v3274_v10, %v1440_v19  ;;  %v1688_v40 = vmul.f32 %v3309_v26, %v1687_v48  ;;  %v3343_v61 = vmul.f32 0.33333334, %v1780_v31  ;;  %v1367_v46 = vpop.xlane.xlu0 %1366 }
 0x2c4   : > { %v1771_v43 = vmul.f32 %v1685_v23, %v3073_v54  ;;  %v1605_v50 = vsel %vm1604_vm2, %v3268_v41, %v1601_v16  ;;  %v3340_v58 = vpop.eup %2649  ;;  %v3345_v59 = vmax.f32 %v1351_v8, 1e-24  ;;  %vm1692_vm5 = vweird.f32 %v3266_v24 }
 0x2c5   : > { %v1763_v4 = vmul.f32 %v1605_v50, %v3071_v53  ;;  %v1445_v37 = vsel %vm1444_vm4, %v3274_v10, %v1441_v30  ;;  %v3347_v56 = vpop.eup %2651  ;;  %v1689_v53 = vmul.f32 0.5, %v1688_v40  ;;  %v1447_v10 = vmul.f32 %v3340_v58, %v3300_v45  ;;  %v1789_v50 = vld [vmem:[%s2925_s14 + $0x58] sm:$0xff] }
 0x2c6   : > { %v1867_v54 = vmul.f32 0.33333334, %v1771_v43  ;;  %v1747_v41 = vmul.f32 %v1445_v37, %v3057_v47  ;;  %vm1693_vm6 = vweird.f32 %v3309_v26  ;;  %v1517_v7 = vmul.f32 %v3347_v56, %v3302_v5 }
 0x2c7   : > { %v1859_v22 = vmul.f32 0.33333334, %v1763_v4  ;;  %v1690_v14 = vsub.f32 1.5, %v1689_v53  ;;  %v1448_v62 = vmul.f32 %v3340_v58, %v1447_v10  ;;  %2655 = vrsqrt.f32 %v3345_v59  ;;  %v1337_v23 = vpop.xlane.xlu1 %1336  ;;  %v1339_v31 = vpop.xlane.xlu2 %1338  ;;  %vm1694_vm8 = vmor %vm1692_vm5, %vm1693_vm6 }
 0x2c8   : > { %v1899_v6 = vadd.f32 %v1867_v54, %v3261_v12  ;;  %v1843_v47 = vmul.f32 0.33333334, %v1747_v41  ;;  %v3359_v25 = vpop.eup %2653  ;;  %v3362_v16 = vmul.f32 0.33333334, %v1787_v42  ;;  %v1518_v12 = vmul.f32 %v3347_v56, %v1517_v7 }
 0x2c9   : > { %v1891_v8 = vadd.f32 %v1859_v22, %v1827_v44  ;;  %v3365_v55 = vmax.f32 %v1367_v46, 1e-24  ;;  %v1691_v44 = vmul.f32 %v3309_v26, %v1690_v14  ;;  %v1449_v30 = vmul.f32 0.5, %v1448_v62  ;;  %v1788_v46 = vld [vmem:[%s2925_s14 + $0x50] sm:$0xff] }
 0x2ca   : > { %1931 = vst [vmem:[%s2935_s27 + $0xc8] sm:$0xff] %v1899_v6  ;;  %v1875_v19 = vadd.f32 %v1843_v47, %v1811_v34  ;;  %vm1452_vm7 = vweird.f32 %v3300_v45  ;;  %v1537_v48 = vmul.f32 %v3359_v25, %v3319_v29  ;;  %vm1453_vm9 = vweird.f32 %v3340_v58 }
 0x2cb   : > { %1923 = vst [vmem:[%s2935_s27 + $0x88] sm:$0xff] %v1891_v8  ;;  %v1519_v43 = vmul.f32 0.5, %v1518_v12  ;;  %vm1522_vm10 = vweird.f32 %v3302_v5  ;;  %2657 = vrsqrt.f32 %v3365_v55  ;;  %v1695_v34 = vsel %vm1694_vm8, %v3309_v26, %v1691_v44  ;;  %vm1454_vm12 = vmor %vm1452_vm7, %vm1453_vm9  ;;  %v1796_v8 = vld [vmem:[%s2925_s14 + $0x90] sm:$0xff]  ;;  %v1385_v12 = vpop.xlane.xlu0 %1384 }
 0x2cc   : > { %1907 = vst [vmem:[%s2935_s27 + $0x8] sm:$0xff] %v1875_v19  ;;  %v1450_v4 = vsub.f32 1.5, %v1449_v30  ;;  %v1538_v37 = vmul.f32 %v3359_v25, %v1537_v48  ;;  %v3383_v40 = vmax.f32 %v1337_v23, 1e-24  ;;  %v1772_v54 = vmul.f32 %v1695_v34, %v3093_v63 }
 0x2cd   : > { %v1520_v24 = vsub.f32 1.5, %v1519_v43  ;;  %vm1523_vm11 = vweird.f32 %v3347_v56  ;;  %v3387_v41 = vmax.f32 %v1339_v31, 1e-24  ;;  %v3389_v22 = vpop.eup %2655  ;;  %v1821_v10 = vmul.f32 0.33333334, %v1789_v50 }
 0x2ce   : > { %v1451_v53 = vmul.f32 %v3340_v58, %v1450_v4  ;;  %v1539_v26 = vmul.f32 0.5, %v1538_v37  ;;  %2659 = vrsqrt.f32 %v3383_v40  ;;  %v1868_v42 = vmul.f32 0.33333334, %v1772_v54  ;;  %vm1524_vm14 = vmor %vm1522_vm10, %vm1523_vm11 }
 0x2cf   : > { %v1521_v63 = vmul.f32 %v3347_v56, %v1520_v24  ;;  %vm1542_vm13 = vweird.f32 %v3319_v29  ;;  %v1527_v6 = vmul.f32 %v3389_v22, %v3345_v59  ;;  %vm1543_vm15 = vweird.f32 %v3359_v25  ;;  %v1369_v34 = vpop.xlane.xlu1 %1368 }
 0x2d0   : > { %v1455_v47 = vsel %vm1454_vm12, %v3340_v58, %v1451_v53  ;;  %v1540_v7 = vsub.f32 1.5, %v1539_v26  ;;  %2661 = vrsqrt.f32 %v3387_v41  ;;  %v1900_v14 = vadd.f32 %v1868_v42, %v3337_v2  ;;  %vm1544_vm0 = vmor %vm1542_vm13, %vm1543_vm15 }
 0x2d1   : > { %v3408_v45 = vpop.eup %2657  ;;  %v1748_v62 = vmul.f32 %v1455_v47, %v3079_v57  ;;  %v1525_v19 = vsel %vm1524_vm14, %v3347_v56, %v1521_v63  ;;  %v1528_v58 = vmul.f32 %v3389_v22, %v1527_v6  ;;  %v1820_v44 = vmul.f32 0.33333334, %v1788_v46  ;;  %v1371_v63 = vpop.xlane.xlu2 %1370 }
 0x2d2   : > { %v1755_v5 = vmul.f32 %v1525_v19, %v3061_v49  ;;  %v1541_v23 = vmul.f32 %v3359_v25, %v1540_v7  ;;  %v1607_v30 = vmul.f32 %v3408_v45, %v3365_v55  ;;  %1932 = vst [vmem:[%s2935_s27 + $0xd0] sm:$0xff] %v1900_v14  ;;  %vm1533_vm1 = vweird.f32 %v3389_v22 }
 0x2d3   : > { %v1844_v48 = vmul.f32 0.33333334, %v1748_v62  ;;  %v1529_v57 = vmul.f32 0.5, %v1528_v58  ;;  %v3424_v2 = vmul.f32 0.33333334, %v1796_v8  ;;  %vm1532_vm2 = vweird.f32 %v3345_v59 }
 0x2d4   : > { %v3426_v49 = vpop.eup %2659  ;;  %v1851_v56 = vmul.f32 0.33333334, %v1755_v5  ;;  %v1545_v31 = vsel %vm1544_vm0, %v3359_v25, %v1541_v23  ;;  %v1608_v43 = vmul.f32 %v3408_v45, %v1607_v30  ;;  %v3430_v50 = vmax.f32 %v1385_v12, 1e-24  ;;  %vm1534_vm3 = vmor %vm1532_vm2, %vm1533_vm1  ;;  %v1781_v5 = vld [vmem:[%s2925_s14 + $0x18] sm:$0xff] }
 0x2d5   : > { %v1876_v29 = vadd.f32 %v1844_v48, %v3343_v61  ;;  %v1757_v4 = vmul.f32 %v1545_v31, %v3101_v3  ;;  %v1530_v37 = vsub.f32 1.5, %v1529_v57  ;;  %v1457_v54 = vmul.f32 %v3426_v49, %v3383_v40 }
 0x2d6   : > { %v3436_v24 = vpop.eup %2661  ;;  %v1883_v53 = vadd.f32 %v1851_v56, %v3362_v16  ;;  %v1609_v25 = vmul.f32 0.5, %v1608_v43  ;;  %2663 = vrsqrt.f32 %v3430_v50  ;;  %vm1612_vm4 = vweird.f32 %v3365_v55 }
 0x2d7   : > { %1908 = vst [vmem:[%s2935_s27 + $0x10] sm:$0xff] %v1876_v29  ;;  %v1853_v26 = vmul.f32 0.33333334, %v1757_v4  ;;  %v1531_v42 = vmul.f32 %v3389_v22, %v1530_v37  ;;  %v1458_v61 = vmul.f32 %v3426_v49, %v1457_v54  ;;  %v1467_v3 = vmul.f32 %v3436_v24, %v3387_v41 }
 0x2d8   : > { %1915 = vst [vmem:[%s2935_s27 + $0x48] sm:$0xff] %v1883_v53  ;;  %v1610_v16 = vsub.f32 1.5, %v1609_v25  ;;  %vm1613_vm5 = vweird.f32 %v3408_v45  ;;  %vm1462_vm6 = vweird.f32 %v3383_v40  ;;  %vm1472_vm7 = vweird.f32 %v3387_v41  ;;  %v1805_v41 = vld [vmem:[%s2925_s14 + $0xd8] sm:$0xff] }
 0x2d9   : > { %v1885_v59 = vadd.f32 %v1853_v26, %v1821_v10  ;;  %v1535_v46 = vsel %vm1534_vm3, %v3389_v22, %v1531_v42  ;;  %v1459_v6 = vmul.f32 0.5, %v1458_v61  ;;  %v1468_v47 = vmul.f32 %v3436_v24, %v1467_v3  ;;  %vm1614_vm8 = vmor %vm1612_vm4, %vm1613_vm5  ;;  %v1355_v22 = vpop.xlane.xlu0 %1354  ;;  %v1341_v54 = vpop.xlane.xlu2 %1340 }
 0x2da   : > { %v1756_v7 = vmul.f32 %v1535_v46, %v3085_v60  ;;  %v1611_v8 = vmul.f32 %v3408_v45, %v1610_v16  ;;  %v3457_v14 = vmax.f32 %v1369_v34, 1e-24  ;;  %vm1463_vm9 = vweird.f32 %v3426_v49 }
 0x2db   : > { %1917 = vst [vmem:[%s2935_s27 + $0x58] sm:$0xff] %v1885_v59  ;;  %v1460_v55 = vsub.f32 1.5, %v1459_v6  ;;  %v1469_v10 = vmul.f32 0.5, %v1468_v47  ;;  %v3461_v62 = vmax.f32 %v1371_v63, 1e-24  ;;  %vm1473_vm10 = vweird.f32 %v3436_v24  ;;  %vm1464_vm11 = vmor %vm1462_vm6, %vm1463_vm9  ;;  %v1798_v6 = vld [vmem:[%s2925_s14 + $0xa0] sm:$0xff] }
 0x2dc   : > { %v3463_v19 = vpop.eup %2663  ;;  %v1852_v60 = vmul.f32 0.33333334, %v1756_v7  ;;  %v1615_v58 = vsel %vm1614_vm8, %v3408_v45, %v1611_v8  ;;  %2665 = vrsqrt.f32 %v3457_v14  ;;  %v1387_v45 = vpop.xlane.xlu1 %1386  ;;  %vm1474_vm12 = vmor %vm1472_vm7, %vm1473_vm10  ;;  %v3488_v40 = vmax.f32 %v1355_v22, 1e-24 }
 0x2dd   : > { %v1764_v12 = vmul.f32 %v1615_v58, %v3095_v0  ;;  %v1461_v23 = vmul.f32 %v3426_v49, %v1460_v55  ;;  %v1470_v30 = vsub.f32 1.5, %v1469_v10  ;;  %v1697_v48 = vmul.f32 %v3463_v19, %v3430_v50  ;;  %v1782_v0 = vld [vmem:[%s2925_s14 + $0x20] sm:$0xff] }
 0x2de   : > { %v1884_v57 = vadd.f32 %v1852_v60, %v1820_v44  ;;  %2667 = vrsqrt.f32 %v3461_v62  ;;  %v1813_v44 = vmul.f32 0.33333334, %v1781_v5  ;;  %v1814_v26 = vmul.f32 0.33333334, %v1782_v0 }
 0x2df   : > { %v1860_v56 = vmul.f32 0.33333334, %v1764_v12  ;;  %v1465_v31 = vsel %vm1464_vm11, %v3426_v49, %v1461_v23  ;;  %v1471_v43 = vmul.f32 %v3436_v24, %v1470_v30  ;;  %v1698_v34 = vmul.f32 %v3463_v19, %v1697_v48 }
 0x2e0   : > { %1916 = vst [vmem:[%s2935_s27 + $0x50] sm:$0xff] %v1884_v57  ;;  %v1749_v29 = vmul.f32 %v1465_v31, %v3097_v1  ;;  %2669 = vrsqrt.f32 %v3488_v40  ;;  %vm1703_vm13 = vweird.f32 %v3463_v19  ;;  %v3502_v61 = vmax.f32 %v1387_v45, 1e-24  ;;  %v1790_v57 = vld [vmem:[%s2925_s14 + $0x60] sm:$0xff] }
 0x2e1   : > { %v1892_v49 = vadd.f32 %v1860_v56, %v3424_v2  ;;  %v1475_v4 = vsel %vm1474_vm12, %v3436_v24, %v1471_v43  ;;  %v1699_v37 = vmul.f32 0.5, %v1698_v34  ;;  %v1797_v2 = vld [vmem:[%s2925_s14 + $0x98] sm:$0xff]  ;;  %vm1702_vm14 = vweird.f32 %v3430_v50  ;;  %v1373_v7 = vpop.xlane.xlu0 %1372  ;;  %v1806_v56 = vld [vmem:[%s2925_s14 + $0xe0] sm:$0xff] }
 0x2e2   : > { %v3492_v53 = vpop.eup %2665  ;;  %v1845_v25 = vmul.f32 0.33333334, %v1749_v29  ;;  %v1750_v1 = vmul.f32 %v1475_v4, %v3123_v13  ;;  %v3506_v13 = vmax.f32 %v1341_v54, 1e-24  ;;  %v1837_v55 = vmul.f32 0.33333334, %v1805_v41  ;;  %vm1704_vm15 = vmor %vm1702_vm14, %vm1703_vm13 }
 0x2e3   : > { %1924 = vst [vmem:[%s2935_s27 + $0x90] sm:$0xff] %v1892_v49  ;;  %v1700_v42 = vsub.f32 1.5, %v1699_v37  ;;  %v1617_v24 = vmul.f32 %v3492_v53, %v3457_v14  ;;  %v1829_v10 = vmul.f32 0.33333334, %v1797_v2  ;;  %2671 = vrsqrt.f32 %v3502_v61 }
 0x2e4   : > { %v3504_v3 = vpop.eup %2667  ;;  %v1877_v63 = vadd.f32 %v1845_v25, %v1813_v44  ;;  %v1846_v16 = vmul.f32 0.33333334, %v1750_v1  ;;  %2673 = vrsqrt.f32 %v3506_v13  ;;  %vm1622_vm0 = vweird.f32 %v3457_v14  ;;  %v1357_v30 = vpop.xlane.xlu1 %1356 }
 0x2e5   : > { %v1701_v59 = vmul.f32 %v3463_v19, %v1700_v42  ;;  %v1618_v46 = vmul.f32 %v3492_v53, %v1617_v24  ;;  %v1627_v47 = vmul.f32 %v3504_v3, %v3461_v62  ;;  %v1830_v5 = vmul.f32 0.33333334, %v1798_v6  ;;  %v1359_v44 = vpop.xlane.xlu2 %1358  ;;  %v1783_v42 = vld [vmem:[%s2925_s14 + $0x28] sm:$0xff] }
 0x2e6   : > { %1909 = vst [vmem:[%s2935_s27 + $0x18] sm:$0xff] %v1877_v63  ;;  %v1878_v8 = vadd.f32 %v1846_v16, %v1814_v26  ;;  %v3521_v58 = vpop.eup %2669  ;;  %v3526_v23 = vmax.f32 %v1373_v7, 1e-24  ;;  %vm1623_vm1 = vweird.f32 %v3492_v53  ;;  %vm1632_vm2 = vweird.f32 %v3461_v62 }
 0x2e7   : > { %v1705_v50 = vsel %vm1704_vm15, %v3463_v19, %v1701_v59  ;;  %v1619_v22 = vmul.f32 0.5, %v1618_v46  ;;  %v1628_v60 = vmul.f32 %v3504_v3, %v1627_v47  ;;  %v1547_v45 = vmul.f32 %v3521_v58, %v3488_v40  ;;  %vm1624_vm4 = vmor %vm1622_vm0, %vm1623_vm1 }
 0x2e8   : > { %1910 = vst [vmem:[%s2935_s27 + $0x20] sm:$0xff] %v1878_v8  ;;  %v1773_v12 = vmul.f32 %v1705_v50, %v3115_v9  ;;  %vm1633_vm3 = vweird.f32 %v3504_v3  ;;  %2675 = vrsqrt.f32 %v3526_v23  ;;  %v3538_v34 = vmax.f32 %v1357_v30, 1e-24 }
 0x2e9   : > { %v1620_v48 = vsub.f32 1.5, %v1619_v22  ;;  %v1629_v19 = vmul.f32 0.5, %v1628_v60  ;;  %v1548_v43 = vmul.f32 %v3521_v58, %v1547_v45  ;;  %v3540_v29 = vpop.eup %2671  ;;  %v3546_v4 = vmul.f32 0.33333334, %v1790_v57  ;;  %vm1634_vm6 = vmor %vm1632_vm2, %vm1633_vm3  ;;  %v1343_v47 = vpop.xlane.xlu0 %1342 }
 0x2ea   : > { %v1869_v31 = vmul.f32 0.33333334, %v1773_v12  ;;  %vm1552_vm5 = vweird.f32 %v3488_v40  ;;  %v3549_v37 = vmul.f32 0.33333334, %v1806_v56  ;;  %v3551_v54 = vpop.eup %2673  ;;  %v1707_v41 = vmul.f32 %v3540_v29, %v3502_v61 }
 0x2eb   : > { %v1621_v9 = vmul.f32 %v3492_v53, %v1620_v48  ;;  %v1630_v0 = vsub.f32 1.5, %v1629_v19  ;;  %v1549_v1 = vmul.f32 0.5, %v1548_v43  ;;  %vm1553_vm7 = vweird.f32 %v3521_v58 }
 0x2ec   : > { %v1901_v49 = vadd.f32 %v1869_v31, %v1837_v55  ;;  %v3567_v2 = vmax.f32 %v1359_v44, 1e-24  ;;  %v1708_v16 = vmul.f32 %v3540_v29, %v1707_v41  ;;  %2677 = vrsqrt.f32 %v3538_v34  ;;  %vm1554_vm9 = vmor %vm1552_vm5, %vm1553_vm7  ;;  %v1375_v30 = vpop.xlane.xlu1 %1374 }
 0x2ed   : > { %v1625_v25 = vsel %vm1624_vm4, %v3492_v53, %v1621_v9  ;;  %v1631_v26 = vmul.f32 %v3504_v3, %v1630_v0  ;;  %v1477_v53 = vmul.f32 %v3551_v54, %v3506_v13  ;;  %v1550_v63 = vsub.f32 1.5, %v1549_v1  ;;  %v1377_v56 = vpop.xlane.xlu2 %1376 }
 0x2ee   : > { %1933 = vst [vmem:[%s2935_s27 + $0xd8] sm:$0xff] %v1901_v49  ;;  %v1765_v14 = vmul.f32 %v1625_v25, %v3119_v11  ;;  %v3572_v11 = vpop.eup %2675  ;;  %v3575_v46 = vmul.f32 0.33333334, %v1783_v42  ;;  %v1709_v8 = vmul.f32 0.5, %v1708_v16  ;;  %vm1713_vm8 = vweird.f32 %v3540_v29 }
 0x2ef   : > { %v1635_v24 = vsel %vm1634_vm6, %v3504_v3, %v1631_v26  ;;  %v1478_v6 = vmul.f32 %v3551_v54, %v1477_v53  ;;  %v1551_v7 = vmul.f32 %v3521_v58, %v1550_v63  ;;  %v1637_v3 = vmul.f32 %v3572_v11, %v3526_v23 }
 0x2f0   : > { %v1861_v59 = vmul.f32 0.33333334, %v1765_v14  ;;  %v1766_v62 = vmul.f32 %v1635_v24, %v3133_v17  ;;  %2679 = vrsqrt.f32 %v3567_v2  ;;  %v1710_v60 = vsub.f32 1.5, %v1709_v8  ;;  %v1791_v8 = vld [vmem:[%s2925_s14 + $0x68] sm:$0xff] }
 0x2f1   : > { %v1479_v17 = vmul.f32 0.5, %v1478_v6  ;;  %v1555_v22 = vsel %vm1554_vm9, %v3521_v58, %v1551_v7  ;;  %vm1483_vm10 = vweird.f32 %v3551_v54  ;;  %v1638_v12 = vmul.f32 %v3572_v11, %v1637_v3 }
 0x2f2   : > { %v1893_v55 = vadd.f32 %v1861_v59, %v1829_v10  ;;  %v1862_v50 = vmul.f32 0.33333334, %v1766_v62  ;;  %v1758_v48 = vmul.f32 %v1555_v22, %v3127_v15  ;;  %v3592_v40 = vmax.f32 %v1343_v47, 1e-24  ;;  %v3594_v57 = vpop.eup %2677 }
 0x2f3   : > { %v1480_v19 = vsub.f32 1.5, %v1479_v17  ;;  %v1711_v45 = vmul.f32 %v3540_v29, %v1710_v60  ;;  %vm1712_vm11 = vweird.f32 %v3502_v61  ;;  %vm1482_vm12 = vweird.f32 %v3506_v13  ;;  %v1799_v61 = vld [vmem:[%s2925_s14 + $0xa8] sm:$0xff] }
 0x2f4   : > { %1925 = vst [vmem:[%s2935_s27 + $0x98] sm:$0xff] %v1893_v55  ;;  %v1894_v10 = vadd.f32 %v1862_v50, %v1830_v5  ;;  %v1639_v58 = vmul.f32 0.5, %v1638_v12  ;;  %v1854_v31 = vmul.f32 0.33333334, %v1758_v48  ;;  %vm1714_vm13 = vmor %vm1712_vm11, %vm1713_vm8  ;;  %v1557_v5 = vmul.f32 %v3594_v57, %v3538_v34 }
 0x2f5   : > { %v1481_v15 = vmul.f32 %v3551_v54, %v1480_v19  ;;  %v3605_v9 = vmax.f32 %v1375_v30, 1e-24  ;;  %v1715_v0 = vsel %vm1714_vm13, %v3540_v29, %v1711_v45  ;;  %vm1484_vm14 = vmor %vm1482_vm12, %vm1483_vm10  ;;  %vm1643_vm15 = vweird.f32 %v3572_v11  ;;  %v1389_v55 = vpop.xlane.xlu2 %1388 }
 0x2f6   : > { %1926 = vst [vmem:[%s2935_s27 + $0xa0] sm:$0xff] %v1894_v10  ;;  %v1640_v13 = vsub.f32 1.5, %v1639_v58  ;;  %2681 = vrsqrt.f32 %v3592_v40  ;;  %v3613_v43 = vpop.eup %2679  ;;  %v1886_v44 = vadd.f32 %v1854_v31, %v3546_v4  ;;  %v1774_v49 = vmul.f32 %v1715_v0, %v3135_v18  ;;  %v1361_v18 = vpop.xlane.xlu0 %1360 }
 0x2f7   : > { %v1485_v25 = vsel %vm1484_vm14, %v3551_v54, %v1481_v15  ;;  %v1558_v26 = vmul.f32 %v3594_v57, %v1557_v5  ;;  %vm1642_vm0 = vweird.f32 %v3526_v23  ;;  %v1567_v41 = vmul.f32 %v3613_v43, %v3567_v2 }
 0x2f8   : > { %v1751_v29 = vmul.f32 %v1485_v25, %v3139_v20  ;;  %v1641_v1 = vmul.f32 %v3572_v11, %v1640_v13  ;;  %1918 = vst [vmem:[%s2935_s27 + $0x60] sm:$0xff] %v1886_v44  ;;  %v1870_v42 = vmul.f32 0.33333334, %v1774_v49  ;;  %v1831_v14 = vmul.f32 0.33333334, %v1799_v61  ;;  %vm1644_vm1 = vmor %vm1642_vm0, %vm1643_vm15 }
 0x2f9   : > { %v1559_v4 = vmul.f32 0.5, %v1558_v26  ;;  %2683 = vrsqrt.f32 %v3605_v9  ;;  %vm1563_vm2 = vweird.f32 %v3594_v57  ;;  %v1568_v23 = vmul.f32 %v3613_v43, %v1567_v41  ;;  %v1800_v26 = vld [vmem:[%s2925_s14 + $0xb0] sm:$0xff] }
 0x2fa   : > { %v1847_v54 = vmul.f32 0.33333334, %v1751_v29  ;;  %v1645_v20 = vsel %vm1644_vm1, %v3572_v11, %v1641_v1  ;;  %v1902_v53 = vadd.f32 %v1870_v42, %v3549_v37  ;;  %v3631_v16 = vmax.f32 %v1377_v56, 1e-24  ;;  %v1345_v11 = vpop.xlane.xlu1 %1344  ;;  %v1792_v37 = vld [vmem:[%s2925_s14 + $0x70] sm:$0xff] }
 0x2fb   : > { %v1767_v24 = vmul.f32 %v1645_v20, %v3155_v27  ;;  %v1560_v63 = vsub.f32 1.5, %v1559_v4  ;;  %v1569_v6 = vmul.f32 0.5, %v1568_v23  ;;  %v3636_v47 = vmax.f32 %v1361_v18, 1e-24  ;;  %v1784_v56 = vld [vmem:[%s2925_s14 + $0x30] sm:$0xff] }
 0x2fc   : > { %v3633_v59 = vpop.eup %2681  ;;  %v1879_v62 = vadd.f32 %v1847_v54, %v3575_v46  ;;  %1934 = vst [vmem:[%s2935_s27 + $0xe0] sm:$0xff] %v1902_v53  ;;  %vm1562_vm3 = vweird.f32 %v3538_v34  ;;  %vm1572_vm5 = vweird.f32 %v3567_v2  ;;  %vm1573_vm6 = vweird.f32 %v3613_v43 }
 0x2fd   : > { %v1863_v7 = vmul.f32 0.33333334, %v1767_v24  ;;  %v1561_v3 = vmul.f32 %v3594_v57, %v1560_v63  ;;  %v1487_v27 = vmul.f32 %v3633_v59, %v3592_v40  ;;  %vm1564_vm4 = vmor %vm1562_vm3, %vm1563_vm2  ;;  %v1570_v46 = vsub.f32 1.5, %v1569_v6 }
 0x2fe   : > { %1911 = vst [vmem:[%s2935_s27 + $0x28] sm:$0xff] %v1879_v62  ;;  %2685 = vrsqrt.f32 %v3631_v16  ;;  %v1823_v60 = vmul.f32 0.33333334, %v1791_v8  ;;  %v1824_v48 = vmul.f32 0.33333334, %v1792_v37  ;;  %vm1574_vm7 = vmor %vm1572_vm5, %vm1573_vm6  ;;  %vm1492_vm8 = vweird.f32 %v3592_v40  ;;  %v1391_v25 = vpop.xlane.xlu0 %1390 }
 0x2ff   : > { %v2684_v50 = vpop.eup %2683  ;;  %v1895_v34 = vadd.f32 %v1863_v7, %v1831_v14  ;;  %v1565_v17 = vsel %vm1564_vm4, %v3594_v57, %v1561_v3  ;;  %v1488_v22 = vmul.f32 %v3633_v59, %v1487_v27  ;;  %2687 = vrsqrt.f32 %v3636_v47  ;;  %v1801_v3 = vld [vmem:[%s2925_s14 + $0xb8] sm:$0xff] }
 0x300   : > { %v1759_v12 = vmul.f32 %v1565_v17, %v3141_v21  ;;  %v1571_v30 = vmul.f32 %v3613_v43, %v1570_v46  ;;  %v1647_v10 = vmul.f32 %v2684_v50, %v3605_v9  ;;  %v3660_v45 = vmax.f32 %v1389_v55, 1e-24 }
 0x301   : > { %1927 = vst [vmem:[%s2935_s27 + $0xa8] sm:$0xff] %v1895_v34  ;;  %v1489_v19 = vmul.f32 0.5, %v1488_v22  ;;  %vm1493_vm9 = vweird.f32 %v3633_v59  ;;  %v3670_v61 = vmax.f32 %v1345_v11, 1e-24  ;;  %v1816_v44 = vmul.f32 0.33333334, %v1784_v56 }
 0x302   : > { %v1855_v57 = vmul.f32 0.33333334, %v1759_v12  ;;  %v1575_v58 = vsel %vm1574_vm7, %v3613_v43, %v1571_v30  ;;  %v1648_v21 = vmul.f32 %v2684_v50, %v1647_v10  ;;  %2689 = vrsqrt.f32 %v3660_v45  ;;  %vm1494_vm10 = vmor %vm1492_vm8, %vm1493_vm9  ;;  %v1393_v41 = vpop.xlane.xlu1 %1392 }
 0x303   : > { %v1760_v31 = vmul.f32 %v1575_v58, %v3167_v33  ;;  %v1490_v15 = vsub.f32 1.5, %v1489_v19  ;;  %vm1653_vm11 = vweird.f32 %v2684_v50  ;;  %2691 = vrsqrt.f32 %v3670_v61 }
 0x304   : > { %v3668_v2 = vpop.eup %2685  ;;  %v1887_v5 = vadd.f32 %v1855_v57, %v1823_v60  ;;  %v1649_v0 = vmul.f32 0.5, %v1648_v21  ;;  %vm1652_vm12 = vweird.f32 %v3605_v9  ;;  %v3689_v20 = vmax.f32 %v1391_v25, 1e-24 }
 0x305   : > { %v3672_v13 = vpop.eup %2687  ;;  %v1856_v43 = vmul.f32 0.33333334, %v1760_v31  ;;  %v1491_v49 = vmul.f32 %v3633_v59, %v1490_v15  ;;  %v1657_v33 = vmul.f32 %v3668_v2, %v3631_v16  ;;  %v1832_v53 = vmul.f32 0.33333334, %v1800_v26  ;;  %vm1654_vm13 = vmor %vm1652_vm12, %vm1653_vm11 }
 0x306   : > { %1919 = vst [vmem:[%s2935_s27 + $0x68] sm:$0xff] %v1887_v5  ;;  %v1650_v29 = vsub.f32 1.5, %v1649_v0  ;;  %v1577_v1 = vmul.f32 %v3672_v13, %v3636_v47  ;;  %v3693_v63 = vmax.f32 %v1393_v41, 1e-24  ;;  %vm1663_vm14 = vweird.f32 %v3668_v2 }
 0x307   : > { %v1888_v42 = vadd.f32 %v1856_v43, %v1824_v48  ;;  %v1495_v14 = vsel %vm1494_vm10, %v3633_v59, %v1491_v49  ;;  %v1658_v4 = vmul.f32 %v3668_v2, %v1657_v33  ;;  %2693 = vrsqrt.f32 %v3689_v20  ;;  %v1807_v48 = vld [vmem:[%s2925_s14 + $0xe8] sm:$0xff]  ;;  %v1785_v33 = vld [vmem:[%s2925_s14 + $0x38] sm:$0xff] }
 0x308   : > { %v1752_v40 = vmul.f32 %v1495_v14, %v3165_v32  ;;  %v1651_v18 = vmul.f32 %v2684_v50, %v1650_v29  ;;  %v1578_v54 = vmul.f32 %v3672_v13, %v1577_v1  ;;  %v2690_v23 = vpop.eup %2689  ;;  %vm1583_vm15 = vweird.f32 %v3672_v13 }
 0x309   : > { %1920 = vst [vmem:[%s2935_s27 + $0x70] sm:$0xff] %v1888_v42  ;;  %v1659_v24 = vmul.f32 0.5, %v1658_v4  ;;  %v1717_v32 = vmul.f32 %v2690_v23, %v3660_v45  ;;  %v2692_v7 = vpop.eup %2691  ;;  %vm1662_vm0 = vweird.f32 %v3631_v16  ;;  %vm1582_vm2 = vweird.f32 %v3636_v47 }
 0x30a   : > { %v1848_v59 = vmul.f32 0.33333334, %v1752_v40  ;;  %v1655_v9 = vsel %vm1654_vm13, %v2684_v50, %v1651_v18  ;;  %v1579_v62 = vmul.f32 0.5, %v1578_v54  ;;  %vm1664_vm1 = vmor %vm1662_vm0, %vm1663_vm14  ;;  %v1793_v50 = vld [vmem:[%s2925_s14 + $0x78] sm:$0xff]  ;;  %2695 = vrsqrt.f32 %v3693_v63  ;;  %v1808_v18 = vld [vmem:[%s2925_s14 + $0xf0] sm:$0xff] }
 0x30b   : > { %v1768_v6 = vmul.f32 %v1655_v9, %v3173_v35  ;;  %v1660_v11 = vsub.f32 1.5, %v1659_v24  ;;  %v1718_v37 = vmul.f32 %v2690_v23, %v1717_v32  ;;  %v1497_v35 = vmul.f32 %v2692_v7, %v3670_v61  ;;  %vm1584_vm3 = vmor %vm1582_vm2, %vm1583_vm15  ;;  %v1809_v9 = vld [vmem:[%s2925_s14 + $0xf8] sm:$0xff] }
 0x30c   : > { %v1880_v8 = vadd.f32 %v1848_v59, %v1816_v44  ;;  %v1580_v27 = vsub.f32 1.5, %v1579_v62  ;;  %v1833_v60 = vmul.f32 0.33333334, %v1801_v3  ;;  %vm1723_vm4 = vweird.f32 %v2690_v23 }
 0x30d   : > { %v1864_v46 = vmul.f32 0.33333334, %v1768_v6  ;;  %v1661_v55 = vmul.f32 %v3668_v2, %v1660_v11  ;;  %v1719_v17 = vmul.f32 0.5, %v1718_v37  ;;  %v1498_v16 = vmul.f32 %v2692_v7, %v1497_v35  ;;  %v2694_v57 = vpop.eup %2693 }
 0x30e   : > { %1912 = vst [vmem:[%s2935_s27 + $0x30] sm:$0xff] %v1880_v8  ;;  %v1581_v34 = vmul.f32 %v3672_v13, %v1580_v27  ;;  %v1825_v47 = vmul.f32 0.33333334, %v1793_v50  ;;  %vm1722_vm5 = vweird.f32 %v3660_v45  ;;  %v1727_v15 = vmul.f32 %v2694_v57, %v3689_v20 }
 0x30f   : > { %v1896_v22 = vadd.f32 %v1864_v46, %v1832_v53  ;;  %v1665_v12 = vsel %vm1664_vm1, %v3668_v2, %v1661_v55  ;;  %v1720_v19 = vsub.f32 1.5, %v1719_v17  ;;  %v1499_v56 = vmul.f32 0.5, %v1498_v16  ;;  %vm1724_vm6 = vmor %vm1722_vm5, %vm1723_vm4 }
 0x310   : > { %v1769_v30 = vmul.f32 %v1665_v12, %v3195_v51  ;;  %v1585_v10 = vsel %vm1584_vm3, %v3672_v13, %v1581_v34  ;;  %v1839_v2 = vmul.f32 0.33333334, %v1807_v48  ;;  %vm1503_vm7 = vweird.f32 %v2692_v7  ;;  %v2696_v0 = vpop.eup %2695 }
 0x311   : > { %1928 = vst [vmem:[%s2935_s27 + $0xb0] sm:$0xff] %v1896_v22  ;;  %v1761_v58 = vmul.f32 %v1585_v10, %v3181_v39  ;;  %v1721_v31 = vmul.f32 %v2690_v23, %v1720_v19  ;;  %v1500_v5 = vsub.f32 1.5, %v1499_v56  ;;  %vm1502_vm8 = vweird.f32 %v3670_v61 }
 0x312   : > { %v1865_v21 = vmul.f32 0.33333334, %v1769_v30  ;;  %v1728_v39 = vmul.f32 %v2694_v57, %v1727_v15  ;;  %v1737_v25 = vmul.f32 %v2696_v0, %v3693_v63  ;;  %vm1504_vm9 = vmor %vm1502_vm8, %vm1503_vm7  ;;  %v1817_v42 = vmul.f32 0.33333334, %v1785_v33 }
 0x313   : > { %v1857_v51 = vmul.f32 0.33333334, %v1761_v58  ;;  %v1725_v43 = vsel %vm1724_vm6, %v2690_v23, %v1721_v31  ;;  %v1501_v45 = vmul.f32 %v2692_v7, %v1500_v5  ;;  %vm1733_vm10 = vweird.f32 %v2694_v57 }
 0x314   : > { %v1897_v13 = vadd.f32 %v1865_v21, %v1833_v60  ;;  %v1775_v49 = vmul.f32 %v1725_v43, %v3157_v28  ;;  %v1729_v26 = vmul.f32 0.5, %v1728_v39  ;;  %v1738_v41 = vmul.f32 %v2696_v0, %v1737_v25 }
 0x315   : > { %v1889_v44 = vadd.f32 %v1857_v51, %v1825_v47  ;;  %v1505_v1 = vsel %vm1504_vm9, %v2692_v7, %v1501_v45  ;;  %vm1732_vm11 = vweird.f32 %v3689_v20  ;;  %vm1743_vm13 = vweird.f32 %v2696_v0 }
 0x316   : > { %1929 = vst [vmem:[%s2935_s27 + $0xb8] sm:$0xff] %v1897_v13  ;;  %v1871_v29 = vmul.f32 0.33333334, %v1775_v49  ;;  %v1753_v61 = vmul.f32 %v1505_v1, %v3179_v38  ;;  %v1730_v14 = vsub.f32 1.5, %v1729_v26  ;;  %v1739_v4 = vmul.f32 0.5, %v1738_v41  ;;  %vm1734_vm12 = vmor %vm1732_vm11, %vm1733_vm10 }
 0x317   : > { %1921 = vst [vmem:[%s2935_s27 + $0x78] sm:$0xff] %v1889_v44  ;;  %v1840_v38 = vmul.f32 0.33333334, %v1808_v18  ;;  %vm1742_vm14 = vweird.f32 %v3693_v63  ;;  %v1841_v20 = vmul.f32 0.33333334, %v1809_v9 }
 0x318   : > { %v1903_v28 = vadd.f32 %v1871_v29, %v1839_v2  ;;  %v1849_v40 = vmul.f32 0.33333334, %v1753_v61  ;;  %v1731_v54 = vmul.f32 %v2694_v57, %v1730_v14  ;;  %v1740_v23 = vsub.f32 1.5, %v1739_v4  ;;  %vm1744_vm15 = vmor %vm1742_vm14, %vm1743_vm13 }
 0x31a   : > { %1935 = vst [vmem:[%s2935_s27 + $0xe8] sm:$0xff] %v1903_v28  ;;  %v1881_v53 = vadd.f32 %v1849_v40, %v1817_v42  ;;  %v1735_v24 = vsel %vm1734_vm12, %v2694_v57, %v1731_v54  ;;  %v1741_v62 = vmul.f32 %v2696_v0, %v1740_v23 }
 0x31b   : > { %v1776_v59 = vmul.f32 %v1735_v24, %v3175_v36 }
 0x31c   : > { %1913 = vst [vmem:[%s2935_s27 + $0x38] sm:$0xff] %v1881_v53  ;;  %v1745_v6 = vsel %vm1744_vm15, %v2696_v0, %v1741_v62 }
 0x31d   : > { %v1872_v32 = vmul.f32 0.33333334, %v1776_v59  ;;  %v1777_v11 = vmul.f32 %v1745_v6, %v3197_v52 }
 0x31f   : > { %v1904_v7 = vadd.f32 %v1872_v32, %v1840_v38  ;;  %v1873_v8 = vmul.f32 0.33333334, %v1777_v11 }
 0x321   : > { %1936 = vst [vmem:[%s2935_s27 + $0xf0] sm:$0xff] %v1904_v7  ;;  %v1905_v3 = vadd.f32 %v1873_v8, %v1841_v20 }
 0x323   : > { %1937 = vst [vmem:[%s2935_s27 + $0xf8] sm:$0xff] %v1905_v3 }
 0x324 PF: > { %s16_s24 = sadd.s32 1, %s2751_s24   ;;  %s3765_s18 = smov %s2731_s19 }
 0x325   : > { %p13_p0 = scmp.ge.s32.totalorder %s16_s24, 18   ;;  %s3766_s19 = smov %s2835_s6 }
 0x326   : > { %s3767_s20 = smov %s2743_s22  ;;  %s3768_s21 = smov %s2747_s23 }
 0x327   : > { %s3769_s22 = smov %s3772_s25  ;;  %s3770_s23 = smov %s3776_s26 }
 0x328   :  { %15 = sbr.rel (!%p13_p0) target bundleno = 4 (0x4), region = 135 }

</bundles_post_ra>
